<compile_context>
chip_gen: v6e
topology: v6e:2x2x1
jax: 0.10.0
libtpu: 0.0.40
codegen_flags: <defaults>
</compile_context>

<pallas_src>
import jax
import jax.numpy as jnp
from jax.experimental import pallas as pl
from jax.experimental.pallas import tpu as pltpu

# ----------------------------- problem sizes --------------------------------
B = 8    # batch
T = 6    # target (decode) length
S = 8    # source length (context length)
E = 32   # word_vec_size
D = 32   # rnn_size / hidden_size
L = 2    # opt.layers (hard-wired to 2 in the kernel body)
V = 50   # vocab size

NEG_BIG = -1e30  # finite "−inf" for masked attention scores


# ------------------------------ Pallas kernel -------------------------------
def decoder_kernel(
    # inputs
    emb_ref, ctx_ref, mask_ref, init_out_ref, h0_ref, c0_ref,
    wih0e_ref, wih0f_ref, whh0_ref, b0_ref,
    wih1_ref, whh1_ref, b1_ref,
    win_ref, woutc_ref, wouth_ref,
    # outputs
    out_ref, attn_ref, hN_ref, cN_ref,
):
    # Everything is tiny (<100 KB total) and fully VMEM-resident; load once.
    ctx = ctx_ref[...]          # (B, S, D)
    mask = mask_ref[...]        # (B, S)
    wih0f = wih0f_ref[...]      # (D, 4D)
    whh0 = whh0_ref[...]        # (D, 4D)
    wih1 = wih1_ref[...]        # (D, 4D)
    whh1 = whh1_ref[...]        # (D, 4D)
    b1 = b1_ref[...]            # (1, 4D)
    win = win_ref[...]          # (D, D)
    woutc = woutc_ref[...]      # (D, D)
    wouth = wouth_ref[...]      # (D, D)

    # Hoist the recurrence-independent embedding projection for ALL steps off
    # the critical path: one (T*B, E) x (E, 4D) matmul, layer-0 bias folded in.
    emb_g = (
        jnp.dot(emb_ref[...], wih0e_ref[...], preferred_element_type=jnp.float32)
        + b0_ref[...]
    )                           # (T*B, 4D)

    # Loop-carried state in vregs (no VMEM scratch round-trips).
    h0 = h0_ref[0]              # (B, D)
    h1 = h0_ref[1]
    c0 = c0_ref[0]
    c1 = c0_ref[1]
    feed = init_out_ref[...]    # (B, D)  input-feed

    def lstm_cell(gates, c_prev):
        # gates is a full (B, 4D) = (8, 128) vreg: one sigmoid pass + one tanh
        # pass over the whole vreg (2 EUP pushes per cell), then lane-slice.
        sig = jax.nn.sigmoid(gates)
        th = jnp.tanh(gates)
        i = sig[:, 0 * D:1 * D]
        f = sig[:, 1 * D:2 * D]
        g = th[:, 2 * D:3 * D]
        o = sig[:, 3 * D:4 * D]
        c_new = f * c_prev + i * g
        h_new = o * jnp.tanh(c_new)
        return h_new, c_new

    outs = []
    attn_last = None
    for t in range(T):          # T is a static Python constant -> fully unrolled
        eg_t = emb_g[t * B:(t + 1) * B, :]                       # (B, 4D)

        # ---- StackedLSTM layer 0: input = cat([emb_t, feed]) (emb part hoisted)
        gates0 = (
            eg_t
            + jnp.dot(feed, wih0f, preferred_element_type=jnp.float32)
            + jnp.dot(h0, whh0, preferred_element_type=jnp.float32)
        )
        h0, c0 = lstm_cell(gates0, c0)

        # ---- StackedLSTM layer 1 (inter-layer dropout = identity in eval mode)
        gates1 = (
            jnp.dot(h0, wih1, preferred_element_type=jnp.float32)
            + jnp.dot(h1, whh1, preferred_element_type=jnp.float32)
            + b1
        )
        h1, c1 = lstm_cell(gates1, c1)
        rnn_out = h1                                             # (B, D)

        # ---- GlobalAttention (Luong "general")
        target = jnp.dot(rnn_out, win, preferred_element_type=jnp.float32)
        scores = jnp.sum(ctx * target[:, None, :], axis=-1) + mask   # (B, S)
        scores = scores - jnp.max(scores, axis=-1, keepdims=True)
        p = jnp.exp(scores)
        attn = p / jnp.sum(p, axis=-1, keepdims=True)                # softmax
        wctx = jnp.sum(attn[:, :, None] * ctx, axis=1)               # (B, D)
        out_t = jnp.tanh(
            jnp.dot(wctx, woutc, preferred_element_type=jnp.float32)
            + jnp.dot(rnn_out, wouth, preferred_element_type=jnp.float32)
        )
        # output dropout = identity in eval mode

        feed = out_t
        outs.append(out_t)
        attn_last = attn

    # Single slab writeback after the unrolled loop (no per-step tiny stores,
    # attn written once — only the last step's attention is returned).
    out_ref[...] = jnp.concatenate(outs, axis=0).astype(out_ref.dtype)  # (T*B, D)
    attn_ref[...] = attn_last.astype(attn_ref.dtype)
    hN_ref[0] = h0
    hN_ref[1] = h1
    cN_ref[0] = c0
    cN_ref[1] = c1


# ------------------------------- wrapper -------------------------------------
def decoder_forward(input_ids, hidden, context, k, init_output, params):
    """input_ids: (B, T) int32; hidden = (h0, c0) each (L, B, D);
    context: (S, B, D); k: (B,) int32 source lengths; init_output: (B, D)."""
    h0, c0 = hidden
    # glue: embedding lookup + layout prep (pure layout plumbing)
    emb = params["embedding"][input_ids]                     # (B, T, E)
    emb = jnp.transpose(emb, (1, 0, 2)).reshape(T * B, E)    # time-major, flat
    ctx = jnp.transpose(context, (1, 0, 2))                  # (B, S, D)
    mask_bias = jnp.where(
        jnp.arange(S)[None, :] >= k[:, None], NEG_BIG, 0.0
    ).astype(jnp.float32)                                    # (B, S)

    # pre-transposed weights so the kernel does x @ W
    wih0e = params["W_ih0"][:, :E].T                         # (E, 4D)
    wih0f = params["W_ih0"][:, E:].T                         # (D, 4D)
    whh0 = params["W_hh0"].T                                 # (D, 4D)
    b0 = (params["b_ih0"] + params["b_hh0"])[None, :]        # (1, 4D)
    wih1 = params["W_ih1"].T                                 # (D, 4D)
    whh1 = params["W_hh1"].T
    b1 = (params["b_ih1"] + params["b_hh1"])[None, :]
    win = params["W_in"].T                                   # (D, D)
    woutc = params["W_out"][:, :D].T                         # (D, D) weightedContext
    wouth = params["W_out"][:, D:].T                         # (D, D) rnn output

    vmem = pl.BlockSpec(memory_space=pltpu.MemorySpace.VMEM)

    out_flat, attn, hN, cN = pl.pallas_call(
        decoder_kernel,
        out_shape=(
            jax.ShapeDtypeStruct((T * B, D), jnp.float32),   # outputs (time-major, flat)
            jax.ShapeDtypeStruct((B, S), jnp.float32),       # final attn
            jax.ShapeDtypeStruct((L, B, D), jnp.float32),    # h_T
            jax.ShapeDtypeStruct((L, B, D), jnp.float32),    # c_T
        ),
        in_specs=[vmem] * 16,
        out_specs=(vmem, vmem, vmem, vmem),
    )(
        emb, ctx, mask_bias, init_output, h0, c0,
        wih0e, wih0f, whh0, b0, wih1, whh1, b1, win, woutc, wouth,
    )

    outputs = jnp.transpose(out_flat.reshape(T, B, D), (1, 0, 2))  # (B, T, D)
    return outputs, (hN, cN), attn


# ---------------------------- pure-JAX reference -----------------------------
def reference_forward(input_ids, hidden, context, k, init_output, params):
    h0, c0 = hidden
    emb = jnp.transpose(params["embedding"][input_ids], (1, 0, 2))  # (T,B,E)
    ctx = jnp.transpose(context, (1, 0, 2))                          # (B,S,D)
    mask = jnp.arange(S)[None, :] >= k[:, None]

    def cell(x, h, c, W_ih, W_hh, b_ih, b_hh):
        g = x @ W_ih.T + h @ W_hh.T + b_ih + b_hh
        i, f, gg, o = jnp.split(g, 4, axis=1)
        c_new = jax.nn.sigmoid(f) * c + jax.nn.sigmoid(i) * jnp.tanh(gg)
        h_new = jax.nn.sigmoid(o) * jnp.tanh(c_new)
        return h_new, c_new

    h = [h0[0], h0[1]]
    c = [c0[0], c0[1]]
    feed = init_output
    outs = []
    for t in range(T):
        x = jnp.concatenate([emb[t], feed], axis=1)
        h[0], c[0] = cell(x, h[0], c[0], params["W_ih0"], params["W_hh0"],
                          params["b_ih0"], params["b_hh0"])
        h[1], c[1] = cell(h[0], h[1], c[1], params["W_ih1"], params["W_hh1"],
                          params["b_ih1"], params["b_hh1"])
        rnn_out = h[1]
        target = rnn_out @ params["W_in"].T
        scores = jnp.einsum("bsd,bd->bs", ctx, target)
        scores = jnp.where(mask, -jnp.inf, scores)
        attn = jax.nn.softmax(scores, axis=-1)
        wctx = jnp.einsum("bs,bsd->bd", attn, ctx)
        out = jnp.tanh(jnp.concatenate([wctx, rnn_out], axis=1) @ params["W_out"].T)
        feed = out
        outs.append(out)
    outputs = jnp.transpose(jnp.stack(outs), (1, 0, 2))
    return outputs, (jnp.stack(h), jnp.stack(c)), attn


# ----------------------------------- main ------------------------------------
def _uniform(key, shape, scale=0.1):
    return jax.random.uniform(key, shape, jnp.float32, -scale, scale)


if __name__ == "__main__":
    root = jax.random.PRNGKey(0)
    keys = jax.random.split(root, 20)

    # deterministic parameters (shapes from Decoder.__init__)
    embedding = _uniform(keys[0], (V, E))
    embedding = embedding.at[0].set(0.0)            # padding_idx = PAD = 0
    params = {
        "embedding": embedding,
        # StackedLSTM layer 0: LSTMCell(E + D, D)
        "W_ih0": _uniform(keys[1], (4 * D, E + D)),
        "W_hh0": _uniform(keys[2], (4 * D, D)),
        "b_ih0": _uniform(keys[3], (4 * D,)),
        "b_hh0": _uniform(keys[4], (4 * D,)),
        # StackedLSTM layer 1: LSTMCell(D, D)
        "W_ih1": _uniform(keys[5], (4 * D, D)),
        "W_hh1": _uniform(keys[6], (4 * D, D)),
        "b_ih1": _uniform(keys[7], (4 * D,)),
        "b_hh1": _uniform(keys[8], (4 * D,)),
        # GlobalAttention: linear_in(D, D, bias=False), linear_out(2D, D, bias=False)
        "W_in": _uniform(keys[9], (D, D)),
        "W_out": _uniform(keys[10], (D, 2 * D)),
    }

    # deterministic inputs
    input_ids = jax.random.randint(keys[11], (B, T), 0, V)
    input_ids = input_ids.at[1, -1].set(0)          # a PAD token
    h0 = _uniform(keys[12], (L, B, D), 0.5)
    c0 = _uniform(keys[13], (L, B, D), 0.5)
    context = _uniform(keys[14], (S, B, D), 0.5)    # encoder states (S, B, D)
    init_output = _uniform(keys[15], (B, D), 0.5)
    k = jnp.array([8, 5, 6, 8, 3, 7, 8, 4], dtype=jnp.int32)  # source lengths

    outputs, (hN, cN), attn = jax.block_until_ready(
        decoder_forward(input_ids, (h0, c0), context, k, init_output, params)
    )

    ref_out, (ref_h, ref_c), ref_attn = reference_forward(
        input_ids, (h0, c0), context, k, init_output, params
    )

    assert outputs.shape == (B, T, D) and attn.shape == (B, S)
    assert jnp.allclose(outputs, ref_out, atol=2e-3, rtol=2e-3)
    assert jnp.allclose(attn, ref_attn, atol=2e-3, rtol=2e-3)
    assert jnp.allclose(hN, ref_h, atol=2e-3, rtol=2e-3)
    assert jnp.allclose(cN, ref_c, atol=2e-3, rtol=2e-3)

    print("KERNEL_OK")
</pallas_src>

<mosaic_0001>
module attributes {stable_mosaic.version = 11 : i64} {
  func.func @decoder_kernel(%arg0: memref<48x32xf32, #tpu.memory_space<vmem>>, %arg1: memref<8x8x32xf32, #tpu.memory_space<vmem>>, %arg2: memref<8x8xf32, #tpu.memory_space<vmem>>, %arg3: memref<8x32xf32, #tpu.memory_space<vmem>>, %arg4: memref<2x8x32xf32, #tpu.memory_space<vmem>>, %arg5: memref<2x8x32xf32, #tpu.memory_space<vmem>>, %arg6: memref<32x128xf32, #tpu.memory_space<vmem>>, %arg7: memref<32x128xf32, #tpu.memory_space<vmem>>, %arg8: memref<32x128xf32, #tpu.memory_space<vmem>>, %arg9: memref<1x128xf32, #tpu.memory_space<vmem>>, %arg10: memref<32x128xf32, #tpu.memory_space<vmem>>, %arg11: memref<32x128xf32, #tpu.memory_space<vmem>>, %arg12: memref<1x128xf32, #tpu.memory_space<vmem>>, %arg13: memref<32x32xf32, #tpu.memory_space<vmem>>, %arg14: memref<32x32xf32, #tpu.memory_space<vmem>>, %arg15: memref<32x32xf32, #tpu.memory_space<vmem>>, %arg16: memref<48x32xf32, #tpu.memory_space<vmem>>, %arg17: memref<8x8xf32, #tpu.memory_space<vmem>>, %arg18: memref<2x8x32xf32, #tpu.memory_space<vmem>>, %arg19: memref<2x8x32xf32, #tpu.memory_space<vmem>>) attributes {dimension_semantics = [], scalar_prefetch = 0 : i64, scratch_operands = 0 : i64, tpu.core_type = #tpu.core_type<tc>} {
    %c0 = arith.constant 0 : index
    %c0_0 = arith.constant 0 : index
    %c0_1 = arith.constant 0 : index
    %0 = vector.load %arg1[%c0, %c0_0, %c0_1] : memref<8x8x32xf32, #tpu.memory_space<vmem>>, vector<8x8x32xf32>
    %c0_2 = arith.constant 0 : index
    %c0_3 = arith.constant 0 : index
    %1 = vector.load %arg2[%c0_2, %c0_3] : memref<8x8xf32, #tpu.memory_space<vmem>>, vector<8x8xf32>
    %c0_4 = arith.constant 0 : index
    %c0_5 = arith.constant 0 : index
    %2 = vector.load %arg7[%c0_4, %c0_5] : memref<32x128xf32, #tpu.memory_space<vmem>>, vector<32x128xf32>
    %c0_6 = arith.constant 0 : index
    %c0_7 = arith.constant 0 : index
    %3 = vector.load %arg8[%c0_6, %c0_7] : memref<32x128xf32, #tpu.memory_space<vmem>>, vector<32x128xf32>
    %c0_8 = arith.constant 0 : index
    %c0_9 = arith.constant 0 : index
    %4 = vector.load %arg10[%c0_8, %c0_9] : memref<32x128xf32, #tpu.memory_space<vmem>>, vector<32x128xf32>
    %c0_10 = arith.constant 0 : index
    %c0_11 = arith.constant 0 : index
    %5 = vector.load %arg11[%c0_10, %c0_11] : memref<32x128xf32, #tpu.memory_space<vmem>>, vector<32x128xf32>
    %c0_12 = arith.constant 0 : index
    %c0_13 = arith.constant 0 : index
    %6 = vector.load %arg12[%c0_12, %c0_13] : memref<1x128xf32, #tpu.memory_space<vmem>>, vector<1x128xf32>
    %c0_14 = arith.constant 0 : index
    %c0_15 = arith.constant 0 : index
    %7 = vector.load %arg13[%c0_14, %c0_15] : memref<32x32xf32, #tpu.memory_space<vmem>>, vector<32x32xf32>
    %c0_16 = arith.constant 0 : index
    %c0_17 = arith.constant 0 : index
    %8 = vector.load %arg14[%c0_16, %c0_17] : memref<32x32xf32, #tpu.memory_space<vmem>>, vector<32x32xf32>
    %c0_18 = arith.constant 0 : index
    %c0_19 = arith.constant 0 : index
    %9 = vector.load %arg15[%c0_18, %c0_19] : memref<32x32xf32, #tpu.memory_space<vmem>>, vector<32x32xf32>
    %c0_20 = arith.constant 0 : index
    %c0_21 = arith.constant 0 : index
    %10 = vector.load %arg0[%c0_20, %c0_21] : memref<48x32xf32, #tpu.memory_space<vmem>>, vector<48x32xf32>
    %c0_22 = arith.constant 0 : index
    %c0_23 = arith.constant 0 : index
    %11 = vector.load %arg6[%c0_22, %c0_23] : memref<32x128xf32, #tpu.memory_space<vmem>>, vector<32x128xf32>
    %cst = arith.constant dense<0.000000e+00> : vector<48x128xf32>
    %12 = tpu.matmul %10, %11, %cst {dimension_numbers = #tpu.dot_dimension_numbers<[1], [0], [0], [1], [0, 0, 1, 1], [], []>} : vector<48x32xf32>, vector<32x128xf32>, vector<48x128xf32> -> vector<48x128xf32>
    %c0_24 = arith.constant 0 : index
    %c0_25 = arith.constant 0 : index
    %13 = vector.load %arg9[%c0_24, %c0_25] : memref<1x128xf32, #tpu.memory_space<vmem>>, vector<1x128xf32>
    %14 = vector.broadcast %13 : vector<1x128xf32> to vector<48x128xf32>
    %15 = arith.addf %12, %14 : vector<48x128xf32>
    %c0_26 = arith.constant 0 : index
    %c0_27 = arith.constant 0 : index
    %c0_28 = arith.constant 0 : index
    %16 = vector.load %arg4[%c0_26, %c0_27, %c0_28] : memref<2x8x32xf32, #tpu.memory_space<vmem>>, vector<1x8x32xf32>
    %17 = vector.shape_cast %16 : vector<1x8x32xf32> to vector<8x32xf32>
    %c1 = arith.constant 1 : index
    %c0_29 = arith.constant 0 : index
    %c0_30 = arith.constant 0 : index
    %18 = vector.load %arg4[%c1, %c0_29, %c0_30] : memref<2x8x32xf32, #tpu.memory_space<vmem>>, vector<1x8x32xf32>
    %19 = vector.shape_cast %18 : vector<1x8x32xf32> to vector<8x32xf32>
    %c0_31 = arith.constant 0 : index
    %c0_32 = arith.constant 0 : index
    %c0_33 = arith.constant 0 : index
    %20 = vector.load %arg5[%c0_31, %c0_32, %c0_33] : memref<2x8x32xf32, #tpu.memory_space<vmem>>, vector<1x8x32xf32>
    %21 = vector.shape_cast %20 : vector<1x8x32xf32> to vector<8x32xf32>
    %c1_34 = arith.constant 1 : index
    %c0_35 = arith.constant 0 : index
    %c0_36 = arith.constant 0 : index
    %22 = vector.load %arg5[%c1_34, %c0_35, %c0_36] : memref<2x8x32xf32, #tpu.memory_space<vmem>>, vector<1x8x32xf32>
    %23 = vector.shape_cast %22 : vector<1x8x32xf32> to vector<8x32xf32>
    %c0_37 = arith.constant 0 : index
    %c0_38 = arith.constant 0 : index
    %24 = vector.load %arg3[%c0_37, %c0_38] : memref<8x32xf32, #tpu.memory_space<vmem>>, vector<8x32xf32>
    %25 = vector.extract_strided_slice %15 {offsets = [0, 0], sizes = [8, 128], strides = [1, 1]} : vector<48x128xf32> to vector<8x128xf32>
    %cst_39 = arith.constant dense<0.000000e+00> : vector<8x128xf32>
    %26 = tpu.matmul %24, %2, %cst_39 {dimension_numbers = #tpu.dot_dimension_numbers<[1], [0], [0], [1], [0, 0, 1, 1], [], []>} : vector<8x32xf32>, vector<32x128xf32>, vector<8x128xf32> -> vector<8x128xf32>
    %27 = arith.addf %25, %26 : vector<8x128xf32>
    %cst_40 = arith.constant dense<0.000000e+00> : vector<8x128xf32>
    %28 = tpu.matmul %17, %3, %cst_40 {dimension_numbers = #tpu.dot_dimension_numbers<[1], [0], [0], [1], [0, 0, 1, 1], [], []>} : vector<8x32xf32>, vector<32x128xf32>, vector<8x128xf32> -> vector<8x128xf32>
    %29 = arith.addf %27, %28 : vector<8x128xf32>
    %30 = arith.negf %29 : vector<8x128xf32>
    %31 = math.exp %30 : vector<8x128xf32>
    %cst_41 = arith.constant 1.000000e+00 : f32
    %32 = vector.broadcast %cst_41 : f32 to vector<8x128xf32>
    %33 = arith.addf %32, %31 : vector<8x128xf32>
    %34 = arith.divf %32, %33 : vector<8x128xf32>
    %35 = math.tanh %29 : vector<8x128xf32>
    %36 = vector.extract_strided_slice %34 {offsets = [0, 0], sizes = [8, 32], strides = [1, 1]} : vector<8x128xf32> to vector<8x32xf32>
    %37 = vector.extract_strided_slice %34 {offsets = [0, 32], sizes = [8, 32], strides = [1, 1]} : vector<8x128xf32> to vector<8x32xf32>
    %38 = vector.extract_strided_slice %35 {offsets = [0, 64], sizes = [8, 32], strides = [1, 1]} : vector<8x128xf32> to vector<8x32xf32>
    %39 = vector.extract_strided_slice %34 {offsets = [0, 96], sizes = [8, 32], strides = [1, 1]} : vector<8x128xf32> to vector<8x32xf32>
    %40 = arith.mulf %37, %21 : vector<8x32xf32>
    %41 = arith.mulf %36, %38 : vector<8x32xf32>
    %42 = arith.addf %40, %41 : vector<8x32xf32>
    %43 = math.tanh %42 : vector<8x32xf32>
    %44 = arith.mulf %39, %43 : vector<8x32xf32>
    %cst_42 = arith.constant dense<0.000000e+00> : vector<8x128xf32>
    %45 = tpu.matmul %44, %4, %cst_42 {dimension_numbers = #tpu.dot_dimension_numbers<[1], [0], [0], [1], [0, 0, 1, 1], [], []>} : vector<8x32xf32>, vector<32x128xf32>, vector<8x128xf32> -> vector<8x128xf32>
    %cst_43 = arith.constant dense<0.000000e+00> : vector<8x128xf32>
    %46 = tpu.matmul %19, %5, %cst_43 {dimension_numbers = #tpu.dot_dimension_numbers<[1], [0], [0], [1], [0, 0, 1, 1], [], []>} : vector<8x32xf32>, vector<32x128xf32>, vector<8x128xf32> -> vector<8x128xf32>
    %47 = arith.addf %45, %46 : vector<8x128xf32>
    %48 = vector.broadcast %6 : vector<1x128xf32> to vector<8x128xf32>
    %49 = arith.addf %47, %48 : vector<8x128xf32>
    %50 = arith.negf %49 : vector<8x128xf32>
    %51 = math.exp %50 : vector<8x128xf32>
    %cst_44 = arith.constant 1.000000e+00 : f32
    %52 = vector.broadcast %cst_44 : f32 to vector<8x128xf32>
    %53 = arith.addf %52, %51 : vector<8x128xf32>
    %54 = arith.divf %52, %53 : vector<8x128xf32>
    %55 = math.tanh %49 : vector<8x128xf32>
    %56 = vector.extract_strided_slice %54 {offsets = [0, 0], sizes = [8, 32], strides = [1, 1]} : vector<8x128xf32> to vector<8x32xf32>
    %57 = vector.extract_strided_slice %54 {offsets = [0, 32], sizes = [8, 32], strides = [1, 1]} : vector<8x128xf32> to vector<8x32xf32>
    %58 = vector.extract_strided_slice %55 {offsets = [0, 64], sizes = [8, 32], strides = [1, 1]} : vector<8x128xf32> to vector<8x32xf32>
    %59 = vector.extract_strided_slice %54 {offsets = [0, 96], sizes = [8, 32], strides = [1, 1]} : vector<8x128xf32> to vector<8x32xf32>
    %60 = arith.mulf %57, %23 : vector<8x32xf32>
    %61 = arith.mulf %56, %58 : vector<8x32xf32>
    %62 = arith.addf %60, %61 : vector<8x32xf32>
    %63 = math.tanh %62 : vector<8x32xf32>
    %64 = arith.mulf %59, %63 : vector<8x32xf32>
    %cst_45 = arith.constant dense<0.000000e+00> : vector<8x32xf32>
    %65 = tpu.matmul %64, %7, %cst_45 {dimension_numbers = #tpu.dot_dimension_numbers<[1], [0], [0], [1], [0, 0, 1, 1], [], []>} : vector<8x32xf32>, vector<32x32xf32>, vector<8x32xf32> -> vector<8x32xf32>
    %66 = vector.shape_cast %65 : vector<8x32xf32> to vector<8x1x32xf32>
    %67 = vector.broadcast %66 : vector<8x1x32xf32> to vector<8x8x32xf32>
    %68 = arith.mulf %0, %67 : vector<8x8x32xf32>
    %cst_46 = arith.constant dense<0.000000e+00> : vector<8x8xf32>
    %69 = vector.multi_reduction <add>, %68, %cst_46 [2] : vector<8x8x32xf32> to vector<8x8xf32>
    %70 = arith.addf %69, %1 : vector<8x8xf32>
    %cst_47 = arith.constant dense<0xFF800000> : vector<8xf32>
    %71 = vector.multi_reduction <maximumf>, %70, %cst_47 [1] : vector<8x8xf32> to vector<8xf32>
    %72 = vector.shape_cast %71 : vector<8xf32> to vector<8x1xf32>
    %73 = vector.broadcast %72 : vector<8x1xf32> to vector<8x8xf32>
    %74 = arith.subf %70, %73 : vector<8x8xf32>
    %75 = math.exp %74 : vector<8x8xf32>
    %cst_48 = arith.constant dense<0.000000e+00> : vector<8xf32>
    %76 = vector.multi_reduction <add>, %75, %cst_48 [1] : vector<8x8xf32> to vector<8xf32>
    %77 = vector.shape_cast %76 : vector<8xf32> to vector<8x1xf32>
    %78 = vector.broadcast %77 : vector<8x1xf32> to vector<8x8xf32>
    %79 = arith.divf %75, %78 : vector<8x8xf32>
    %80 = vector.shape_cast %79 : vector<8x8xf32> to vector<8x8x1xf32>
    %81 = vector.broadcast %80 : vector<8x8x1xf32> to vector<8x8x32xf32>
    %82 = arith.mulf %81, %0 : vector<8x8x32xf32>
    %cst_49 = arith.constant dense<0.000000e+00> : vector<8x32xf32>
    %83 = vector.multi_reduction <add>, %82, %cst_49 [1] : vector<8x8x32xf32> to vector<8x32xf32>
    %cst_50 = arith.constant dense<0.000000e+00> : vector<8x32xf32>
    %84 = tpu.matmul %83, %8, %cst_50 {dimension_numbers = #tpu.dot_dimension_numbers<[1], [0], [0], [1], [0, 0, 1, 1], [], []>} : vector<8x32xf32>, vector<32x32xf32>, vector<8x32xf32> -> vector<8x32xf32>
    %cst_51 = arith.constant dense<0.000000e+00> : vector<8x32xf32>
    %85 = tpu.matmul %64, %9, %cst_51 {dimension_numbers = #tpu.dot_dimension_numbers<[1], [0], [0], [1], [0, 0, 1, 1], [], []>} : vector<8x32xf32>, vector<32x32xf32>, vector<8x32xf32> -> vector<8x32xf32>
    %86 = arith.addf %84, %85 : vector<8x32xf32>
    %87 = math.tanh %86 : vector<8x32xf32>
    %88 = vector.extract_strided_slice %15 {offsets = [8, 0], sizes = [8, 128], strides = [1, 1]} : vector<48x128xf32> to vector<8x128xf32>
    %cst_52 = arith.constant dense<0.000000e+00> : vector<8x128xf32>
    %89 = tpu.matmul %87, %2, %cst_52 {dimension_numbers = #tpu.dot_dimension_numbers<[1], [0], [0], [1], [0, 0, 1, 1], [], []>} : vector<8x32xf32>, vector<32x128xf32>, vector<8x128xf32> -> vector<8x128xf32>
    %90 = arith.addf %88, %89 : vector<8x128xf32>
    %cst_53 = arith.constant dense<0.000000e+00> : vector<8x128xf32>
    %91 = tpu.matmul %44, %3, %cst_53 {dimension_numbers = #tpu.dot_dimension_numbers<[1], [0], [0], [1], [0, 0, 1, 1], [], []>} : vector<8x32xf32>, vector<32x128xf32>, vector<8x128xf32> -> vector<8x128xf32>
    %92 = arith.addf %90, %91 : vector<8x128xf32>
    %93 = arith.negf %92 : vector<8x128xf32>
    %94 = math.exp %93 : vector<8x128xf32>
    %cst_54 = arith.constant 1.000000e+00 : f32
    %95 = vector.broadcast %cst_54 : f32 to vector<8x128xf32>
    %96 = arith.addf %95, %94 : vector<8x128xf32>
    %97 = arith.divf %95, %96 : vector<8x128xf32>
    %98 = math.tanh %92 : vector<8x128xf32>
    %99 = vector.extract_strided_slice %97 {offsets = [0, 0], sizes = [8, 32], strides = [1, 1]} : vector<8x128xf32> to vector<8x32xf32>
    %100 = vector.extract_strided_slice %97 {offsets = [0, 32], sizes = [8, 32], strides = [1, 1]} : vector<8x128xf32> to vector<8x32xf32>
    %101 = vector.extract_strided_slice %98 {offsets = [0, 64], sizes = [8, 32], strides = [1, 1]} : vector<8x128xf32> to vector<8x32xf32>
    %102 = vector.extract_strided_slice %97 {offsets = [0, 96], sizes = [8, 32], strides = [1, 1]} : vector<8x128xf32> to vector<8x32xf32>
    %103 = arith.mulf %100, %42 : vector<8x32xf32>
    %104 = arith.mulf %99, %101 : vector<8x32xf32>
    %105 = arith.addf %103, %104 : vector<8x32xf32>
    %106 = math.tanh %105 : vector<8x32xf32>
    %107 = arith.mulf %102, %106 : vector<8x32xf32>
    %cst_55 = arith.constant dense<0.000000e+00> : vector<8x128xf32>
    %108 = tpu.matmul %107, %4, %cst_55 {dimension_numbers = #tpu.dot_dimension_numbers<[1], [0], [0], [1], [0, 0, 1, 1], [], []>} : vector<8x32xf32>, vector<32x128xf32>, vector<8x128xf32> -> vector<8x128xf32>
    %cst_56 = arith.constant dense<0.000000e+00> : vector<8x128xf32>
    %109 = tpu.matmul %64, %5, %cst_56 {dimension_numbers = #tpu.dot_dimension_numbers<[1], [0], [0], [1], [0, 0, 1, 1], [], []>} : vector<8x32xf32>, vector<32x128xf32>, vector<8x128xf32> -> vector<8x128xf32>
    %110 = arith.addf %108, %109 : vector<8x128xf32>
    %111 = vector.broadcast %6 : vector<1x128xf32> to vector<8x128xf32>
    %112 = arith.addf %110, %111 : vector<8x128xf32>
    %113 = arith.negf %112 : vector<8x128xf32>
    %114 = math.exp %113 : vector<8x128xf32>
    %cst_57 = arith.constant 1.000000e+00 : f32
    %115 = vector.broadcast %cst_57 : f32 to vector<8x128xf32>
    %116 = arith.addf %115, %114 : vector<8x128xf32>
    %117 = arith.divf %115, %116 : vector<8x128xf32>
    %118 = math.tanh %112 : vector<8x128xf32>
    %119 = vector.extract_strided_slice %117 {offsets = [0, 0], sizes = [8, 32], strides = [1, 1]} : vector<8x128xf32> to vector<8x32xf32>
    %120 = vector.extract_strided_slice %117 {offsets = [0, 32], sizes = [8, 32], strides = [1, 1]} : vector<8x128xf32> to vector<8x32xf32>
    %121 = vector.extract_strided_slice %118 {offsets = [0, 64], sizes = [8, 32], strides = [1, 1]} : vector<8x128xf32> to vector<8x32xf32>
    %122 = vector.extract_strided_slice %117 {offsets = [0, 96], sizes = [8, 32], strides = [1, 1]} : vector<8x128xf32> to vector<8x32xf32>
    %123 = arith.mulf %120, %62 : vector<8x32xf32>
    %124 = arith.mulf %119, %121 : vector<8x32xf32>
    %125 = arith.addf %123, %124 : vector<8x32xf32>
    %126 = math.tanh %125 : vector<8x32xf32>
    %127 = arith.mulf %122, %126 : vector<8x32xf32>
    %cst_58 = arith.constant dense<0.000000e+00> : vector<8x32xf32>
    %128 = tpu.matmul %127, %7, %cst_58 {dimension_numbers = #tpu.dot_dimension_numbers<[1], [0], [0], [1], [0, 0, 1, 1], [], []>} : vector<8x32xf32>, vector<32x32xf32>, vector<8x32xf32> -> vector<8x32xf32>
    %129 = vector.shape_cast %128 : vector<8x32xf32> to vector<8x1x32xf32>
    %130 = vector.broadcast %129 : vector<8x1x32xf32> to vector<8x8x32xf32>
    %131 = arith.mulf %0, %130 : vector<8x8x32xf32>
    %cst_59 = arith.constant dense<0.000000e+00> : vector<8x8xf32>
    %132 = vector.multi_reduction <add>, %131, %cst_59 [2] : vector<8x8x32xf32> to vector<8x8xf32>
    %133 = arith.addf %132, %1 : vector<8x8xf32>
    %cst_60 = arith.constant dense<0xFF800000> : vector<8xf32>
    %134 = vector.multi_reduction <maximumf>, %133, %cst_60 [1] : vector<8x8xf32> to vector<8xf32>
    %135 = vector.shape_cast %134 : vector<8xf32> to vector<8x1xf32>
    %136 = vector.broadcast %135 : vector<8x1xf32> to vector<8x8xf32>
    %137 = arith.subf %133, %136 : vector<8x8xf32>
    %138 = math.exp %137 : vector<8x8xf32>
    %cst_61 = arith.constant dense<0.000000e+00> : vector<8xf32>
    %139 = vector.multi_reduction <add>, %138, %cst_61 [1] : vector<8x8xf32> to vector<8xf32>
    %140 = vector.shape_cast %139 : vector<8xf32> to vector<8x1xf32>
    %141 = vector.broadcast %140 : vector<8x1xf32> to vector<8x8xf32>
    %142 = arith.divf %138, %141 : vector<8x8xf32>
    %143 = vector.shape_cast %142 : vector<8x8xf32> to vector<8x8x1xf32>
    %144 = vector.broadcast %143 : vector<8x8x1xf32> to vector<8x8x32xf32>
    %145 = arith.mulf %144, %0 : vector<8x8x32xf32>
    %cst_62 = arith.constant dense<0.000000e+00> : vector<8x32xf32>
    %146 = vector.multi_reduction <add>, %145, %cst_62 [1] : vector<8x8x32xf32> to vector<8x32xf32>
    %cst_63 = arith.constant dense<0.000000e+00> : vector<8x32xf32>
    %147 = tpu.matmul %146, %8, %cst_63 {dimension_numbers = #tpu.dot_dimension_numbers<[1], [0], [0], [1], [0, 0, 1, 1], [], []>} : vector<8x32xf32>, vector<32x32xf32>, vector<8x32xf32> -> vector<8x32xf32>
    %cst_64 = arith.constant dense<0.000000e+00> : vector<8x32xf32>
    %148 = tpu.matmul %127, %9, %cst_64 {dimension_numbers = #tpu.dot_dimension_numbers<[1], [0], [0], [1], [0, 0, 1, 1], [], []>} : vector<8x32xf32>, vector<32x32xf32>, vector<8x32xf32> -> vector<8x32xf32>
    %149 = arith.addf %147, %148 : vector<8x32xf32>
    %150 = math.tanh %149 : vector<8x32xf32>
    %151 = vector.extract_strided_slice %15 {offsets = [16, 0], sizes = [8, 128], strides = [1, 1]} : vector<48x128xf32> to vector<8x128xf32>
    %cst_65 = arith.constant dense<0.000000e+00> : vector<8x128xf32>
    %152 = tpu.matmul %150, %2, %cst_65 {dimension_numbers = #tpu.dot_dimension_numbers<[1], [0], [0], [1], [0, 0, 1, 1], [], []>} : vector<8x32xf32>, vector<32x128xf32>, vector<8x128xf32> -> vector<8x128xf32>
    %153 = arith.addf %151, %152 : vector<8x128xf32>
    %cst_66 = arith.constant dense<0.000000e+00> : vector<8x128xf32>
    %154 = tpu.matmul %107, %3, %cst_66 {dimension_numbers = #tpu.dot_dimension_numbers<[1], [0], [0], [1], [0, 0, 1, 1], [], []>} : vector<8x32xf32>, vector<32x128xf32>, vector<8x128xf32> -> vector<8x128xf32>
    %155 = arith.addf %153, %154 : vector<8x128xf32>
    %156 = arith.negf %155 : vector<8x128xf32>
    %157 = math.exp %156 : vector<8x128xf32>
    %cst_67 = arith.constant 1.000000e+00 : f32
    %158 = vector.broadcast %cst_67 : f32 to vector<8x128xf32>
    %159 = arith.addf %158, %157 : vector<8x128xf32>
    %160 = arith.divf %158, %159 : vector<8x128xf32>
    %161 = math.tanh %155 : vector<8x128xf32>
    %162 = vector.extract_strided_slice %160 {offsets = [0, 0], sizes = [8, 32], strides = [1, 1]} : vector<8x128xf32> to vector<8x32xf32>
    %163 = vector.extract_strided_slice %160 {offsets = [0, 32], sizes = [8, 32], strides = [1, 1]} : vector<8x128xf32> to vector<8x32xf32>
    %164 = vector.extract_strided_slice %161 {offsets = [0, 64], sizes = [8, 32], strides = [1, 1]} : vector<8x128xf32> to vector<8x32xf32>
    %165 = vector.extract_strided_slice %160 {offsets = [0, 96], sizes = [8, 32], strides = [1, 1]} : vector<8x128xf32> to vector<8x32xf32>
    %166 = arith.mulf %163, %105 : vector<8x32xf32>
    %167 = arith.mulf %162, %164 : vector<8x32xf32>
    %168 = arith.addf %166, %167 : vector<8x32xf32>
    %169 = math.tanh %168 : vector<8x32xf32>
    %170 = arith.mulf %165, %169 : vector<8x32xf32>
    %cst_68 = arith.constant dense<0.000000e+00> : vector<8x128xf32>
    %171 = tpu.matmul %170, %4, %cst_68 {dimension_numbers = #tpu.dot_dimension_numbers<[1], [0], [0], [1], [0, 0, 1, 1], [], []>} : vector<8x32xf32>, vector<32x128xf32>, vector<8x128xf32> -> vector<8x128xf32>
    %cst_69 = arith.constant dense<0.000000e+00> : vector<8x128xf32>
    %172 = tpu.matmul %127, %5, %cst_69 {dimension_numbers = #tpu.dot_dimension_numbers<[1], [0], [0], [1], [0, 0, 1, 1], [], []>} : vector<8x32xf32>, vector<32x128xf32>, vector<8x128xf32> -> vector<8x128xf32>
    %173 = arith.addf %171, %172 : vector<8x128xf32>
    %174 = vector.broadcast %6 : vector<1x128xf32> to vector<8x128xf32>
    %175 = arith.addf %173, %174 : vector<8x128xf32>
    %176 = arith.negf %175 : vector<8x128xf32>
    %177 = math.exp %176 : vector<8x128xf32>
    %cst_70 = arith.constant 1.000000e+00 : f32
    %178 = vector.broadcast %cst_70 : f32 to vector<8x128xf32>
    %179 = arith.addf %178, %177 : vector<8x128xf32>
    %180 = arith.divf %178, %179 : vector<8x128xf32>
    %181 = math.tanh %175 : vector<8x128xf32>
    %182 = vector.extract_strided_slice %180 {offsets = [0, 0], sizes = [8, 32], strides = [1, 1]} : vector<8x128xf32> to vector<8x32xf32>
    %183 = vector.extract_strided_slice %180 {offsets = [0, 32], sizes = [8, 32], strides = [1, 1]} : vector<8x128xf32> to vector<8x32xf32>
    %184 = vector.extract_strided_slice %181 {offsets = [0, 64], sizes = [8, 32], strides = [1, 1]} : vector<8x128xf32> to vector<8x32xf32>
    %185 = vector.extract_strided_slice %180 {offsets = [0, 96], sizes = [8, 32], strides = [1, 1]} : vector<8x128xf32> to vector<8x32xf32>
    %186 = arith.mulf %183, %125 : vector<8x32xf32>
    %187 = arith.mulf %182, %184 : vector<8x32xf32>
    %188 = arith.addf %186, %187 : vector<8x32xf32>
    %189 = math.tanh %188 : vector<8x32xf32>
    %190 = arith.mulf %185, %189 : vector<8x32xf32>
    %cst_71 = arith.constant dense<0.000000e+00> : vector<8x32xf32>
    %191 = tpu.matmul %190, %7, %cst_71 {dimension_numbers = #tpu.dot_dimension_numbers<[1], [0], [0], [1], [0, 0, 1, 1], [], []>} : vector<8x32xf32>, vector<32x32xf32>, vector<8x32xf32> -> vector<8x32xf32>
    %192 = vector.shape_cast %191 : vector<8x32xf32> to vector<8x1x32xf32>
    %193 = vector.broadcast %192 : vector<8x1x32xf32> to vector<8x8x32xf32>
    %194 = arith.mulf %0, %193 : vector<8x8x32xf32>
    %cst_72 = arith.constant dense<0.000000e+00> : vector<8x8xf32>
    %195 = vector.multi_reduction <add>, %194, %cst_72 [2] : vector<8x8x32xf32> to vector<8x8xf32>
    %196 = arith.addf %195, %1 : vector<8x8xf32>
    %cst_73 = arith.constant dense<0xFF800000> : vector<8xf32>
    %197 = vector.multi_reduction <maximumf>, %196, %cst_73 [1] : vector<8x8xf32> to vector<8xf32>
    %198 = vector.shape_cast %197 : vector<8xf32> to vector<8x1xf32>
    %199 = vector.broadcast %198 : vector<8x1xf32> to vector<8x8xf32>
    %200 = arith.subf %196, %199 : vector<8x8xf32>
    %201 = math.exp %200 : vector<8x8xf32>
    %cst_74 = arith.constant dense<0.000000e+00> : vector<8xf32>
    %202 = vector.multi_reduction <add>, %201, %cst_74 [1] : vector<8x8xf32> to vector<8xf32>
    %203 = vector.shape_cast %202 : vector<8xf32> to vector<8x1xf32>
    %204 = vector.broadcast %203 : vector<8x1xf32> to vector<8x8xf32>
    %205 = arith.divf %201, %204 : vector<8x8xf32>
    %206 = vector.shape_cast %205 : vector<8x8xf32> to vector<8x8x1xf32>
    %207 = vector.broadcast %206 : vector<8x8x1xf32> to vector<8x8x32xf32>
    %208 = arith.mulf %207, %0 : vector<8x8x32xf32>
    %cst_75 = arith.constant dense<0.000000e+00> : vector<8x32xf32>
    %209 = vector.multi_reduction <add>, %208, %cst_75 [1] : vector<8x8x32xf32> to vector<8x32xf32>
    %cst_76 = arith.constant dense<0.000000e+00> : vector<8x32xf32>
    %210 = tpu.matmul %209, %8, %cst_76 {dimension_numbers = #tpu.dot_dimension_numbers<[1], [0], [0], [1], [0, 0, 1, 1], [], []>} : vector<8x32xf32>, vector<32x32xf32>, vector<8x32xf32> -> vector<8x32xf32>
    %cst_77 = arith.constant dense<0.000000e+00> : vector<8x32xf32>
    %211 = tpu.matmul %190, %9, %cst_77 {dimension_numbers = #tpu.dot_dimension_numbers<[1], [0], [0], [1], [0, 0, 1, 1], [], []>} : vector<8x32xf32>, vector<32x32xf32>, vector<8x32xf32> -> vector<8x32xf32>
    %212 = arith.addf %210, %211 : vector<8x32xf32>
    %213 = math.tanh %212 : vector<8x32xf32>
    %214 = vector.extract_strided_slice %15 {offsets = [24, 0], sizes = [8, 128], strides = [1, 1]} : vector<48x128xf32> to vector<8x128xf32>
    %cst_78 = arith.constant dense<0.000000e+00> : vector<8x128xf32>
    %215 = tpu.matmul %213, %2, %cst_78 {dimension_numbers = #tpu.dot_dimension_numbers<[1], [0], [0], [1], [0, 0, 1, 1], [], []>} : vector<8x32xf32>, vector<32x128xf32>, vector<8x128xf32> -> vector<8x128xf32>
    %216 = arith.addf %214, %215 : vector<8x128xf32>
    %cst_79 = arith.constant dense<0.000000e+00> : vector<8x128xf32>
    %217 = tpu.matmul %170, %3, %cst_79 {dimension_numbers = #tpu.dot_dimension_numbers<[1], [0], [0], [1], [0, 0, 1, 1], [], []>} : vector<8x32xf32>, vector<32x128xf32>, vector<8x128xf32> -> vector<8x128xf32>
    %218 = arith.addf %216, %217 : vector<8x128xf32>
    %219 = arith.negf %218 : vector<8x128xf32>
    %220 = math.exp %219 : vector<8x128xf32>
    %cst_80 = arith.constant 1.000000e+00 : f32
    %221 = vector.broadcast %cst_80 : f32 to vector<8x128xf32>
    %222 = arith.addf %221, %220 : vector<8x128xf32>
    %223 = arith.divf %221, %222 : vector<8x128xf32>
    %224 = math.tanh %218 : vector<8x128xf32>
    %225 = vector.extract_strided_slice %223 {offsets = [0, 0], sizes = [8, 32], strides = [1, 1]} : vector<8x128xf32> to vector<8x32xf32>
    %226 = vector.extract_strided_slice %223 {offsets = [0, 32], sizes = [8, 32], strides = [1, 1]} : vector<8x128xf32> to vector<8x32xf32>
    %227 = vector.extract_strided_slice %224 {offsets = [0, 64], sizes = [8, 32], strides = [1, 1]} : vector<8x128xf32> to vector<8x32xf32>
    %228 = vector.extract_strided_slice %223 {offsets = [0, 96], sizes = [8, 32], strides = [1, 1]} : vector<8x128xf32> to vector<8x32xf32>
    %229 = arith.mulf %226, %168 : vector<8x32xf32>
    %230 = arith.mulf %225, %227 : vector<8x32xf32>
    %231 = arith.addf %229, %230 : vector<8x32xf32>
    %232 = math.tanh %231 : vector<8x32xf32>
    %233 = arith.mulf %228, %232 : vector<8x32xf32>
    %cst_81 = arith.constant dense<0.000000e+00> : vector<8x128xf32>
    %234 = tpu.matmul %233, %4, %cst_81 {dimension_numbers = #tpu.dot_dimension_numbers<[1], [0], [0], [1], [0, 0, 1, 1], [], []>} : vector<8x32xf32>, vector<32x128xf32>, vector<8x128xf32> -> vector<8x128xf32>
    %cst_82 = arith.constant dense<0.000000e+00> : vector<8x128xf32>
    %235 = tpu.matmul %190, %5, %cst_82 {dimension_numbers = #tpu.dot_dimension_numbers<[1], [0], [0], [1], [0, 0, 1, 1], [], []>} : vector<8x32xf32>, vector<32x128xf32>, vector<8x128xf32> -> vector<8x128xf32>
    %236 = arith.addf %234, %235 : vector<8x128xf32>
    %237 = vector.broadcast %6 : vector<1x128xf32> to vector<8x128xf32>
    %238 = arith.addf %236, %237 : vector<8x128xf32>
    %239 = arith.negf %238 : vector<8x128xf32>
    %240 = math.exp %239 : vector<8x128xf32>
    %cst_83 = arith.constant 1.000000e+00 : f32
    %241 = vector.broadcast %cst_83 : f32 to vector<8x128xf32>
    %242 = arith.addf %241, %240 : vector<8x128xf32>
    %243 = arith.divf %241, %242 : vector<8x128xf32>
    %244 = math.tanh %238 : vector<8x128xf32>
    %245 = vector.extract_strided_slice %243 {offsets = [0, 0], sizes = [8, 32], strides = [1, 1]} : vector<8x128xf32> to vector<8x32xf32>
    %246 = vector.extract_strided_slice %243 {offsets = [0, 32], sizes = [8, 32], strides = [1, 1]} : vector<8x128xf32> to vector<8x32xf32>
    %247 = vector.extract_strided_slice %244 {offsets = [0, 64], sizes = [8, 32], strides = [1, 1]} : vector<8x128xf32> to vector<8x32xf32>
    %248 = vector.extract_strided_slice %243 {offsets = [0, 96], sizes = [8, 32], strides = [1, 1]} : vector<8x128xf32> to vector<8x32xf32>
    %249 = arith.mulf %246, %188 : vector<8x32xf32>
    %250 = arith.mulf %245, %247 : vector<8x32xf32>
    %251 = arith.addf %249, %250 : vector<8x32xf32>
    %252 = math.tanh %251 : vector<8x32xf32>
    %253 = arith.mulf %248, %252 : vector<8x32xf32>
    %cst_84 = arith.constant dense<0.000000e+00> : vector<8x32xf32>
    %254 = tpu.matmul %253, %7, %cst_84 {dimension_numbers = #tpu.dot_dimension_numbers<[1], [0], [0], [1], [0, 0, 1, 1], [], []>} : vector<8x32xf32>, vector<32x32xf32>, vector<8x32xf32> -> vector<8x32xf32>
    %255 = vector.shape_cast %254 : vector<8x32xf32> to vector<8x1x32xf32>
    %256 = vector.broadcast %255 : vector<8x1x32xf32> to vector<8x8x32xf32>
    %257 = arith.mulf %0, %256 : vector<8x8x32xf32>
    %cst_85 = arith.constant dense<0.000000e+00> : vector<8x8xf32>
    %258 = vector.multi_reduction <add>, %257, %cst_85 [2] : vector<8x8x32xf32> to vector<8x8xf32>
    %259 = arith.addf %258, %1 : vector<8x8xf32>
    %cst_86 = arith.constant dense<0xFF800000> : vector<8xf32>
    %260 = vector.multi_reduction <maximumf>, %259, %cst_86 [1] : vector<8x8xf32> to vector<8xf32>
    %261 = vector.shape_cast %260 : vector<8xf32> to vector<8x1xf32>
    %262 = vector.broadcast %261 : vector<8x1xf32> to vector<8x8xf32>
    %263 = arith.subf %259, %262 : vector<8x8xf32>
    %264 = math.exp %263 : vector<8x8xf32>
    %cst_87 = arith.constant dense<0.000000e+00> : vector<8xf32>
    %265 = vector.multi_reduction <add>, %264, %cst_87 [1] : vector<8x8xf32> to vector<8xf32>
    %266 = vector.shape_cast %265 : vector<8xf32> to vector<8x1xf32>
    %267 = vector.broadcast %266 : vector<8x1xf32> to vector<8x8xf32>
    %268 = arith.divf %264, %267 : vector<8x8xf32>
    %269 = vector.shape_cast %268 : vector<8x8xf32> to vector<8x8x1xf32>
    %270 = vector.broadcast %269 : vector<8x8x1xf32> to vector<8x8x32xf32>
    %271 = arith.mulf %270, %0 : vector<8x8x32xf32>
    %cst_88 = arith.constant dense<0.000000e+00> : vector<8x32xf32>
    %272 = vector.multi_reduction <add>, %271, %cst_88 [1] : vector<8x8x32xf32> to vector<8x32xf32>
    %cst_89 = arith.constant dense<0.000000e+00> : vector<8x32xf32>
    %273 = tpu.matmul %272, %8, %cst_89 {dimension_numbers = #tpu.dot_dimension_numbers<[1], [0], [0], [1], [0, 0, 1, 1], [], []>} : vector<8x32xf32>, vector<32x32xf32>, vector<8x32xf32> -> vector<8x32xf32>
    %cst_90 = arith.constant dense<0.000000e+00> : vector<8x32xf32>
    %274 = tpu.matmul %253, %9, %cst_90 {dimension_numbers = #tpu.dot_dimension_numbers<[1], [0], [0], [1], [0, 0, 1, 1], [], []>} : vector<8x32xf32>, vector<32x32xf32>, vector<8x32xf32> -> vector<8x32xf32>
    %275 = arith.addf %273, %274 : vector<8x32xf32>
    %276 = math.tanh %275 : vector<8x32xf32>
    %277 = vector.extract_strided_slice %15 {offsets = [32, 0], sizes = [8, 128], strides = [1, 1]} : vector<48x128xf32> to vector<8x128xf32>
    %cst_91 = arith.constant dense<0.000000e+00> : vector<8x128xf32>
    %278 = tpu.matmul %276, %2, %cst_91 {dimension_numbers = #tpu.dot_dimension_numbers<[1], [0], [0], [1], [0, 0, 1, 1], [], []>} : vector<8x32xf32>, vector<32x128xf32>, vector<8x128xf32> -> vector<8x128xf32>
    %279 = arith.addf %277, %278 : vector<8x128xf32>
    %cst_92 = arith.constant dense<0.000000e+00> : vector<8x128xf32>
    %280 = tpu.matmul %233, %3, %cst_92 {dimension_numbers = #tpu.dot_dimension_numbers<[1], [0], [0], [1], [0, 0, 1, 1], [], []>} : vector<8x32xf32>, vector<32x128xf32>, vector<8x128xf32> -> vector<8x128xf32>
    %281 = arith.addf %279, %280 : vector<8x128xf32>
    %282 = arith.negf %281 : vector<8x128xf32>
    %283 = math.exp %282 : vector<8x128xf32>
    %cst_93 = arith.constant 1.000000e+00 : f32
    %284 = vector.broadcast %cst_93 : f32 to vector<8x128xf32>
    %285 = arith.addf %284, %283 : vector<8x128xf32>
    %286 = arith.divf %284, %285 : vector<8x128xf32>
    %287 = math.tanh %281 : vector<8x128xf32>
    %288 = vector.extract_strided_slice %286 {offsets = [0, 0], sizes = [8, 32], strides = [1, 1]} : vector<8x128xf32> to vector<8x32xf32>
    %289 = vector.extract_strided_slice %286 {offsets = [0, 32], sizes = [8, 32], strides = [1, 1]} : vector<8x128xf32> to vector<8x32xf32>
    %290 = vector.extract_strided_slice %287 {offsets = [0, 64], sizes = [8, 32], strides = [1, 1]} : vector<8x128xf32> to vector<8x32xf32>
    %291 = vector.extract_strided_slice %286 {offsets = [0, 96], sizes = [8, 32], strides = [1, 1]} : vector<8x128xf32> to vector<8x32xf32>
    %292 = arith.mulf %289, %231 : vector<8x32xf32>
    %293 = arith.mulf %288, %290 : vector<8x32xf32>
    %294 = arith.addf %292, %293 : vector<8x32xf32>
    %295 = math.tanh %294 : vector<8x32xf32>
    %296 = arith.mulf %291, %295 : vector<8x32xf32>
    %cst_94 = arith.constant dense<0.000000e+00> : vector<8x128xf32>
    %297 = tpu.matmul %296, %4, %cst_94 {dimension_numbers = #tpu.dot_dimension_numbers<[1], [0], [0], [1], [0, 0, 1, 1], [], []>} : vector<8x32xf32>, vector<32x128xf32>, vector<8x128xf32> -> vector<8x128xf32>
    %cst_95 = arith.constant dense<0.000000e+00> : vector<8x128xf32>
    %298 = tpu.matmul %253, %5, %cst_95 {dimension_numbers = #tpu.dot_dimension_numbers<[1], [0], [0], [1], [0, 0, 1, 1], [], []>} : vector<8x32xf32>, vector<32x128xf32>, vector<8x128xf32> -> vector<8x128xf32>
    %299 = arith.addf %297, %298 : vector<8x128xf32>
    %300 = vector.broadcast %6 : vector<1x128xf32> to vector<8x128xf32>
    %301 = arith.addf %299, %300 : vector<8x128xf32>
    %302 = arith.negf %301 : vector<8x128xf32>
    %303 = math.exp %302 : vector<8x128xf32>
    %cst_96 = arith.constant 1.000000e+00 : f32
    %304 = vector.broadcast %cst_96 : f32 to vector<8x128xf32>
    %305 = arith.addf %304, %303 : vector<8x128xf32>
    %306 = arith.divf %304, %305 : vector<8x128xf32>
    %307 = math.tanh %301 : vector<8x128xf32>
    %308 = vector.extract_strided_slice %306 {offsets = [0, 0], sizes = [8, 32], strides = [1, 1]} : vector<8x128xf32> to vector<8x32xf32>
    %309 = vector.extract_strided_slice %306 {offsets = [0, 32], sizes = [8, 32], strides = [1, 1]} : vector<8x128xf32> to vector<8x32xf32>
    %310 = vector.extract_strided_slice %307 {offsets = [0, 64], sizes = [8, 32], strides = [1, 1]} : vector<8x128xf32> to vector<8x32xf32>
    %311 = vector.extract_strided_slice %306 {offsets = [0, 96], sizes = [8, 32], strides = [1, 1]} : vector<8x128xf32> to vector<8x32xf32>
    %312 = arith.mulf %309, %251 : vector<8x32xf32>
    %313 = arith.mulf %308, %310 : vector<8x32xf32>
    %314 = arith.addf %312, %313 : vector<8x32xf32>
    %315 = math.tanh %314 : vector<8x32xf32>
    %316 = arith.mulf %311, %315 : vector<8x32xf32>
    %cst_97 = arith.constant dense<0.000000e+00> : vector<8x32xf32>
    %317 = tpu.matmul %316, %7, %cst_97 {dimension_numbers = #tpu.dot_dimension_numbers<[1], [0], [0], [1], [0, 0, 1, 1], [], []>} : vector<8x32xf32>, vector<32x32xf32>, vector<8x32xf32> -> vector<8x32xf32>
    %318 = vector.shape_cast %317 : vector<8x32xf32> to vector<8x1x32xf32>
    %319 = vector.broadcast %318 : vector<8x1x32xf32> to vector<8x8x32xf32>
    %320 = arith.mulf %0, %319 : vector<8x8x32xf32>
    %cst_98 = arith.constant dense<0.000000e+00> : vector<8x8xf32>
    %321 = vector.multi_reduction <add>, %320, %cst_98 [2] : vector<8x8x32xf32> to vector<8x8xf32>
    %322 = arith.addf %321, %1 : vector<8x8xf32>
    %cst_99 = arith.constant dense<0xFF800000> : vector<8xf32>
    %323 = vector.multi_reduction <maximumf>, %322, %cst_99 [1] : vector<8x8xf32> to vector<8xf32>
    %324 = vector.shape_cast %323 : vector<8xf32> to vector<8x1xf32>
    %325 = vector.broadcast %324 : vector<8x1xf32> to vector<8x8xf32>
    %326 = arith.subf %322, %325 : vector<8x8xf32>
    %327 = math.exp %326 : vector<8x8xf32>
    %cst_100 = arith.constant dense<0.000000e+00> : vector<8xf32>
    %328 = vector.multi_reduction <add>, %327, %cst_100 [1] : vector<8x8xf32> to vector<8xf32>
    %329 = vector.shape_cast %328 : vector<8xf32> to vector<8x1xf32>
    %330 = vector.broadcast %329 : vector<8x1xf32> to vector<8x8xf32>
    %331 = arith.divf %327, %330 : vector<8x8xf32>
    %332 = vector.shape_cast %331 : vector<8x8xf32> to vector<8x8x1xf32>
    %333 = vector.broadcast %332 : vector<8x8x1xf32> to vector<8x8x32xf32>
    %334 = arith.mulf %333, %0 : vector<8x8x32xf32>
    %cst_101 = arith.constant dense<0.000000e+00> : vector<8x32xf32>
    %335 = vector.multi_reduction <add>, %334, %cst_101 [1] : vector<8x8x32xf32> to vector<8x32xf32>
    %cst_102 = arith.constant dense<0.000000e+00> : vector<8x32xf32>
    %336 = tpu.matmul %335, %8, %cst_102 {dimension_numbers = #tpu.dot_dimension_numbers<[1], [0], [0], [1], [0, 0, 1, 1], [], []>} : vector<8x32xf32>, vector<32x32xf32>, vector<8x32xf32> -> vector<8x32xf32>
    %cst_103 = arith.constant dense<0.000000e+00> : vector<8x32xf32>
    %337 = tpu.matmul %316, %9, %cst_103 {dimension_numbers = #tpu.dot_dimension_numbers<[1], [0], [0], [1], [0, 0, 1, 1], [], []>} : vector<8x32xf32>, vector<32x32xf32>, vector<8x32xf32> -> vector<8x32xf32>
    %338 = arith.addf %336, %337 : vector<8x32xf32>
    %339 = math.tanh %338 : vector<8x32xf32>
    %340 = vector.extract_strided_slice %15 {offsets = [40, 0], sizes = [8, 128], strides = [1, 1]} : vector<48x128xf32> to vector<8x128xf32>
    %cst_104 = arith.constant dense<0.000000e+00> : vector<8x128xf32>
    %341 = tpu.matmul %339, %2, %cst_104 {dimension_numbers = #tpu.dot_dimension_numbers<[1], [0], [0], [1], [0, 0, 1, 1], [], []>} : vector<8x32xf32>, vector<32x128xf32>, vector<8x128xf32> -> vector<8x128xf32>
    %342 = arith.addf %340, %341 : vector<8x128xf32>
    %cst_105 = arith.constant dense<0.000000e+00> : vector<8x128xf32>
    %343 = tpu.matmul %296, %3, %cst_105 {dimension_numbers = #tpu.dot_dimension_numbers<[1], [0], [0], [1], [0, 0, 1, 1], [], []>} : vector<8x32xf32>, vector<32x128xf32>, vector<8x128xf32> -> vector<8x128xf32>
    %344 = arith.addf %342, %343 : vector<8x128xf32>
    %345 = arith.negf %344 : vector<8x128xf32>
    %346 = math.exp %345 : vector<8x128xf32>
    %cst_106 = arith.constant 1.000000e+00 : f32
    %347 = vector.broadcast %cst_106 : f32 to vector<8x128xf32>
    %348 = arith.addf %347, %346 : vector<8x128xf32>
    %349 = arith.divf %347, %348 : vector<8x128xf32>
    %350 = math.tanh %344 : vector<8x128xf32>
    %351 = vector.extract_strided_slice %349 {offsets = [0, 0], sizes = [8, 32], strides = [1, 1]} : vector<8x128xf32> to vector<8x32xf32>
    %352 = vector.extract_strided_slice %349 {offsets = [0, 32], sizes = [8, 32], strides = [1, 1]} : vector<8x128xf32> to vector<8x32xf32>
    %353 = vector.extract_strided_slice %350 {offsets = [0, 64], sizes = [8, 32], strides = [1, 1]} : vector<8x128xf32> to vector<8x32xf32>
    %354 = vector.extract_strided_slice %349 {offsets = [0, 96], sizes = [8, 32], strides = [1, 1]} : vector<8x128xf32> to vector<8x32xf32>
    %355 = arith.mulf %352, %294 : vector<8x32xf32>
    %356 = arith.mulf %351, %353 : vector<8x32xf32>
    %357 = arith.addf %355, %356 : vector<8x32xf32>
    %358 = math.tanh %357 : vector<8x32xf32>
    %359 = arith.mulf %354, %358 : vector<8x32xf32>
    %cst_107 = arith.constant dense<0.000000e+00> : vector<8x128xf32>
    %360 = tpu.matmul %359, %4, %cst_107 {dimension_numbers = #tpu.dot_dimension_numbers<[1], [0], [0], [1], [0, 0, 1, 1], [], []>} : vector<8x32xf32>, vector<32x128xf32>, vector<8x128xf32> -> vector<8x128xf32>
    %cst_108 = arith.constant dense<0.000000e+00> : vector<8x128xf32>
    %361 = tpu.matmul %316, %5, %cst_108 {dimension_numbers = #tpu.dot_dimension_numbers<[1], [0], [0], [1], [0, 0, 1, 1], [], []>} : vector<8x32xf32>, vector<32x128xf32>, vector<8x128xf32> -> vector<8x128xf32>
    %362 = arith.addf %360, %361 : vector<8x128xf32>
    %363 = vector.broadcast %6 : vector<1x128xf32> to vector<8x128xf32>
    %364 = arith.addf %362, %363 : vector<8x128xf32>
    %365 = arith.negf %364 : vector<8x128xf32>
    %366 = math.exp %365 : vector<8x128xf32>
    %cst_109 = arith.constant 1.000000e+00 : f32
    %367 = vector.broadcast %cst_109 : f32 to vector<8x128xf32>
    %368 = arith.addf %367, %366 : vector<8x128xf32>
    %369 = arith.divf %367, %368 : vector<8x128xf32>
    %370 = math.tanh %364 : vector<8x128xf32>
    %371 = vector.extract_strided_slice %369 {offsets = [0, 0], sizes = [8, 32], strides = [1, 1]} : vector<8x128xf32> to vector<8x32xf32>
    %372 = vector.extract_strided_slice %369 {offsets = [0, 32], sizes = [8, 32], strides = [1, 1]} : vector<8x128xf32> to vector<8x32xf32>
    %373 = vector.extract_strided_slice %370 {offsets = [0, 64], sizes = [8, 32], strides = [1, 1]} : vector<8x128xf32> to vector<8x32xf32>
    %374 = vector.extract_strided_slice %369 {offsets = [0, 96], sizes = [8, 32], strides = [1, 1]} : vector<8x128xf32> to vector<8x32xf32>
    %375 = arith.mulf %372, %314 : vector<8x32xf32>
    %376 = arith.mulf %371, %373 : vector<8x32xf32>
    %377 = arith.addf %375, %376 : vector<8x32xf32>
    %378 = math.tanh %377 : vector<8x32xf32>
    %379 = arith.mulf %374, %378 : vector<8x32xf32>
    %cst_110 = arith.constant dense<0.000000e+00> : vector<8x32xf32>
    %380 = tpu.matmul %379, %7, %cst_110 {dimension_numbers = #tpu.dot_dimension_numbers<[1], [0], [0], [1], [0, 0, 1, 1], [], []>} : vector<8x32xf32>, vector<32x32xf32>, vector<8x32xf32> -> vector<8x32xf32>
    %381 = vector.shape_cast %380 : vector<8x32xf32> to vector<8x1x32xf32>
    %382 = vector.broadcast %381 : vector<8x1x32xf32> to vector<8x8x32xf32>
    %383 = arith.mulf %0, %382 : vector<8x8x32xf32>
    %cst_111 = arith.constant dense<0.000000e+00> : vector<8x8xf32>
    %384 = vector.multi_reduction <add>, %383, %cst_111 [2] : vector<8x8x32xf32> to vector<8x8xf32>
    %385 = arith.addf %384, %1 : vector<8x8xf32>
    %cst_112 = arith.constant dense<0xFF800000> : vector<8xf32>
    %386 = vector.multi_reduction <maximumf>, %385, %cst_112 [1] : vector<8x8xf32> to vector<8xf32>
    %387 = vector.shape_cast %386 : vector<8xf32> to vector<8x1xf32>
    %388 = vector.broadcast %387 : vector<8x1xf32> to vector<8x8xf32>
    %389 = arith.subf %385, %388 : vector<8x8xf32>
    %390 = math.exp %389 : vector<8x8xf32>
    %cst_113 = arith.constant dense<0.000000e+00> : vector<8xf32>
    %391 = vector.multi_reduction <add>, %390, %cst_113 [1] : vector<8x8xf32> to vector<8xf32>
    %392 = vector.shape_cast %391 : vector<8xf32> to vector<8x1xf32>
    %393 = vector.broadcast %392 : vector<8x1xf32> to vector<8x8xf32>
    %394 = arith.divf %390, %393 : vector<8x8xf32>
    %395 = vector.shape_cast %394 : vector<8x8xf32> to vector<8x8x1xf32>
    %396 = vector.broadcast %395 : vector<8x8x1xf32> to vector<8x8x32xf32>
    %397 = arith.mulf %396, %0 : vector<8x8x32xf32>
    %cst_114 = arith.constant dense<0.000000e+00> : vector<8x32xf32>
    %398 = vector.multi_reduction <add>, %397, %cst_114 [1] : vector<8x8x32xf32> to vector<8x32xf32>
    %cst_115 = arith.constant dense<0.000000e+00> : vector<8x32xf32>
    %399 = tpu.matmul %398, %8, %cst_115 {dimension_numbers = #tpu.dot_dimension_numbers<[1], [0], [0], [1], [0, 0, 1, 1], [], []>} : vector<8x32xf32>, vector<32x32xf32>, vector<8x32xf32> -> vector<8x32xf32>
    %cst_116 = arith.constant dense<0.000000e+00> : vector<8x32xf32>
    %400 = tpu.matmul %379, %9, %cst_116 {dimension_numbers = #tpu.dot_dimension_numbers<[1], [0], [0], [1], [0, 0, 1, 1], [], []>} : vector<8x32xf32>, vector<32x32xf32>, vector<8x32xf32> -> vector<8x32xf32>
    %401 = arith.addf %399, %400 : vector<8x32xf32>
    %402 = math.tanh %401 : vector<8x32xf32>
    %403 = tpu.concatenate %87, %150, %213, %276, %339, %402 in 0 : vector<8x32xf32>, vector<8x32xf32>, vector<8x32xf32>, vector<8x32xf32>, vector<8x32xf32>, vector<8x32xf32> -> vector<48x32xf32>
    %c0_117 = arith.constant 0 : index
    %c0_118 = arith.constant 0 : index
    %404 = vector.load %arg16[%c0_117, %c0_118] : memref<48x32xf32, #tpu.memory_space<vmem>>, vector<48x32xf32>
    tpu.vector_store %arg16[%c0_117, %c0_118], %403 {strides = array<i32>} : memref<48x32xf32, #tpu.memory_space<vmem>>, vector<48x32xf32>,
    %c0_119 = arith.constant 0 : index
    %c0_120 = arith.constant 0 : index
    %405 = vector.load %arg17[%c0_119, %c0_120] : memref<8x8xf32, #tpu.memory_space<vmem>>, vector<8x8xf32>
    tpu.vector_store %arg17[%c0_119, %c0_120], %394 {strides = array<i32>} : memref<8x8xf32, #tpu.memory_space<vmem>>, vector<8x8xf32>,
    %c0_121 = arith.constant 0 : index
    %c0_122 = arith.constant 0 : index
    %c0_123 = arith.constant 0 : index
    %406 = vector.load %arg18[%c0_121, %c0_122, %c0_123] : memref<2x8x32xf32, #tpu.memory_space<vmem>>, vector<1x8x32xf32>
    %407 = vector.shape_cast %406 : vector<1x8x32xf32> to vector<8x32xf32>
    %408 = vector.shape_cast %359 : vector<8x32xf32> to vector<1x8x32xf32>
    tpu.vector_store %arg18[%c0_121, %c0_122, %c0_123], %408 {strides = array<i32>} : memref<2x8x32xf32, #tpu.memory_space<vmem>>, vector<1x8x32xf32>,
    %c1_124 = arith.constant 1 : index
    %c0_125 = arith.constant 0 : index
    %c0_126 = arith.constant 0 : index
    %409 = vector.load %arg18[%c1_124, %c0_125, %c0_126] : memref<2x8x32xf32, #tpu.memory_space<vmem>>, vector<1x8x32xf32>
    %410 = vector.shape_cast %409 : vector<1x8x32xf32> to vector<8x32xf32>
    %411 = vector.shape_cast %379 : vector<8x32xf32> to vector<1x8x32xf32>
    tpu.vector_store %arg18[%c1_124, %c0_125, %c0_126], %411 {strides = array<i32>} : memref<2x8x32xf32, #tpu.memory_space<vmem>>, vector<1x8x32xf32>,
    %c0_127 = arith.constant 0 : index
    %c0_128 = arith.constant 0 : index
    %c0_129 = arith.constant 0 : index
    %412 = vector.load %arg19[%c0_127, %c0_128, %c0_129] : memref<2x8x32xf32, #tpu.memory_space<vmem>>, vector<1x8x32xf32>
    %413 = vector.shape_cast %412 : vector<1x8x32xf32> to vector<8x32xf32>
    %414 = vector.shape_cast %357 : vector<8x32xf32> to vector<1x8x32xf32>
    tpu.vector_store %arg19[%c0_127, %c0_128, %c0_129], %414 {strides = array<i32>} : memref<2x8x32xf32, #tpu.memory_space<vmem>>, vector<1x8x32xf32>,
    %c1_130 = arith.constant 1 : index
    %c0_131 = arith.constant 0 : index
    %c0_132 = arith.constant 0 : index
    %415 = vector.load %arg19[%c1_130, %c0_131, %c0_132] : memref<2x8x32xf32, #tpu.memory_space<vmem>>, vector<1x8x32xf32>
    %416 = vector.shape_cast %415 : vector<1x8x32xf32> to vector<8x32xf32>
    %417 = vector.shape_cast %377 : vector<8x32xf32> to vector<1x8x32xf32>
    tpu.vector_store %arg19[%c1_130, %c0_131, %c0_132], %417 {strides = array<i32>} : memref<2x8x32xf32, #tpu.memory_space<vmem>>, vector<1x8x32xf32>,
    return
  }
}

</mosaic_0001>

<bundles_post_ra>
// kernel: tpu_custom_call.1
= control target key start
LH: loop header
LB: loop body
LE: loop exit
PB: predicated region body
PF: predicated region fallthrough
CT: control target
= control target key end

     0   :  { %s10767_s0 = inlined_call_operand.vmem [shape: f32[48,32], index: 0, kind: input, shape index: {}]   ;;  %s10768_s1 = inlined_call_operand.vmem [shape: f32[8,8,32], index: 1, kind: input, shape index: {}]   ;;  %s10769_s2 = inlined_call_operand.hbm [shape: f32[8,8], index: 2, kind: input, shape index: {}]   ;;  %s10770_s3 = inlined_call_operand.hbm [shape: f32[8,32], index: 3, kind: input, shape index: {}]   ;;  %s10771_s4 = inlined_call_operand.hbm [shape: f32[2,8,32], index: 4, kind: input, shape index: {}]   ;;  %s10772_s5 = inlined_call_operand.hbm [shape: f32[2,8,32], index: 5, kind: input, shape index: {}]   ;;  %s10773_s6 = inlined_call_operand.hbm [shape: f32[32,128], index: 6, kind: input, shape index: {}]   ;;  %s10774_s7 = inlined_call_operand.hbm [shape: f32[32,128], index: 7, kind: input, shape index: {}]   ;;  %s10775_s8 = inlined_call_operand.hbm [shape: f32[32,128], index: 8, kind: input, shape index: {}]   ;;  %s10776_s9 = inlined_call_operand.hbm [shape: f32[1,128], index: 9, kind: input, shape index: {}]   ;;  %s10777_s10 = inlined_call_operand.vmem [shape: f32[32,128], index: 10, kind: input, shape index: {}]   ;;  %s10778_s11 = inlined_call_operand.hbm [shape: f32[32,128], index: 11, kind: input, shape index: {}]   ;;  %s10779_s12 = inlined_call_operand.vmem [shape: f32[1,128], index: 12, kind: input, shape index: {}]   ;;  %s10780_s13 = inlined_call_operand.hbm [shape: f32[32,32], index: 13, kind: input, shape index: {}]   ;;  %s10781_s14 = inlined_call_operand.hbm [shape: f32[32,32], index: 14, kind: input, shape index: {}]   ;;  %s10782_s15 = inlined_call_operand.hbm [shape: f32[32,32], index: 15, kind: input, shape index: {}]   ;;  %s10783_s16 = inlined_call_operand.vmem [shape: f32[48,32], index: 16, kind: output, shape index: {0}]   ;;  %s10784_s17 = inlined_call_operand.hbm [shape: f32[8,8], index: 17, kind: output, shape index: {1}]   ;;  %s10785_s18 = inlined_call_operand.hbm [shape: f32[2,8,32], index: 18, kind: output, shape index: {2}]   ;;  %s10786_s19 = inlined_call_operand.hbm [shape: f32[2,8,32], index: 19, kind: output, shape index: {3}]  }
   0x1   :  { %10879 = sst [smem:[#allocation61_spill]] %s10767_s0 }
   0x2   :  { %10880 = sst [smem:[#allocation62_spill]] %s10768_s1 }
   0x3   :  { %10881 = sst [smem:[#allocation63_spill]] %s10769_s2 }
   0x4   :  { %10882 = sst [smem:[#allocation64_spill]] %s10770_s3 }
   0x5   :  { %25 = vsyncpa [#allocation3], 0 }
   0x6   :  { %26 = vsyncpa [#allocation6], 0 }
   0x7   :  { %27 = vsyncpa [#allocation9], 0 }
   0x8   :  { %28 = vsyncpa [#allocation12], 0 }
   0x9   :  { %29 = vsyncpa [#allocation15], 0 }
   0xa   :  { %30 = vsyncpa [#allocation18], 0 }
   0xb   :  { %31 = vsyncpa [#allocation21], 0 }
   0xc   :  { %32 = vsyncpa [#allocation4], 0 }
   0xd   :  { %33 = vsyncpa [#allocation24], 0  ;;  %s8569_s0 = smov [#allocation5]  }
   0xe   :  { %s54_s30 = sshll.u32 %s8569_s0, 4  ;;  %s55_s30 = int_to_ptr.vmem [resolvable:$true] %s54_s30 }
   0xf   :  { %s8259_s20 = scalar_lea.vmem %s55_s30, 128  ;;  %p8264_p1 = scmp.lt.s32.totalorder %s55_s30, %s55_s30 }
  0x10   :  { %p8260_p0 = scmp.ne.s32.totalorder %s55_s30, %s8259_s20  ;;  %p8265_p2 = scmp.lt.s32.totalorder %s8259_s20, %s8259_s20 }
  0x12   :  { %p8266_p3 = por %p8265_p2, %p8264_p1 }
  0x14   :  { %p8267_p4 = pnand %p8266_p3, %p8260_p0 }
  0x16   :  { %8270 = shalt.err (!%p8267_p4)
}
  0x17   :  { %s10883_s22 = sld [smem:[#allocation64_spill]]  ;;  %s8570_s2 = smov [#allocation8]  }
  0x18   :  { %s75_s23 = sshll.u32 %s8570_s2, 4  ;;  %s8571_s24 = smov [#allocation11]   ;;  %s76_s23 = int_to_ptr.vmem [resolvable:$true] %s75_s23 }
  0x19   :  { %s99_s25 = sshll.u32 %s8571_s24, 4  ;;  %s8279_s3 = scalar_lea.vmem %s76_s23, 256  ;;  %s100_s25 = int_to_ptr.vmem [resolvable:$true] %s99_s25 }
  0x1a   :  { %p8280_p5 = scmp.ne.s32.totalorder %s76_s23, %s8279_s3  ;;  %p8284_p6 = scmp.lt.s32.totalorder %s76_s23, %s76_s23 }
  0x1b   :  { %p8285_p7 = scmp.lt.s32.totalorder %s8279_s3, %s8279_s3 }
  0x1d   :  { %57 = dma.hbm_to_vmem [thread:$0]  %s10883_s22, 128, %s55_s30, [#allocation6]  }
  0x1e   :  { %p8286_p8 = por %p8285_p7, %p8284_p6 }
  0x20   :  { %p8287_p9 = pnand %p8286_p8, %p8280_p5 }
  0x22   :  { %8290 = shalt.err (!%p8287_p9)
}
  0x23   :  { %s8572_s26 = smov 128   ;;  %s8573_s27 = smov 8  }
  0x24   :  { %81 = dma.hbm_to_vmem [thread:$0]  %s10772_s5, 256, %s76_s23, [#allocation9], %s8572_s26, %s8572_s26, %s8573_s27  }
  0x25   :  { %s8299_s0 = scalar_lea.vmem %s100_s25, 512  ;;  %p8304_p11 = scmp.lt.s32.totalorder %s100_s25, %s100_s25 }
  0x26   :  { %p8300_p10 = scmp.ne.s32.totalorder %s100_s25, %s8299_s0  ;;  %p8305_p12 = scmp.lt.s32.totalorder %s8299_s0, %s8299_s0 }
  0x28   :  { %p8306_p13 = por %p8305_p12, %p8304_p11 }
  0x2a   :  { %p8307_p0 = pnand %p8306_p13, %p8300_p10 }
  0x2c   :  { %8310 = shalt.err (!%p8307_p0)
}
  0x2d   :  { %105 = dma.hbm_to_vmem [thread:$0]  %s10774_s7, 512, %s100_s25, [#allocation12], %s8572_s26, %s8572_s26, %s8573_s27  }
  0x2e   :  { %s8574_s21 = smov [#allocation14]   ;;  %s8575_s22 = smov [#allocation17]  }
  0x2f   :  { %s124_s1 = sshll.u32 %s8574_s21, 4  ;;  %s149_s5 = sshll.u32 %s8575_s22, 4  ;;  %s125_s1 = int_to_ptr.vmem [resolvable:$true] %s124_s1  ;;  %s150_s5 = int_to_ptr.vmem [resolvable:$true] %s149_s5 }
  0x30   :  { %s8319_s2 = scalar_lea.vmem %s125_s1, 16  ;;  %s8323_s23 = scalar_lea.vmem %s125_s1, 32 }
  0x31   :  { %p8320_p1 = scmp.ne.s32.totalorder %s125_s1, %s8319_s2  ;;  %p8324_p2 = scmp.lt.s32.totalorder %s125_s1, %s125_s1 }
  0x32   :  { %p8325_p3 = scmp.lt.s32.totalorder %s8323_s23, %s8319_s2 }
  0x34   :  { %p8326_p4 = por %p8325_p3, %p8324_p2 }
  0x36   :  { %p8327_p5 = pnand %p8326_p4, %p8320_p1 }
  0x38   :  { %8330 = shalt.err (!%p8327_p5)
}
  0x39   :  { %127 = dma.hbm_to_vmem [thread:$0]  %s10776_s9, 16, %s125_s1, [#allocation15]  }
  0x3a   :  { %s8339_s28 = scalar_lea.vmem %s150_s5, 512  ;;  %p8344_p7 = scmp.lt.s32.totalorder %s150_s5, %s150_s5 }
  0x3b   :  { %p8340_p6 = scmp.ne.s32.totalorder %s150_s5, %s8339_s28  ;;  %p8345_p8 = scmp.lt.s32.totalorder %s8339_s28, %s8339_s28 }
  0x3d   :  { %p8346_p9 = por %p8345_p8, %p8344_p7 }
  0x3f   :  { %p8347_p10 = pnand %p8346_p9, %p8340_p6 }
  0x41   :  { %8350 = shalt.err (!%p8347_p10)
}
  0x42   :  { %155 = dma.hbm_to_vmem [thread:$0]  %s10780_s13, 512, %s150_s5, [#allocation18], %s8572_s26, %s8572_s26, %s8573_s27  }
  0x43   :  { %s8576_s29 = smov [#allocation2]   ;;  %s8577_s30 = smov [#allocation7]  }
  0x44   :  { %s44_s0 = sshll.u32 %s8576_s29, 4  ;;  %s63_s9 = sshll.u32 %s8577_s30, 4  ;;  %s45_s0 = int_to_ptr.vmem [resolvable:$true] %s44_s0  ;;  %s64_s9 = int_to_ptr.vmem [resolvable:$true] %s63_s9 }
  0x45   :  { %s8359_s20 = scalar_lea.vmem %s45_s0, 128  ;;  %p8364_p12 = scmp.lt.s32.totalorder %s45_s0, %s45_s0 }
  0x46   :  { %p8360_p11 = scmp.ne.s32.totalorder %s45_s0, %s8359_s20  ;;  %p8365_p13 = scmp.lt.s32.totalorder %s8359_s20, %s8359_s20 }
  0x48   :  { %p8366_p0 = por %p8365_p13, %p8364_p12 }
  0x4a   :  { %p8367_p1 = pnand %p8366_p0, %p8360_p11 }
  0x4c   :  { %8370 = shalt.err (!%p8367_p1)
}
  0x4d   :  { %s10884_s22 = sld [smem:[#allocation63_spill]]  ;;  %s8379_s2 = scalar_lea.vmem %s64_s9, 256 }
  0x4e   :  { %p8380_p2 = scmp.ne.s32.totalorder %s64_s9, %s8379_s2  ;;  %p8384_p3 = scmp.lt.s32.totalorder %s64_s9, %s64_s9 }
  0x4f   :  { %p8385_p4 = scmp.lt.s32.totalorder %s8379_s2, %s8379_s2 }
  0x51   :  { %p8386_p5 = por %p8385_p4, %p8384_p3 }
  0x53   :  { %47 = dma.hbm_to_vmem [thread:$0]  %s10884_s22, 128, %s45_s0, [#allocation3]  }
  0x54   :  { %p8387_p6 = pnand %p8386_p5, %p8380_p2 }
  0x56   :  { %8390 = shalt.err (!%p8387_p6)
}
  0x57   :  { %69 = dma.hbm_to_vmem [thread:$0]  %s10771_s4, 256, %s64_s9, [#allocation6], %s8572_s26, %s8572_s26, %s8573_s27  }
  0x58   :  { %s8578_s23 = smov [#allocation10]   ;;  %s8579_s3 = smov [#allocation13]  }
  0x59   :  { %s87_s24 = sshll.u32 %s8578_s23, 4  ;;  %s111_s28 = sshll.u32 %s8579_s3, 4  ;;  %s88_s24 = int_to_ptr.vmem [resolvable:$true] %s87_s24  ;;  %s112_s28 = int_to_ptr.vmem [resolvable:$true] %s111_s28 }
  0x5a   :  { %s8399_s7 = scalar_lea.vmem %s88_s24, 512  ;;  %p8404_p8 = scmp.lt.s32.totalorder %s88_s24, %s88_s24 }
  0x5b   :  { %p8400_p7 = scmp.ne.s32.totalorder %s88_s24, %s8399_s7  ;;  %p8405_p9 = scmp.lt.s32.totalorder %s8399_s7, %s8399_s7 }
  0x5d   :  { %p8406_p10 = por %p8405_p9, %p8404_p8 }
  0x5f   :  { %p8407_p11 = pnand %p8406_p10, %p8400_p7 }
  0x61   :  { %8410 = shalt.err (!%p8407_p11)
}
  0x62   :  { %93 = dma.hbm_to_vmem [thread:$0]  %s10773_s6, 512, %s88_s24, [#allocation9], %s8572_s26, %s8572_s26, %s8573_s27  }
  0x63   :  { %s8419_s4 = scalar_lea.vmem %s112_s28, 512  ;;  %p8424_p13 = scmp.lt.s32.totalorder %s112_s28, %s112_s28 }
  0x64   :  { %p8420_p12 = scmp.ne.s32.totalorder %s112_s28, %s8419_s4  ;;  %p8425_p0 = scmp.lt.s32.totalorder %s8419_s4, %s8419_s4 }
  0x66   :  { %p8426_p1 = por %p8425_p0, %p8424_p13 }
  0x68   :  { %p8427_p2 = pnand %p8426_p1, %p8420_p12 }
  0x6a   :  { %8430 = shalt.err (!%p8427_p2)
}
  0x6b   :  { %117 = dma.hbm_to_vmem [thread:$0]  %s10775_s8, 512, %s112_s28, [#allocation12], %s8572_s26, %s8572_s26, %s8573_s27  }
  0x6c   :  { %s8580_s9 = smov [#allocation16]   ;;  %s8581_s21 = smov [#allocation19]  }
  0x6d   :  { %s135_s20 = sshll.u32 %s8580_s9, 4  ;;  %s161_s6 = sshll.u32 %s8581_s21, 4  ;;  %s136_s20 = int_to_ptr.vmem [resolvable:$true] %s135_s20  ;;  %s162_s6 = int_to_ptr.vmem [resolvable:$true] %s161_s6 }
  0x6e   :  { %s8439_s1 = scalar_lea.vmem %s136_s20, 512  ;;  %p8444_p4 = scmp.lt.s32.totalorder %s136_s20, %s136_s20 }
  0x6f   :  { %p8440_p3 = scmp.ne.s32.totalorder %s136_s20, %s8439_s1  ;;  %p8445_p5 = scmp.lt.s32.totalorder %s8439_s1, %s8439_s1 }
  0x71   :  { %p8446_p6 = por %p8445_p5, %p8444_p4 }
  0x73   :  { %p8447_p7 = pnand %p8446_p6, %p8440_p3 }
  0x75   :  { %8450 = shalt.err (!%p8447_p7)
}
  0x76   :  { %141 = dma.hbm_to_vmem [thread:$0]  %s10778_s11, 512, %s136_s20, [#allocation15], %s8572_s26, %s8572_s26, %s8573_s27  }
  0x77   :  { %s8459_s8 = scalar_lea.vmem %s162_s6, 512  ;;  %p8464_p9 = scmp.lt.s32.totalorder %s162_s6, %s162_s6 }
  0x78   :  { %p8460_p8 = scmp.ne.s32.totalorder %s162_s6, %s8459_s8  ;;  %p8465_p10 = scmp.lt.s32.totalorder %s8459_s8, %s8459_s8 }
  0x7a   :  { %p8466_p11 = por %p8465_p10, %p8464_p9 }
  0x7c   :  { %p8467_p12 = pnand %p8466_p11, %p8460_p8 }
  0x7e   :  { %8470 = shalt.err (!%p8467_p12)
}
  0x7f   :  { %167 = dma.hbm_to_vmem [thread:$0]  %s10781_s14, 512, %s162_s6, [#allocation18], %s8572_s26, %s8572_s26, %s8573_s27  }
  0x80   :  { %s8582_s23 = smov [#allocation20]  }
  0x81   :  { %s173_s24 = sshll.u32 %s8582_s23, 4  ;;  %s174_s24 = int_to_ptr.vmem [resolvable:$true] %s173_s24 }
  0x82   :  { %s8479_s3 = scalar_lea.vmem %s174_s24, 512  ;;  %p8484_p0 = scmp.lt.s32.totalorder %s174_s24, %s174_s24 }
  0x83   :  { %p8480_p13 = scmp.ne.s32.totalorder %s174_s24, %s8479_s3  ;;  %p8485_p1 = scmp.lt.s32.totalorder %s8479_s3, %s8479_s3 }
  0x85   :  { %p8486_p2 = por %p8485_p1, %p8484_p0 }
  0x87   :  { %p8487_p3 = pnand %p8486_p2, %p8480_p13 }
  0x89   :  { %8490 = shalt.err (!%p8487_p3)
}
  0x8a   :  { %179 = dma.hbm_to_vmem [thread:$0]  %s10782_s15, 512, %s174_s24, [#allocation21], %s8572_s26, %s8572_s26, %s8573_s27  }
  0x8b   :  { %8551 = dma.done.wait [#allocation3], 128  }
  0x8c   :  { %8552 = vsyncadd [#allocation3], 4294967168 }
  0x8d   :  { %8553 = dma.done.wait [#allocation6], 384  }
  0x8e   :  { %8554 = vsyncadd [#allocation6], 4294966912 }
  0x8f   :  { %8555 = dma.done.wait [#allocation9], 768  }
  0x90   :  { %8556 = vsyncadd [#allocation9], 4294966528 }
  0x91   :  { %8557 = dma.done.wait [#allocation12], 1024  }
  0x92   :  { %8558 = vsyncadd [#allocation12], 4294966272 }
  0x93   :  { %8559 = dma.done.wait [#allocation15], 528  }
  0x94   :  { %8560 = vsyncadd [#allocation15], 4294966768 }
  0x95   :  { %8561 = dma.done.wait [#allocation18], 1024  }
  0x96   :  { %8562 = vsyncadd [#allocation18], 4294966272 }
  0x97   :  { %8563 = dma.done.wait [#allocation21], 512  }
  0x98   :  { %8564 = vsyncadd [#allocation21], 4294966784  ;;  %v10789_v0 = vmov 0.0   ;;  %vm8584_vm0 = vmmov 0   ;;  %v263_v1 = vld [vmem:[#allocation10 + $0x18] sm:$0xff]  ;;  %v262_v3 = vld [vmem:[#allocation10 + $0x10] sm:$0xff] }
  0x99   :  { %7373 = vmatprep.subr.mxu1 %v10789_v0  ;;  %7381 = vmatprep.mubr.msk.f32.mxu1 %vm8584_vm0, %v10789_v0  ;;  %v8759_v2 = vld [vmem:[#allocation11 + $0x18] sm:$0xff]  ;;  %v8762_v4 = vld [vmem:[#allocation11 + $0x10] sm:$0xff]  ;;  %v261_v5 = vld [vmem:[#allocation10 + $0x8] sm:$0xff]  ;;  %s10885_s7 = sld [smem:[#allocation61_spill]]  ;;  %vm271_vm1 = vcmask 261120   ;;  %s8585_s4 = smov 64  }
  0x9a   :  { %7356 = vmatprep.subr.mxu0 %v263_v1  ;;  %7374 = vmatpush3.msra.mxu1 %v8759_v2  ;;  %v8765_v6 = vld [vmem:[#allocation11 + $0x8] sm:$0xff]  ;;  %v260_v7 = vld [vmem:[#allocation10] sm:$0xff]  ;;  %v391_v10 = vld [vmem:[#allocation5] sm:$0xff]  ;;  %s8586_s0 = smov 32   ;;  %s10897_s29 = sld [smem:[#allocation62_spill]]  ;;  %vm1087_vm2 = vcmask 1041409  }
  0x9b   :  { %7357 = vmatpush3.msra.mxu0 %v263_v1  ;;  %7375 = vmatprep.subr.mxu1 %v10789_v0  ;;  %v8769_v8 = vld [vmem:[#allocation11] sm:$0xff]  ;;  %v232_v12 = vld [vmem:[#allocation13 + $0x18] sm:$0xff]  ;;  %v231_v13 = vld [vmem:[#allocation13 + $0x10] sm:$0xff]  ;;  %vm1089_vm3 = vcmask 1042434   ;;  %vm1091_vm4 = vcmask 1043459   ;;  %vm1093_vm5 = vcmask 1044484  }
  0x9c   :  { %7358 = vmatprep.subr.mxu0 %v262_v3  ;;  %7376 = vmatpush3.msra.mxu1 %v8762_v4  ;;  %v230_v14 = vld [vmem:[#allocation13 + $0x8] sm:$0xff]  ;;  %v229_v15 = vld [vmem:[#allocation13] sm:$0xff]  ;;  %v388_v28 = vld [vmem:[#allocation8] sm:$0xff]  ;;  %vm1095_vm6 = vcmask 1045509   ;;  %vm1097_vm7 = vcmask 1046534   ;;  %vm1099_vm8 = vcmask 1047559  }
  0x9d   :  { %7359 = vmatpush3.msra.mxu0 %v262_v3  ;;  %7377 = vmatprep.subr.mxu1 %v10789_v0  ;;  %v385_v16 = vld [vmem:[#allocation7] sm:$0xff]  ;;  %v8812_v42 = vld [vmem:[#allocation16 + $0x10] sm:$0xff]  ;;  %v8820_v44 = vld [vmem:[%s10777_s10 + $0x18] sm:$0xff]  ;;  %vm1102_vm9 = vcmask 64512   ;;  %s8591_s24 = smov [#allocation22]  }
  0x9e   :  { %7360 = vmatprep.subr.mxu0 %v261_v5  ;;  %7378 = vmatpush3.msra.mxu1 %v8765_v6  ;;  %v7074_v19 = vld [vmem:[#allocation14] ss:$0 sm:$0xff]  ;;  %v8824_v45 = vld [vmem:[#allocation16 + $0x8] sm:$0xff]  ;;  %v8840_v48 = vld [vmem:[#allocation16] sm:$0xff]  ;;  %s7026_s3 = sshll.u32 %s8591_s24, 4  ;;  %s7027_s3 = int_to_ptr.vmem [resolvable:$true] %s7026_s3 }
  0x9f   :  { %v254_v9 = vld [vmem:[%s10885_s7] sm:$0xff]  ;;  %7361 = vmatpush3.msra.mxu0 %v261_v5  ;;  %7379 = vmatprep.subr.mxu1 %v10789_v0  ;;  %v255_v11 = vld [vmem:[%s10885_s7 + $0x8] sm:$0xff]  ;;  %v256_v40 = vld [vmem:[%s10885_s7 + $0x10] sm:$0xff] }
  0xa0   :  { %7362 = vmatprep.subr.mxu0 %v260_v7  ;;  %7380 = vmatpush3.msra.mxu1 %v8769_v8  ;;  %v8802_v39 = vld [vmem:[#allocation16 + $0x18] sm:$0xff]  ;;  %v257_v41 = vld [vmem:[%s10885_s7 + $0x18] sm:$0xff]  ;;  %v258_v43 = vld [vmem:[%s10885_s7 + $0x20] sm:$0xff] }
  0xa1   :  { %7363 = vmatpush3.msra.mxu0 %v260_v7  ;;  %7364 = vmatprep.mubr.msk.f32.mxu0 %vm271_vm1, %v254_v9  ;;  %v259_v46 = vld [vmem:[%s10885_s7 + $0x28] sm:$0xff]  ;;  %v8834_v47 = vld [vmem:[%s10777_s10 + $0x10] sm:$0xff]  ;;  %v387_v50 = vld [vmem:[#allocation7 + $0x8] sm:$0xff] }
  0xa2   :  { %7382 = vmatmul.mubr.msk.f32.vlgmr.msra.gmra.mxu1 %vm271_vm1, %v391_v10  ;;  %7384 = vmatprep.subr.mxu1 %v10789_v0  ;;  %v8847_v49 = vld [vmem:[%s10777_s10 + $0x8] sm:$0xff]  ;;  %v8857_v51 = vld [vmem:[%s10777_s10] sm:$0xff] }
  0xa3   :  { %7365 = vmatmul.mubr.msk.f32.vlgmr.msra.gmra.mxu0 %vm271_vm1, %v255_v11  ;;  %7385 = vmatpush3.msra.mxu1 %v232_v12  ;;  %v390_v55 = vld [vmem:[#allocation8 + $0x8] sm:$0xff]  ;;  %v7086_v63 = vld [vmem:[%s10779_s12] ss:$0 sm:$0xff] }
  0xa4   :  { %7386 = vmatprep.subr.mxu1 %v10789_v0  ;;  %7392 = vmatprep.mubr.msk.f32.mxu1 %vm8584_vm0, %v10789_v0 }
  0xa5   :  { %7387 = vmatpush3.msra.mxu1 %v231_v13  ;;  %7395 = vmatprep.subr.mxu0 %v10789_v0 }
  0xa6   :  { %7388 = vmatprep.subr.mxu1 %v10789_v0  ;;  %7396 = vmatpush3.msra.mxu0 %v8802_v39 }
  0xa7   :  { %7389 = vmatpush3.msra.mxu1 %v230_v14  ;;  %7367 = vmatprep.mubr.msk.f32.mxu0 %vm271_vm1, %v256_v40 }
  0xa8   :  { %7390 = vmatprep.subr.mxu1 %v10789_v0  ;;  %7368 = vmatmul.mubr.msk.f32.gmra.mxu0 %vm271_vm1, %v257_v41 }
  0xa9   :  { %7391 = vmatpush3.msra.mxu1 %v229_v15  ;;  %7397 = vmatprep.subr.mxu0 %v10789_v0 }
  0xaa   :  { %7393 = vmatmul.mubr.msk.f32.vlgmr.msra.gmra.mxu1 %vm271_vm1, %v385_v16  ;;  %7406 = vmatprep.subr.mxu1 %v10789_v0 }
  0xab   :  { %7414 = vmatprep.mubr.msk.f32.mxu1 %vm8584_vm0, %v10789_v0  ;;  %7398 = vmatpush3.msra.mxu0 %v8812_v42 }
  0xac   :  { %7370 = vmatprep.mubr.msk.f32.mxu0 %vm271_vm1, %v258_v43  ;;  %7399 = vmatprep.subr.mxu0 %v10789_v0 }
  0xad   :  { %7407 = vmatpush3.msra.mxu1 %v8820_v44  ;;  %7400 = vmatpush3.msra.mxu0 %v8824_v45 }
  0xae   :  { %7408 = vmatprep.subr.mxu1 %v10789_v0  ;;  %7371 = vmatmul.mubr.msk.f32.gmra.mxu0 %vm271_vm1, %v259_v46 }
  0xaf   :  { %7409 = vmatpush3.msra.mxu1 %v8834_v47  ;;  %7401 = vmatprep.subr.mxu0 %v10789_v0 }
  0xb0   :  { %7410 = vmatprep.subr.mxu1 %v10789_v0  ;;  %7402 = vmatpush3.msra.mxu0 %v8840_v48 }
  0xb1   :  { %7403 = vmatprep.mubr.msk.f32.mxu0 %vm8584_vm0, %v10789_v0  ;;  %7411 = vmatpush3.msra.mxu1 %v8847_v49 }
  0xb2   :  { %7417 = vmatprep.subr.mxu0 %v10789_v0  ;;  %7404 = vmatmul.mubr.msk.f32.vlgmr.msra.gmra.mxu0 %vm271_vm1, %v387_v50 }
  0xb3   :  { %7412 = vmatprep.subr.mxu1 %v10789_v0  ;;  %7425 = vmatprep.mubr.msk.f32.mxu0 %vm8584_vm0, %v10789_v0 }
  0xb4   :  { %7413 = vmatpush3.msra.mxu1 %v8857_v51 }
  0xb5   :  { %7428 = vmatprep.subr.mxu1 %v10789_v0 }
 0x162   :  { %v461_v17 = vpop.f32.mrf.mxu1 }
 0x163   :  { %v8794_v18 = vpop.f32.mrf.mxu0 }
 0x164   :  { %v7383_v20 = vpop.f32.mrf.mxu1 }
 0x165   :  { %v356_v21 = vpop.f32.mrf.mxu0 }
 0x166   :  { %v357_v22 = vadd.f32 %v7074_v19, %v356_v21  ;;  %v8892_v21 = vld [vmem:[#allocation17 + $0x18] sm:$0xff] }
 0x167   :  { %7418 = vmatpush3.msra.mxu0 %v8892_v21 }
 0x168   :  { %v465_v23 = vadd.f32 %v461_v17, %v357_v22  ;;  %v8870_v56 = vpop.f32.mrf.mxu0  ;;  %v8894_v22 = vld [vmem:[#allocation20 + $0x18] sm:$0xff]  ;;  %7419 = vmatprep.subr.mxu0 %v10789_v0 }
 0x169   :  { %10886 = vst [vmem:[#allocation35_spill] sm:$0xff] %v8870_v56 }
 0x16a   :  { %v535_v24 = vpop.f32.mrf.mxu1  ;;  %v8872_v57 = vpop.f32.mrf.mxu0 }
 0x16b   :  { %v539_v25 = vadd.f32 %v535_v24, %v465_v23  ;;  %10887 = vst [vmem:[#allocation36_spill] sm:$0xff] %v8872_v57  ;;  %v8896_v23 = vld [vmem:[#allocation17 + $0x10] sm:$0xff] }
 0x16c   :  { %v7394_v26 = vpop.f32.mrf.mxu1  ;;  %v8900_v24 = vld [vmem:[#allocation20 + $0x10] sm:$0xff]  ;;  %7420 = vmatpush3.msra.mxu0 %v8896_v23 }
 0x16d   :  { %7861 = vtanh.f32 %v539_v25  ;;  %v7083_v29 = vmul.f32 -1.442695, %v539_v25  ;;  %v8904_v25 = vld [vmem:[#allocation17 + $0x8] sm:$0xff]  ;;  %7421 = vmatprep.subr.mxu0 %v10789_v0 }
 0x16e   :  { %v8874_v58 = vpop.f32.mrf.mxu0  ;;  %v8906_v26 = vld [vmem:[#allocation20 + $0x8] sm:$0xff]  ;;  %7422 = vmatpush3.msra.mxu0 %v8904_v25 }
 0x16f   :  { %7863 = vpow2.f32 %v7083_v29  ;;  %10888 = vst [vmem:[#allocation37_spill] sm:$0xff] %v8874_v58  ;;  %7423 = vmatprep.subr.mxu0 %v10789_v0 }
 0x170   :  { %v8876_v59 = vpop.f32.mrf.mxu0 }
 0x171   :  { %10889 = vst [vmem:[#allocation38_spill] sm:$0xff] %v8876_v59 }
 0x172   :  { %v637_v60 = vpop.f32.mrf.mxu0 }
 0x174   :  { %v7405_v61 = vpop.f32.mrf.mxu0 }
 0x175   :  { %v8587_v61 = vmov 1966171168  }
 0x17a   :  { %v7862_v27 = vpop.eup %7861 }
 0x17b   :  { %553 = vrot.lane.b32.xlu0 %v7862_v27, %s8585_s4  ;;  %v8912_v27 = vld [vmem:[#allocation17] sm:$0xff] }
 0x17c   :  { %v7864_v30 = vpop.eup %7863  ;;  %7424 = vmatpush3.msra.mxu0 %v8912_v27 }
 0x17d   :  { %v543_v31 = vadd.f32 1.0, %v7864_v30  ;;  %7439 = vmatprep.subr.mxu0 %v10789_v0  ;;  %v10791_v30 = vlaneseq }
 0x17f   :  { %548 = vrot.lane.b32.xlu0 %v388_v28, %s8586_s0  ;;  %7865 = vrcp.f32 %v543_v31  ;;  %v8914_v28 = vld [vmem:[#allocation20] sm:$0xff]  ;;  %v8926_v31 = vshrl.u32 %v10791_v30, 7 }
 0x181   :  { %v8947_v46 = vsub.s32 2, %v8926_v31 }
 0x183   :  { %10893 = vst [vmem:[#allocation42_spill] sm:$0xff] %v8947_v46 }
 0x18c   :  { %v7866_v32 = vpop.eup %7865 }
 0x1ed   :  { %v554_v33 = vpop.permute.xlu0 %553 }
 0x1ee   :  { %v556_v34 = vmul.f32 %v7866_v32, %v554_v33  ;;  %v8932_v33 = vsub.s32 4, %v8926_v31 }
 0x1f0   :  { %558 = vrot.lane.b32.xlu1 %v556_v34, %s8586_s0  ;;  %10892 = vst [vmem:[#allocation41_spill] sm:$0xff] %v8932_v33  ;;  %v8934_v34 = vld [vmem:[#allocation2] sm:$0xff] }
 0x1f1   :  { %v549_v35 = vpop.permute.xlu0 %548  ;;  %v966_v50 = vrot.slane %v8934_v34, %v8947_v46 }
 0x1f2   :  { %v551_v36 = vmul.f32 %v7866_v32, %v549_v35 }
 0x262   :  { %v559_v37 = vpop.permute.xlu1 %558 }
 0x263   :  { %v8799_v38 = vadd.f32 %v559_v37, %v551_v36  ;;  %v8939_v36 = vsub.s32 0, %v8926_v31  ;;  %v980_v37 = vrot.slane %v8934_v34, %v8932_v33 }
 0x265   :  { %7867 = vtanh.f32 %v8799_v38  ;;  %v952_v43 = vrot.slane %v8934_v34, %v8939_v36 }
 0x272   :  { %v7868_v52 = vpop.eup %7867 }
 0x273   :  { %564 = vrot.lane.b32.xlu1 %v7868_v52, %s8585_s4  ;;  %v8952_v52 = vsub.s32 3, %v8926_v31 }
 0x275   :  { %10894 = vst [vmem:[#allocation43_spill] sm:$0xff] %v8952_v52 }
 0x2e5   :  { %v565_v53 = vpop.permute.xlu1 %564 }
 0x2e6   :  { %v567_v54 = vmul.f32 %v7866_v32, %v565_v53  ;;  %v8929_v32 = vsub.s32 1, %v8926_v31  ;;  %v973_v53 = vrot.slane %v8934_v34, %v8952_v52 }
 0x2e8   :  { %642 = vrot.lane.b32.xlu0 %v567_v54, %s8586_s0  ;;  %10891 = vst [vmem:[#allocation40_spill] sm:$0xff] %v8929_v32  ;;  %v959_v35 = vrot.slane %v8934_v34, %v8929_v32  ;;  %v8957_v54 = vsub.s32 5, %v8926_v31 }
 0x2ea   :  { %10895 = vst [vmem:[#allocation44_spill] sm:$0xff] %v8957_v54 }
 0x2ec   :  { %731 = vrot.lane.b32.xlu0 %v390_v55, %s8586_s0  ;;  %v987_v55 = vrot.slane %v8934_v34, %v8957_v54 }
 0x35a   :  { %v8878_v62 = vpop.permute.xlu0 %642 }
 0x35b   :  { %7415 = vmatmul.mubr.msk.f32.vlgmr.msra.gmra.mxu1 %vm271_vm1, %v8878_v62 }
 0x35c   :  { %7436 = vmatprep.mubr.msk.f32.mxu1 %vm8584_vm0, %v10789_v0  ;;  %7429 = vmatpush3.msra.mxu1 %v8894_v22 }
 0x35d   :  { %7430 = vmatprep.subr.mxu1 %v10789_v0 }
 0x35e   :  { %v732_v16 = vpop.permute.xlu0 %731  ;;  %7431 = vmatpush3.msra.mxu1 %v8900_v24 }
 0x35f   :  { %7432 = vmatprep.subr.mxu1 %v10789_v0 }
 0x360   :  { %7433 = vmatpush3.msra.mxu1 %v8906_v26 }
 0x361   :  { %7434 = vmatprep.subr.mxu1 %v10789_v0 }
 0x362   :  { %7435 = vmatpush3.msra.mxu1 %v8914_v28 }
 0x363   :  { %7450 = vmatprep.subr.mxu1 %v10789_v0 }
 0x41b   :  { %v712_v1 = vpop.f32.mrf.mxu1 }
 0x41c   :  { %v713_v3 = vadd.f32 %v712_v1, %v637_v60 }
 0x41d   :  { %v7416_v5 = vpop.f32.mrf.mxu1 }
 0x41e   :  { %v722_v7 = vadd.f32 %v7086_v63, %v713_v3  ;;  %v829_v63 = vunpack.c.l.s4 %v8587_v61 }
 0x420   :  { %7869 = vtanh.f32 %v722_v7  ;;  %v7087_v10 = vmul.f32 -1.442695, %v722_v7 }
 0x422   :  { %7871 = vpow2.f32 %v7087_v10 }
 0x42d   :  { %v7870_v9 = vpop.eup %7869 }
 0x42e   :  { %736 = vrot.lane.b32.xlu1 %v7870_v9, %s8585_s4 }
 0x42f   :  { %v7872_v11 = vpop.eup %7871 }
 0x430   :  { %v726_v12 = vadd.f32 1.0, %v7872_v11 }
 0x432   :  { %7873 = vrcp.f32 %v726_v12 }
 0x43f   :  { %v7874_v13 = vpop.eup %7873 }
 0x440   :  { %v734_v17 = vmul.f32 %v7874_v13, %v732_v16 }
 0x4a0   :  { %v737_v14 = vpop.permute.xlu1 %736 }
 0x4a1   :  { %v739_v15 = vmul.f32 %v7874_v13, %v737_v14 }
 0x4a3   :  { %741 = vrot.lane.b32.xlu1 %v739_v15, %s8586_s0  ;;  %v8992_v15 = vld [vmem:[%s10897_s29] sm:$0xff] }
 0x515   :  { %v742_v19 = vpop.permute.xlu1 %741 }
 0x516   :  { %v8889_v20 = vadd.f32 %v742_v19, %v734_v17  ;;  %v8998_v19 = vld [vmem:[%s10897_s29 + $0x8] sm:$0xff] }
 0x518   :  { %10890 = vst [vmem:[#allocation39_spill] sm:$0xff] %v8889_v20  ;;  %7875 = vtanh.f32 %v8889_v20 }
 0x525   :  { %v7876_v29 = vpop.eup %7875 }
 0x526   :  { %747 = vrot.lane.b32.xlu0 %v7876_v29, %s8585_s4 }
 0x52a   :  { %961 = vbcast.lane.b32.xlu0 %v959_v35, 256  ;;  %v9004_v35 = vld [vmem:[%s10897_s29 + $0x10] sm:$0xff] }
 0x52e   :  { %982 = vbcast.lane.b32.xlu0 %v980_v37, 256 }
 0x598   :  { %v748_v40 = vpop.permute.xlu0 %747 }
 0x599   :  { %v750_v41 = vmul.f32 %v7874_v13, %v748_v40 }
 0x59b   :  { %752 = vrot.lane.b32.xlu1 %v750_v41, %s8586_s0 }
 0x59f   :  { %954 = vbcast.lane.b32.xlu1 %v952_v43, 256 }
 0x5a3   :  { %968 = vbcast.lane.b32.xlu1 %v966_v50, 256  ;;  %v9012_v50 = vld [vmem:[%s10897_s29 + $0x20] sm:$0xff] }
 0x5a4   :  { %10898 = vst [vmem:[#allocation46_spill] sm:$0xff] %v9012_v50 }
 0x5a7   :  { %975 = vbcast.lane.b32.xlu1 %v973_v53, 256 }
 0x5ab   :  { %989 = vbcast.lane.b32.xlu1 %v987_v55, 256 }
 0x60d   :  { %v8961_v60 = vpop.permute.xlu1 %752 }
 0x60e   :  { %7426 = vmatmul.mubr.msk.f32.vlgmr.msra.gmra.mxu0 %vm271_vm1, %v8961_v60  ;;  %7437 = vmatmul.mubr.msk.f32.vlgmr.msra.gmra.mxu1 %vm271_vm1, %v8961_v60 }
 0x60f   :  { %7447 = vmatprep.mubr.msk.f32.mxu0 %vm8584_vm0, %v10789_v0  ;;  %7451 = vmatpush3.msra.mxu1 %v8759_v2  ;;  %v830_v2 = vunpack.c.0.s8 %v829_v63 }
 0x610   :  { %7452 = vmatprep.subr.mxu1 %v10789_v0  ;;  %7458 = vmatprep.mubr.msk.f32.mxu1 %vm8584_vm0, %v10789_v0 }
 0x611   :  { %7453 = vmatpush3.msra.mxu1 %v8762_v4  ;;  %v8980_v1 = vsub.s32 %v830_v2, %v8926_v31 }
 0x612   :  { %7454 = vmatprep.subr.mxu1 %v10789_v0 }
 0x613   :  { %7455 = vmatpush3.msra.mxu1 %v8765_v6  ;;  %10896 = vst [vmem:[#allocation45_spill] sm:$0xff] %v8980_v1 }
 0x614   :  { %7456 = vmatprep.subr.mxu1 %v10789_v0 }
 0x615   :  { %7457 = vmatpush3.msra.mxu1 %v8769_v8 }
 0x616   :  { %7472 = vmatprep.subr.mxu1 %v10789_v0 }
 0x6ce   :  { %v822_v3 = vpop.f32.mrf.mxu0  ;;  %v8982_v5 = vpop.f32.mrf.mxu1 }
 0x6cf   :  { %v827_v4 = vcombine.high %v822_v3, %v822_v3  ;;  %v834_v7 = vrot.slane %v822_v3, %v8980_v1 }
 0x6d0   :  { %v7427_v9 = vpop.f32.mrf.mxu0  ;;  %v7438_v6 = vpop.f32.mrf.mxu1 }
 0x6d1   :  { %v841_v10 = vrot.slane %v827_v4, %v8980_v1  ;;  %v842_v11 = vcombine.high %v834_v7, %v834_v7  ;;  %v850_v8 = vrot.slane %v834_v7, %v8980_v1  ;;  %v9024_v9 = vld [vmem:[%s10897_s29 + $0x18] sm:$0xff] }
 0x6d3   :  { %v857_v12 = vrot.slane %v841_v10, %v8980_v1  ;;  %v864_v13 = vrot.slane %v842_v11, %v8980_v1  ;;  %v872_v14 = vcombine.high %v850_v8, %v850_v8  ;;  %v843_v16 = vcombine.high %v841_v10, %v841_v10  ;;  %v9030_v10 = vld [vmem:[%s10897_s29 + $0x30] sm:$0xff] }
 0x6d4   :  { %v879_v17 = vrot.slane %v850_v8, %v8939_v36  ;;  %10899 = vst [vmem:[#allocation47_spill] sm:$0xff] %v9030_v10 }
 0x6d5   :  { %v883_v29 = vrot.slane %v864_v13, %v8939_v36  ;;  %v887_v37 = vrot.slane %v872_v14, %v8939_v36  ;;  %v895_v40 = vrot.slane %v857_v12, %v8939_v36  ;;  %v874_v41 = vcombine.high %v864_v13, %v864_v13 }
 0x6d6   :  { %v916_v43 = vmul.f32 %v879_v17, %v8992_v15  ;;  %v873_v53 = vcombine.high %v857_v12, %v857_v12  ;;  %v871_v3 = vrot.slane %v843_v16, %v8980_v1  ;;  %v9040_v17 = vld [vmem:[%s10897_s29 + $0x28] sm:$0xff] }
 0x6d7   :  { %v917_v55 = vmul.f32 %v883_v29, %v8998_v19  ;;  %v918_v63 = vmul.f32 %v887_v37, %v9004_v35  ;;  %v891_v2 = vrot.slane %v874_v41, %v8939_v36  ;;  %v920_v7 = vmul.f32 %v895_v40, %v9012_v50  ;;  %10900 = vst [vmem:[#allocation48_spill] sm:$0xff] %v9040_v17 }
 0x6d8   :  { %v924_v61 = vsel %vm271_vm1, %v916_v43, 0.0  ;;  %v903_v6 = vrot.slane %v873_v53, %v8939_v36  ;;  %v899_v12 = vrot.slane %v871_v3, %v8939_v36  ;;  %v875_v13 = vcombine.high %v871_v3, %v871_v3  ;;  %v9049_v43 = vld [vmem:[%s10897_s29 + $0x38] sm:$0xff] }
 0x6d9   :  { %925 = vadd.xlane.f32.xlu0 %v924_v61  ;;  %v927_v4 = vsel %vm271_vm1, %v917_v55, 0.0  ;;  %v930_v11 = vsel %vm271_vm1, %v918_v63, 0.0  ;;  %v919_v8 = vmul.f32 %v891_v2, %v9024_v9  ;;  %v936_v14 = vsel %vm271_vm1, %v920_v7, 0.0  ;;  %10901 = vst [vmem:[#allocation49_spill] sm:$0xff] %v9049_v43 }
 0x6da   :  { %928 = vadd.xlane.f32.xlu1 %v927_v4  ;;  %v922_v16 = vmul.f32 %v903_v6, %v9030_v10  ;;  %v921_v37 = vmul.f32 %v899_v12, %v9040_v17  ;;  %v907_v40 = vrot.slane %v875_v13, %v8939_v36  ;;  %v8588_v61 = vmov 0   ;;  %v9064_v6 = vpop.permute.xlu1 %954 }
 0x6db   :  { %v933_v29 = vsel %vm271_vm1, %v919_v8, 0.0  ;;  %7859 = vset.pattern.permute.xlu0 %v8588_v61  ;;  %7860 = vset.pattern.permute.xlu1 %v8588_v61  ;;  %v9055_v2 = vsub.s32 7, %v8926_v31  ;;  %v9060_v4 = vsub.s32 6, %v8926_v31  ;;  %10904 = vst [vmem:[#allocation52_spill] sm:$0xff] %v9064_v6  ;;  %v9068_v8 = vpop.permute.xlu0 %961 }
 0x6dc   :  { %v942_v41 = vsel %vm271_vm1, %v922_v16, 0.0  ;;  %v939_v53 = vsel %vm271_vm1, %v921_v37, 0.0  ;;  %v923_v55 = vmul.f32 %v907_v40, %v9049_v43  ;;  %10906 = vst [vmem:[#allocation54_spill] sm:$0xff] %v9068_v8 }
 0x6dd   :  { %931 = vadd.xlane.f32.xlu0 %v930_v11  ;;  %10902 = vst [vmem:[#allocation50_spill] sm:$0xff] %v9055_v2  ;;  %v1001_v3 = vrot.slane %v8934_v34, %v9055_v2  ;;  %10903 = vst [vmem:[#allocation51_spill] sm:$0xff] %v9060_v4  ;;  %v994_v7 = vrot.slane %v8934_v34, %v9060_v4 }
 0x6de   :  { %937 = vadd.xlane.f32.xlu1 %v936_v14  ;;  %v945_v63 = vsel %vm271_vm1, %v923_v55, 0.0  ;;  %v9066_v11 = vpop.permute.xlu1 %968 }
 0x6df   :  { %10905 = vst [vmem:[#allocation53_spill] sm:$0xff] %v9066_v11  ;;  %v9072_v13 = vpop.permute.xlu0 %982 }
 0x6e0   :  { %10908 = vst [vmem:[#allocation56_spill] sm:$0xff] %v9072_v13 }
 0x6e1   :  { %934 = vadd.xlane.f32.xlu0 %v933_v29 }
 0x6e2   :  { %943 = vadd.xlane.f32.xlu1 %v942_v41  ;;  %v9070_v12 = vpop.permute.xlu1 %975 }
 0x6e3   :  { %10907 = vst [vmem:[#allocation55_spill] sm:$0xff] %v9070_v12 }
 0x6e5   :  { %940 = vadd.xlane.f32.xlu0 %v939_v53 }
 0x6e6   :  { %v9074_v14 = vpop.permute.xlu1 %989 }
 0x6e7   :  { %10909 = vst [vmem:[#allocation57_spill] sm:$0xff] %v9074_v14 }
 0x6e9   :  { %946 = vadd.xlane.f32.xlu0 %v945_v63 }
 0x6f3   :  { %1003 = vbcast.lane.b32.xlu1 %v1001_v3, 256 }
 0x6ff   :  { %996 = vbcast.lane.b32.xlu0 %v994_v7, 256 }
 0x762   :  { %v926_v16 = vpop.xlane.xlu0 %925 }
 0x763   :  { %v9077_v29 = vadd.f32 %v9064_v6, %v926_v16  ;;  %v929_v37 = vpop.xlane.xlu1 %928 }
 0x764   :  { %v9080_v34 = vadd.f32 %v9068_v8, %v929_v37 }
 0x765   :  { %1030 = vperm.xlu0 %7859, %v9077_v29  }
 0x766   :  { %v932_v40 = vpop.xlane.xlu0 %931  ;;  %1033 = vperm.xlu1 %7860, %v9080_v34  }
 0x767   :  { %v938_v41 = vpop.xlane.xlu1 %937  ;;  %v1015_v53 = vadd.f32 %v9066_v11, %v932_v40 }
 0x768   :  { %v9087_v63 = vadd.f32 %v9072_v13, %v938_v41 }
 0x76a   :  { %v935_v55 = vpop.xlane.xlu0 %934  ;;  %1036 = vperm.xlu1 %7860, %v1015_v53  }
 0x76b   :  { %v1016_v61 = vadd.f32 %v9070_v12, %v935_v55  ;;  %v944_v3 = vpop.xlane.xlu1 %943 }
 0x76d   :  { %1039 = vperm.xlu0 %7859, %v1016_v61  }
 0x76e   :  { %v941_v7 = vpop.xlane.xlu0 %940  ;;  %1042 = vperm.xlu1 %7860, %v9087_v63  }
 0x76f   :  { %v9091_v16 = vadd.f32 %v9074_v14, %v941_v7  ;;  %v9093_v37 = vpop.permute.xlu1 %1003  ;;  %v10912_v7 = vlaneseq }
 0x770   :  { %10910 = vst [vmem:[#allocation58_spill] sm:$0xff] %v9093_v37 }
 0x771   :  { %1045 = vperm.xlu0 %7859, %v9091_v16   ;;  %v1054_v58 = vand.u32 127, %v10912_v7 }
 0x772   :  { %v947_v40 = vpop.xlane.xlu0 %946 }
 0x773   :  { %v9097_v0 = vadd.f32 %v9093_v37, %v947_v40  ;;  %v9108_v56 = vsub.s32 %v1054_v58, %v8926_v31 }
 0x775   :  { %1051 = vperm.xlu0 %7859, %v9097_v0   ;;  %10913 = vst [vmem:[#allocation60_spill] sm:$0xff] %v9108_v56 }
 0x776   :  { %v9100_v41 = vpop.permute.xlu0 %996 }
 0x777   :  { %10911 = vst [vmem:[#allocation59_spill] sm:$0xff] %v9100_v41  ;;  %v9103_v55 = vadd.f32 %v9100_v41, %v944_v3 }
 0x779   :  { %1048 = vperm.xlu1 %7860, %v9103_v55  }
 0x7e0   :  { %v1031_v59 = vpop.permute.xlu0 %1030 }
 0x7e1   :  { %v1034_v30 = vpop.permute.xlu1 %1033  ;;  %v1058_v14 = vrot.slane %v1031_v59, %v9108_v56 }
 0x7e2   :  { %v1062_v40 = vrot.slane %v1034_v30, %v9108_v56 }
 0x7e4   :  { %v1088_v3 = vsel %vm1087_vm2, %v1062_v40, %v1058_v14 }
 0x7e5   :  { %v1037_v57 = vpop.permute.xlu1 %1036 }
 0x7e6   :  { %v1066_v13 = vrot.slane %v1037_v57, %v9108_v56 }
 0x7e8   :  { %v1040_v37 = vpop.permute.xlu0 %1039  ;;  %v1090_v7 = vsel %vm1089_vm3, %v1066_v13, %v1088_v3 }
 0x7e9   :  { %v1070_v41 = vrot.slane %v1040_v37, %v9108_v56  ;;  %v1043_v11 = vpop.permute.xlu1 %1042 }
 0x7ea   :  { %v1074_v31 = vrot.slane %v1043_v11, %v9108_v56 }
 0x7eb   :  { %v1092_v30 = vsel %vm1091_vm4, %v1070_v41, %v1090_v7 }
 0x7ec   :  { %v1046_v58 = vpop.permute.xlu0 %1045  ;;  %v1094_v57 = vsel %vm1093_vm5, %v1074_v31, %v1092_v30 }
 0x7ed   :  { %v1078_v12 = vrot.slane %v1046_v58, %v9108_v56 }
 0x7ef   :  { %v1096_v37 = vsel %vm1095_vm6, %v1078_v12, %v1094_v57 }
 0x7f0   :  { %v1052_v59 = vpop.permute.xlu0 %1051 }
 0x7f1   :  { %v1086_v13 = vrot.slane %v1052_v59, %v9108_v56 }
 0x7f4   :  { %v1049_v8 = vpop.permute.xlu1 %1048 }
 0x7f5   :  { %v1082_v14 = vrot.slane %v1049_v8, %v9108_v56 }
 0x7f7   :  { %v1098_v11 = vsel %vm1097_vm7, %v1082_v14, %v1096_v37 }
 0x7f8   :  { %v1100_v41 = vsel %vm1099_vm8, %v1086_v13, %v1098_v11 }
 0x7f9   :  { %v1103_v40 = vsel %vm1102_vm9, %v1100_v41, -inf }
 0x7fa   :  { %1104 = vmax.xlane.f32.xlu1 %v1103_v40 }
 0x883   :  { %v1105_v3 = vpop.xlane.xlu1 %1104 }
 0x884   :  { %v1110_v7 = vrot.slane %v1105_v3, %v8939_v36  ;;  %v1114_v58 = vrot.slane %v1105_v3, %v8929_v32  ;;  %v1118_v8 = vrot.slane %v1105_v3, %v8947_v46  ;;  %v1122_v57 = vrot.slane %v1105_v3, %v8952_v52 }
 0x885   :  { %v1126_v13 = vrot.slane %v1105_v3, %v8932_v33  ;;  %v1130_v41 = vrot.slane %v1105_v3, %v8957_v54 }
 0x886   :  { %v1147_v31 = vsub.f32 %v9077_v29, %v1110_v7  ;;  %v1148_v30 = vsub.f32 %v9080_v34, %v1114_v58  ;;  %v1149_v59 = vsub.f32 %v1015_v53, %v1118_v8  ;;  %v1150_v37 = vsub.f32 %v1016_v61, %v1122_v57 }
 0x887   :  { %v1151_v40 = vsub.f32 %v9087_v63, %v1126_v13  ;;  %v1134_v29 = vrot.slane %v1105_v3, %v9060_v4  ;;  %v1152_v34 = vsub.f32 %v9091_v16, %v1130_v41  ;;  %v1138_v61 = vrot.slane %v1105_v3, %v9055_v2 }
 0x888   :  { %v1155_v12 = vmul.f32 1.442695, %v1147_v31  ;;  %v1157_v14 = vmul.f32 1.442695, %v1148_v30  ;;  %v1159_v11 = vmul.f32 1.442695, %v1149_v59 }
 0x889   :  { %v1161_v6 = vmul.f32 1.442695, %v1150_v37  ;;  %v1163_v7 = vmul.f32 1.442695, %v1151_v40  ;;  %v1153_v58 = vsub.f32 %v9103_v55, %v1134_v29  ;;  %v1165_v8 = vmul.f32 1.442695, %v1152_v34 }
 0x88a   :  { %7877 = vpow2.f32 %v1155_v12  ;;  %v1154_v63 = vsub.f32 %v9097_v0, %v1138_v61 }
 0x88b   :  { %7879 = vpow2.f32 %v1157_v14  ;;  %v1167_v16 = vmul.f32 1.442695, %v1153_v58 }
 0x88c   :  { %7881 = vpow2.f32 %v1159_v11  ;;  %v1169_v30 = vmul.f32 1.442695, %v1154_v63 }
 0x88d   :  { %7883 = vpow2.f32 %v1161_v6 }
 0x88e   :  { %7885 = vpow2.f32 %v1163_v7 }
 0x88f   :  { %7887 = vpow2.f32 %v1165_v8 }
 0x890   :  { %7889 = vpow2.f32 %v1167_v16 }
 0x891   :  { %7891 = vpow2.f32 %v1169_v30 }
 0x897   :  { %v9137_v53 = vpop.eup %7877 }
 0x898   :  { %1180 = vperm.xlu0 %7859, %v9137_v53   ;;  %v9142_v31 = vpop.eup %7879 }
 0x899   :  { %v9146_v6 = vpop.eup %7881 }
 0x89a   :  { %v9149_v12 = vpop.eup %7883 }
 0x89b   :  { %v9152_v55 = vpop.eup %7885 }
 0x89c   :  { %1183 = vperm.xlu0 %7859, %v9142_v31   ;;  %v7888_v3 = vpop.eup %7887 }
 0x89d   :  { %v9155_v0 = vpop.eup %7889 }
 0x89e   :  { %v9158_v57 = vpop.eup %7891 }
 0x8a0   :  { %1186 = vperm.xlu0 %7859, %v9146_v6  }
 0x8a4   :  { %1189 = vperm.xlu0 %7859, %v9149_v12  }
 0x8a8   :  { %1192 = vperm.xlu0 %7859, %v9152_v55  }
 0x8ac   :  { %1195 = vperm.xlu0 %7859, %v7888_v3  }
 0x8b0   :  { %1198 = vperm.xlu0 %7859, %v9155_v0  }
 0x8b4   :  { %1201 = vperm.xlu0 %7859, %v9158_v57  }
 0x913   :  { %v1181_v59 = vpop.permute.xlu0 %1180 }
 0x914   :  { %v1206_v34 = vrot.slane %v1181_v59, %v9108_v56 }
 0x917   :  { %v1184_v14 = vpop.permute.xlu0 %1183 }
 0x918   :  { %v1210_v40 = vrot.slane %v1184_v14, %v9108_v56 }
 0x91a   :  { %v1235_v8 = vsel %vm1087_vm2, %v1210_v40, %v1206_v34 }
 0x91b   :  { %v1187_v13 = vpop.permute.xlu0 %1186 }
 0x91c   :  { %v1214_v29 = vrot.slane %v1187_v13, %v9108_v56 }
 0x91e   :  { %v1236_v16 = vsel %vm1089_vm3, %v1214_v29, %v1235_v8 }
 0x91f   :  { %v1190_v37 = vpop.permute.xlu0 %1189 }
 0x920   :  { %v1218_v7 = vrot.slane %v1190_v37, %v9108_v56 }
 0x922   :  { %v1237_v1 = vsel %vm1091_vm4, %v1218_v7, %v1236_v16 }
 0x923   :  { %v1193_v11 = vpop.permute.xlu0 %1192 }
 0x924   :  { %v1222_v61 = vrot.slane %v1193_v11, %v9108_v56 }
 0x926   :  { %v1238_v14 = vsel %vm1093_vm5, %v1222_v61, %v1237_v1 }
 0x927   :  { %v1196_v41 = vpop.permute.xlu0 %1195 }
 0x928   :  { %v1226_v63 = vrot.slane %v1196_v41, %v9108_v56 }
 0x92a   :  { %v1239_v37 = vsel %vm1095_vm6, %v1226_v63, %v1238_v14 }
 0x92b   :  { %v1199_v58 = vpop.permute.xlu0 %1198 }
 0x92c   :  { %v1230_v30 = vrot.slane %v1199_v58, %v9108_v56 }
 0x92e   :  { %v1240_v11 = vsel %vm1097_vm7, %v1230_v30, %v1239_v37 }
 0x92f   :  { %v1202_v13 = vpop.permute.xlu0 %1201 }
 0x930   :  { %v1234_v59 = vrot.slane %v1202_v13, %v9108_v56 }
 0x932   :  { %v1241_v20 = vsel %vm1099_vm8, %v1234_v59, %v1240_v11 }
 0x933   :  { %v1243_v40 = vsel %vm1102_vm9, %v1241_v20, 0.0 }
 0x934   :  { %1244 = vadd.xlane.f32.xlu0 %v1243_v40 }
 0x9bd   :  { %v1245_v41 = vpop.xlane.xlu0 %1244 }
 0x9be   :  { %v1270_v29 = vrot.slane %v1245_v41, %v8957_v54  ;;  %v1250_v34 = vrot.slane %v1245_v41, %v8939_v36  ;;  %v1254_v7 = vrot.slane %v1245_v41, %v8929_v32  ;;  %v1258_v1 = vrot.slane %v1245_v41, %v8947_v46 }
 0x9bf   :  { %v1262_v61 = vrot.slane %v1245_v41, %v8952_v52  ;;  %v1266_v58 = vrot.slane %v1245_v41, %v8932_v33  ;;  %v1274_v30 = vrot.slane %v1245_v41, %v9060_v4  ;;  %v1278_v59 = vrot.slane %v1245_v41, %v9055_v2 }
 0x9c0   :  { %7893 = vrcp.f32 %v1270_v29 }
 0x9c1   :  { %7895 = vrcp.f32 %v1250_v34 }
 0x9c2   :  { %7897 = vrcp.f32 %v1254_v7 }
 0x9c3   :  { %7899 = vrcp.f32 %v1258_v1  ;;  %v9192_v1 = vld [vmem:[#allocation19 + $0x18] sm:$0xff] }
 0x9c4   :  { %7901 = vrcp.f32 %v1262_v61  ;;  %7440 = vmatpush3.msra.mxu0 %v9192_v1  ;;  %v9198_v61 = vld [vmem:[#allocation19 + $0x8] sm:$0xff] }
 0x9c5   :  { %7903 = vrcp.f32 %v1266_v58 }
 0x9c6   :  { %7905 = vrcp.f32 %v1274_v30 }
 0x9c7   :  { %7907 = vrcp.f32 %v1278_v59 }
 0x9cd   :  { %v7894_v20 = vpop.eup %7893 }
 0x9ce   :  { %v7896_v8 = vpop.eup %7895  ;;  %v1298_v63 = vmul.f32 %v7894_v20, %v7888_v3 }
 0x9cf   :  { %v1288_v16 = vmul.f32 %v7896_v8, %v9137_v53  ;;  %v7898_v14 = vpop.eup %7897 }
 0x9d0   :  { %1330 = vperm.xlu0 %7859, %v1298_v63   ;;  %v1290_v13 = vmul.f32 %v7898_v14, %v9142_v31  ;;  %v7900_v37 = vpop.eup %7899 }
 0x9d1   :  { %1305 = vperm.xlu1 %7860, %v1288_v16   ;;  %v1292_v11 = vmul.f32 %v7900_v37, %v9146_v6  ;;  %v7902_v40 = vpop.eup %7901  ;;  %v9194_v6 = vld [vmem:[#allocation19 + $0x10] sm:$0xff] }
 0x9d2   :  { %v1294_v53 = vmul.f32 %v7902_v40, %v9149_v12  ;;  %v7904_v3 = vpop.eup %7903  ;;  %v10914_v12 = vmov 0.0  }
 0x9d3   :  { %v1296_v29 = vmul.f32 %v7904_v3, %v9152_v55  ;;  %v7906_v34 = vpop.eup %7905  ;;  %7441 = vmatprep.subr.mxu0 %v10914_v12  ;;  %v9202_v55 = vld [vmem:[#allocation19] sm:$0xff] }
 0x9d4   :  { %v1300_v31 = vmul.f32 %v7906_v34, %v9155_v0  ;;  %v7908_v7 = vpop.eup %7907  ;;  %7442 = vmatpush3.msra.mxu0 %v9194_v6 }
 0x9d5   :  { %1310 = vperm.xlu1 %7860, %v1290_v13   ;;  %v1302_v41 = vmul.f32 %v7908_v7, %v9158_v57  ;;  %7443 = vmatprep.subr.mxu0 %v10914_v12 }
 0x9d6   :  { %7444 = vmatpush3.msra.mxu0 %v9198_v61 }
 0x9d7   :  { %7445 = vmatprep.subr.mxu0 %v10914_v12 }
 0x9d8   :  { %7446 = vmatpush3.msra.mxu0 %v9202_v55 }
 0x9d9   :  { %1315 = vperm.xlu1 %7860, %v1292_v11   ;;  %7461 = vmatprep.subr.mxu0 %v10914_v12 }
 0x9dd   :  { %1320 = vperm.xlu1 %7860, %v1294_v53  }
 0x9e1   :  { %1325 = vperm.xlu1 %7860, %v1296_v29  }
 0x9e5   :  { %1335 = vperm.xlu1 %7860, %v1300_v31  }
 0x9e9   :  { %1340 = vperm.xlu1 %7860, %v1302_v41  }
 0xa4b   :  { %v1331_v20 = vpop.permute.xlu0 %1330 }
 0xa4c   :  { %v1306_v0 = vpop.permute.xlu1 %1305  ;;  %v1348_v30 = vmul.f32 %v1331_v20, %v9040_v17 }
 0xa4d   :  { %v1343_v57 = vmul.f32 %v1306_v0, %v8992_v15 }
 0xa4e   :  { %v1386_v40 = vsel %vm271_vm1, %v1348_v30, 0.0 }
 0xa4f   :  { %v1351_v63 = vsel %vm271_vm1, %v1343_v57, 0.0  ;;  %v1387_v41 = vrot.slane %v1386_v40, 4 }
 0xa50   :  { %v1311_v58 = vpop.permute.xlu1 %1310  ;;  %v1352_v37 = vrot.slane %v1351_v63, 4 }
 0xa51   :  { %v1344_v8 = vmul.f32 %v1311_v58, %v8998_v19  ;;  %v1388_v4 = vadd.f32 %v1387_v41, %v1386_v40 }
 0xa52   :  { %v1353_v31 = vadd.f32 %v1352_v37, %v1351_v63 }
 0xa53   :  { %v1358_v16 = vsel %vm271_vm1, %v1344_v8, 0.0  ;;  %v1389_v33 = vrot.slane %v1388_v4, 2 }
 0xa54   :  { %v1359_v14 = vrot.slane %v1358_v16, 4  ;;  %v1316_v13 = vpop.permute.xlu1 %1315  ;;  %v1354_v2 = vrot.slane %v1353_v31, 2 }
 0xa55   :  { %v1345_v59 = vmul.f32 %v1316_v13, %v9004_v35 }
 0xa56   :  { %v1360_v53 = vadd.f32 %v1359_v14, %v1358_v16 }
 0xa57   :  { %v1365_v11 = vsel %vm271_vm1, %v1345_v59, 0.0 }
 0xa58   :  { %v1366_v3 = vrot.slane %v1365_v11, 4  ;;  %v1321_v29 = vpop.permute.xlu1 %1320  ;;  %v1361_v57 = vrot.slane %v1360_v53, 2 }
 0xa59   :  { %v1346_v34 = vmul.f32 %v1321_v29, %v9024_v9 }
 0xa5a   :  { %v1367_v7 = vadd.f32 %v1366_v3, %v1365_v11  ;;  %v1362_v30 = vadd.f32 %v1361_v57, %v1360_v53  ;;  %v1355_v11 = vadd.f32 %v1354_v2, %v1353_v31 }
 0xa5b   :  { %v1372_v0 = vsel %vm271_vm1, %v1346_v34, 0.0 }
 0xa5c   :  { %v1373_v58 = vrot.slane %v1372_v0, 4  ;;  %v1326_v20 = vpop.permute.xlu1 %1325  ;;  %v1368_v8 = vrot.slane %v1367_v7, 2  ;;  %v1363_v46 = vrot.slane %v1362_v30, 1  ;;  %v1356_v53 = vrot.slane %v1355_v11, 1 }
 0xa5d   :  { %v1347_v13 = vmul.f32 %v1326_v20, %v9012_v50 }
 0xa5e   :  { %v1374_v59 = vadd.f32 %v1373_v58, %v1372_v0  ;;  %v1369_v63 = vadd.f32 %v1368_v8, %v1367_v7  ;;  %v1390_v7 = vadd.f32 %v1389_v33, %v1388_v4  ;;  %v1364_v2 = vadd.f32 %v1363_v46, %v1362_v30 }
 0xa5f   :  { %v1379_v16 = vsel %vm271_vm1, %v1347_v13, 0.0 }
 0xa60   :  { %v1375_v14 = vrot.slane %v1374_v59, 2  ;;  %v1380_v54 = vrot.slane %v1379_v16, 4  ;;  %v1336_v29 = vpop.permute.xlu1 %1335  ;;  %v1370_v40 = vrot.slane %v1369_v63, 1  ;;  %v1391_v50 = vrot.slane %v1390_v7, 1 }
 0xa61   :  { %v1349_v37 = vmul.f32 %v1336_v29, %v9030_v10 }
 0xa62   :  { %v1376_v3 = vadd.f32 %v1375_v14, %v1374_v59  ;;  %v1381_v34 = vadd.f32 %v1380_v54, %v1379_v16  ;;  %v1371_v16 = vadd.f32 %v1370_v40, %v1369_v63  ;;  %v1357_v14 = vadd.f32 %v1356_v53, %v1355_v11  ;;  %v9232_v40 = vld [vmem:[#allocation13 + $0x18] sm:$0xff] }
 0xa63   :  { %v1393_v52 = vsel %vm271_vm1, %v1349_v37, 0.0  ;;  %v1392_v30 = vadd.f32 %v1391_v50, %v1390_v7  ;;  %v9242_v50 = vld [vmem:[#allocation13 + $0x8] sm:$0xff] }
 0xa64   :  { %v1382_v20 = vrot.slane %v1381_v34, 2  ;;  %v1394_v32 = vrot.slane %v1393_v52, 4  ;;  %v1341_v0 = vpop.permute.xlu1 %1340  ;;  %v1377_v57 = vrot.slane %v1376_v3, 1 }
 0xa65   :  { %v1350_v41 = vmul.f32 %v1341_v0, %v9049_v43  ;;  %v1485_v0 = vsel %vm1087_vm2, %v1364_v2, %v1357_v14 }
 0xa66   :  { %v1383_v58 = vadd.f32 %v1382_v20, %v1381_v34  ;;  %v1395_v13 = vadd.f32 %v1394_v32, %v1393_v52  ;;  %v1378_v29 = vadd.f32 %v1377_v57, %v1376_v3  ;;  %v1486_v32 = vsel %vm1089_vm3, %v1371_v16, %v1485_v0  ;;  %v9319_v16 = vld [vmem:[%s10779_s12] ss:$0 sm:$0xff] }
 0xa67   :  { %v1400_v8 = vsel %vm271_vm1, %v1350_v41, 0.0 }
 0xa68   :  { %v1384_v31 = vrot.slane %v1383_v58, 1  ;;  %v1396_v54 = vrot.slane %v1395_v13, 2  ;;  %v1401_v59 = vrot.slane %v1400_v8, 4  ;;  %v1487_v33 = vsel %vm1091_vm4, %v1378_v29, %v1486_v32 }
 0xa6a   :  { %v1397_v37 = vadd.f32 %v1396_v54, %v1395_v13  ;;  %v1402_v56 = vadd.f32 %v1401_v59, %v1400_v8  ;;  %v1385_v10 = vadd.f32 %v1384_v31, %v1383_v58 }
 0xa6c   :  { %v1398_v43 = vrot.slane %v1397_v37, 1  ;;  %v1403_v17 = vrot.slane %v1402_v56, 2  ;;  %v1488_v4 = vsel %vm1093_vm5, %v1385_v10, %v1487_v33  ;;  %v9246_v10 = vld [vmem:[#allocation13] sm:$0xff]  ;;  %v10915_v33 = vld [vmem:[#allocation39_spill] sm:$0xff] }
 0xa6d   :  { %v1489_v3 = vsel %vm1095_vm6, %v1392_v30, %v1488_v4 }
 0xa6e   :  { %v1404_v52 = vadd.f32 %v1403_v17, %v1402_v56  ;;  %v1399_v46 = vadd.f32 %v1398_v43, %v1397_v37  ;;  %v9238_v56 = vld [vmem:[#allocation13 + $0x10] sm:$0xff] }
 0xa70   :  { %v1405_v63 = vrot.slane %v1404_v52, 1  ;;  %v1490_v34 = vsel %vm1097_vm7, %v1399_v46, %v1489_v3 }
 0xa72   :  { %v1406_v11 = vadd.f32 %v1405_v63, %v1404_v52 }
 0xa74   :  { %v1491_v20 = vsel %vm1099_vm8, %v1406_v11, %v1490_v34  ;;  %v9340_v34 = vld [vmem:[#allocation11 + $0x18] sm:$0xff] }
 0xa75   :  { %7448 = vmatmul.mubr.msk.f32.vlgmr.msra.gmra.mxu0 %vm271_vm1, %v1491_v20  ;;  %v9346_v20 = vld [vmem:[#allocation11 + $0x10] sm:$0xff] }
 0xa76   :  { %7462 = vmatpush3.msra.mxu0 %v9232_v40  ;;  %7469 = vmatprep.mubr.msk.f32.mxu0 %vm8584_vm0, %v10914_v12 }
 0xa77   :  { %7463 = vmatprep.subr.mxu0 %v10914_v12 }
 0xa78   :  { %7464 = vmatpush3.msra.mxu0 %v9238_v56 }
 0xa79   :  { %7465 = vmatprep.subr.mxu0 %v10914_v12 }
 0xa7a   :  { %7466 = vmatpush3.msra.mxu0 %v9242_v50 }
 0xa7b   :  { %7467 = vmatprep.subr.mxu0 %v10914_v12 }
 0xa7c   :  { %7468 = vmatpush3.msra.mxu0 %v9246_v10 }
 0xa7d   :  { %7470 = vmatmul.mubr.msk.f32.vlgmr.msra.gmra.mxu0 %vm271_vm1, %v8878_v62  ;;  %7483 = vmatprep.subr.mxu0 %v10914_v12 }
 0xa7e   :  { %7484 = vmatpush3.msra.mxu0 %v8820_v44  ;;  %7491 = vmatprep.mubr.msk.f32.mxu0 %vm8584_vm0, %v10914_v12 }
 0xa7f   :  { %7485 = vmatprep.subr.mxu0 %v10914_v12 }
 0xa80   :  { %7486 = vmatpush3.msra.mxu0 %v8834_v47 }
 0xa81   :  { %7487 = vmatprep.subr.mxu0 %v10914_v12 }
 0xa82   :  { %7488 = vmatpush3.msra.mxu0 %v8847_v49 }
 0xa83   :  { %7489 = vmatprep.subr.mxu0 %v10914_v12 }
 0xa84   :  { %7490 = vmatpush3.msra.mxu0 %v8857_v51 }
 0xa85   :  { %7505 = vmatprep.subr.mxu0 %v10914_v12 }
 0xb35   :  { %v1560_v62 = vpop.f32.mrf.mxu0 }
 0xb36   :  { %v1561_v44 = vadd.f32 %v1560_v62, %v8982_v5 }
 0xb37   :  { %v7449_v17 = vpop.f32.mrf.mxu0 }
 0xb38   :  { %7909 = vtanh.f32 %v1561_v44  ;;  %v10916_v17 = vld [vmem:[#allocation45_spill] sm:$0xff] }
 0xb3d   :  { %v1705_v43 = vpop.f32.mrf.mxu0 }
 0xb3f   :  { %v7471_v41 = vpop.f32.mrf.mxu0 }
 0xb45   :  { %v7910_v53 = vpop.eup %7909 }
 0xb46   :  { %6955 = vst.msk [vmem:[%s10783_s16] sm:$0xff] %vm271_vm1, %v7910_v53  ;;  %7459 = vmatmul.mubr.msk.f32.vlgmr.msra.gmra.mxu1 %vm271_vm1, %v7910_v53 }
 0xb47   :  { %7473 = vmatpush3.msra.mxu1 %v8802_v39  ;;  %7480 = vmatprep.mubr.msk.f32.mxu1 %vm8584_vm0, %v10914_v12  ;;  %v9290_v39 = vld [vmem:[#allocation14] ss:$0 sm:$0xff] }
 0xb48   :  { %7474 = vmatprep.subr.mxu1 %v10914_v12 }
 0xb49   :  { %7475 = vmatpush3.msra.mxu1 %v8812_v42  ;;  %v362_v42 = vadd.f32 %v9290_v39, %v8794_v18 }
 0xb4a   :  { %7476 = vmatprep.subr.mxu1 %v10914_v12 }
 0xb4b   :  { %7477 = vmatpush3.msra.mxu1 %v8824_v45 }
 0xb4c   :  { %7478 = vmatprep.subr.mxu1 %v10914_v12 }
 0xb4d   :  { %7479 = vmatpush3.msra.mxu1 %v8840_v48 }
 0xb4e   :  { %7481 = vmatmul.mubr.msk.f32.vlgmr.msra.gmra.mxu1 %vm271_vm1, %v8961_v60  ;;  %7494 = vmatprep.subr.mxu1 %v10914_v12 }
 0xb4f   :  { %7495 = vmatpush3.msra.mxu1 %v8892_v21  ;;  %7502 = vmatprep.mubr.msk.f32.mxu1 %vm8584_vm0, %v10914_v12 }
 0xb50   :  { %7496 = vmatprep.subr.mxu1 %v10914_v12 }
 0xb51   :  { %7497 = vmatpush3.msra.mxu1 %v8896_v23 }
 0xb52   :  { %7498 = vmatprep.subr.mxu1 %v10914_v12 }
 0xb53   :  { %7499 = vmatpush3.msra.mxu1 %v8904_v25 }
 0xb54   :  { %7500 = vmatprep.subr.mxu1 %v10914_v12 }
 0xb55   :  { %7501 = vmatpush3.msra.mxu1 %v8912_v27 }
 0xb56   :  { %7516 = vmatprep.subr.mxu1 %v10914_v12 }
 0xc06   :  { %v1634_v45 = vpop.f32.mrf.mxu1 }
 0xc07   :  { %v1638_v47 = vadd.f32 %v1634_v45, %v362_v42 }
 0xc08   :  { %v7460_v48 = vpop.f32.mrf.mxu1 }
 0xc09   :  { %v1709_v49 = vadd.f32 %v1705_v43, %v1638_v47 }
 0xc0b   :  { %7911 = vtanh.f32 %v1709_v49  ;;  %v7093_v25 = vmul.f32 -1.442695, %v1709_v49 }
 0xc0d   :  { %7913 = vpow2.f32 %v7093_v25 }
 0xc0e   :  { %v1800_v51 = vpop.f32.mrf.mxu1 }
 0xc10   :  { %v7482_v21 = vpop.f32.mrf.mxu1 }
 0xc18   :  { %v7912_v23 = vpop.eup %7911 }
 0xc19   :  { %1719 = vrot.lane.b32.xlu1 %v7912_v23, %s8585_s4 }
 0xc1a   :  { %v7914_v27 = vpop.eup %7913 }
 0xc1b   :  { %v1713_v60 = vadd.f32 1.0, %v7914_v27 }
 0xc1d   :  { %7915 = vrcp.f32 %v1713_v60 }
 0xc2a   :  { %v7916_v5 = vpop.eup %7915 }
 0xc2b   :  { %v1717_v18 = vmul.f32 %v7916_v5, %v8799_v38 }
 0xc8b   :  { %v1720_v57 = vpop.permute.xlu1 %1719 }
 0xc8c   :  { %v1722_v58 = vmul.f32 %v7916_v5, %v1720_v57 }
 0xc8e   :  { %1724 = vrot.lane.b32.xlu1 %v1722_v58, %s8586_s0 }
 0xd00   :  { %v1725_v13 = vpop.permute.xlu1 %1724 }
 0xd01   :  { %v9297_v7 = vadd.f32 %v1725_v13, %v1717_v18 }
 0xd03   :  { %7917 = vtanh.f32 %v9297_v7 }
 0xd10   :  { %v7918_v8 = vpop.eup %7917 }
 0xd11   :  { %1730 = vrot.lane.b32.xlu1 %v7918_v8, %s8585_s4 }
 0xd83   :  { %v1731_v2 = vpop.permute.xlu1 %1730 }
 0xd84   :  { %v1733_v31 = vmul.f32 %v7916_v5, %v1731_v2 }
 0xd86   :  { %1805 = vrot.lane.b32.xlu0 %v1733_v31, %s8586_s0 }
 0xdf8   :  { %v9302_v54 = vpop.permute.xlu0 %1805 }
 0xdf9   :  { %7492 = vmatmul.mubr.msk.f32.vlgmr.msra.gmra.mxu0 %vm271_vm1, %v9302_v54 }
 0xdfa   :  { %7506 = vmatpush3.msra.mxu0 %v8894_v22  ;;  %7513 = vmatprep.mubr.msk.f32.mxu0 %vm8584_vm0, %v10914_v12 }
 0xdfb   :  { %7507 = vmatprep.subr.mxu0 %v10914_v12 }
 0xdfc   :  { %7508 = vmatpush3.msra.mxu0 %v8900_v24 }
 0xdfd   :  { %7509 = vmatprep.subr.mxu0 %v10914_v12 }
 0xdfe   :  { %7510 = vmatpush3.msra.mxu0 %v8906_v26 }
 0xdff   :  { %7511 = vmatprep.subr.mxu0 %v10914_v12 }
 0xe00   :  { %7512 = vmatpush3.msra.mxu0 %v8914_v28 }
 0xe01   :  { %7527 = vmatprep.subr.mxu0 %v10914_v12 }
 0xeb9   :  { %v1875_v38 = vpop.f32.mrf.mxu0 }
 0xeba   :  { %v1876_v59 = vadd.f32 %v1875_v38, %v1800_v51 }
 0xebb   :  { %v7493_v22 = vpop.f32.mrf.mxu0 }
 0xebc   :  { %v1879_v24 = vadd.f32 %v9319_v16, %v1876_v59 }
 0xebe   :  { %7919 = vtanh.f32 %v1879_v24  ;;  %v7096_v26 = vmul.f32 -1.442695, %v1879_v24 }
 0xec0   :  { %7921 = vpow2.f32 %v7096_v26 }
 0xecb   :  { %v7920_v14 = vpop.eup %7919 }
 0xecc   :  { %1889 = vrot.lane.b32.xlu1 %v7920_v14, %s8585_s4 }
 0xecd   :  { %v7922_v29 = vpop.eup %7921 }
 0xece   :  { %v1883_v28 = vadd.f32 1.0, %v7922_v29  ;;  %v10918_v29 = vld [vmem:[#allocation46_spill] sm:$0xff] }
 0xed0   :  { %7923 = vrcp.f32 %v1883_v28 }
 0xedd   :  { %v7924_v37 = vpop.eup %7923 }
 0xede   :  { %v1887_v52 = vmul.f32 %v7924_v37, %v10915_v33  ;;  %v10920_v33 = vld [vmem:[#allocation47_spill] sm:$0xff] }
 0xf3e   :  { %v1890_v0 = vpop.permute.xlu1 %1889 }
 0xf3f   :  { %v1892_v32 = vmul.f32 %v7924_v37, %v1890_v0  ;;  %v10919_v0 = vld [vmem:[#allocation49_spill] sm:$0xff] }
 0xf41   :  { %1894 = vrot.lane.b32.xlu0 %v1892_v32, %s8586_s0 }
 0xfb3   :  { %v1895_v46 = vpop.permute.xlu0 %1894 }
 0xfb4   :  { %v9325_v4 = vadd.f32 %v1895_v46, %v1887_v52 }
 0xfb6   :  { %7925 = vtanh.f32 %v9325_v4 }
 0xfc3   :  { %v7926_v30 = vpop.eup %7925 }
 0xfc4   :  { %1900 = vrot.lane.b32.xlu1 %v7926_v30, %s8585_s4 }
0x1036   :  { %v1901_v63 = vpop.permute.xlu1 %1900 }
0x1037   :  { %v1903_v11 = vmul.f32 %v7924_v37, %v1901_v63 }
0x1039   :  { %1905 = vrot.lane.b32.xlu0 %v1903_v11, %s8586_s0  ;;  %v10921_v11 = vld [vmem:[#allocation52_spill] sm:$0xff] }
0x10ab   :  { %v9330_v3 = vpop.permute.xlu0 %1905 }
0x10ac   :  { %7503 = vmatmul.mubr.msk.f32.vlgmr.msra.gmra.mxu1 %vm271_vm1, %v9330_v3  ;;  %7514 = vmatmul.mubr.msk.f32.vlgmr.msra.gmra.mxu0 %vm271_vm1, %v9330_v3 }
0x10ad   :  { %7517 = vmatpush3.msra.mxu1 %v9192_v1  ;;  %7524 = vmatprep.mubr.msk.f32.mxu1 %vm8584_vm0, %v10914_v12  ;;  %v9352_v1 = vld [vmem:[#allocation11 + $0x8] sm:$0xff] }
0x10ae   :  { %7518 = vmatprep.subr.mxu1 %v10914_v12  ;;  %7528 = vmatpush3.msra.mxu0 %v9340_v34 }
0x10af   :  { %7519 = vmatpush3.msra.mxu1 %v9194_v6  ;;  %7529 = vmatprep.subr.mxu0 %v10914_v12  ;;  %v9358_v6 = vld [vmem:[#allocation11] sm:$0xff] }
0x10b0   :  { %7520 = vmatprep.subr.mxu1 %v10914_v12  ;;  %7530 = vmatpush3.msra.mxu0 %v9346_v20 }
0x10b1   :  { %7521 = vmatpush3.msra.mxu1 %v9198_v61  ;;  %7531 = vmatprep.subr.mxu0 %v10914_v12 }
0x10b2   :  { %7522 = vmatprep.subr.mxu1 %v10914_v12  ;;  %7532 = vmatpush3.msra.mxu0 %v9352_v1 }
0x10b3   :  { %7523 = vmatpush3.msra.mxu1 %v9202_v55  ;;  %7533 = vmatprep.subr.mxu0 %v10914_v12 }
0x10b4   :  { %7538 = vmatprep.subr.mxu1 %v10914_v12  ;;  %7534 = vmatpush3.msra.mxu0 %v9358_v6 }
0x10b5   :  { %7535 = vmatprep.mubr.msk.f32.mxu0 %vm8584_vm0, %v10914_v12  ;;  %7549 = vmatprep.subr.mxu0 %v10914_v12 }
0x116c   :  { %v1975_v61 = vpop.f32.mrf.mxu1  ;;  %v9364_v62 = vpop.f32.mrf.mxu0 }
0x116d   :  { %v1980_v44 = vcombine.high %v1975_v61, %v1975_v61  ;;  %v1987_v43 = vrot.slane %v1975_v61, %v10916_v17 }
0x116e   :  { %v7504_v55 = vpop.f32.mrf.mxu1  ;;  %v7515_v41 = vpop.f32.mrf.mxu0 }
0x116f   :  { %v1994_v53 = vrot.slane %v1980_v44, %v10916_v17  ;;  %v1995_v42 = vcombine.high %v1987_v43, %v1987_v43  ;;  %v2003_v45 = vrot.slane %v1987_v43, %v10916_v17  ;;  %v10922_v43 = vld [vmem:[#allocation54_spill] sm:$0xff] }
0x1171   :  { %v1996_v47 = vcombine.high %v1994_v53, %v1994_v53  ;;  %v2017_v48 = vrot.slane %v1995_v42, %v10916_v17  ;;  %v2025_v49 = vcombine.high %v2003_v45, %v2003_v45  ;;  %v2010_v51 = vrot.slane %v1994_v53, %v10916_v17  ;;  %v10923_v53 = vld [vmem:[#allocation55_spill] sm:$0xff] }
0x1172   :  { %v2032_v21 = vrot.slane %v2003_v45, %v8939_v36 }
0x1173   :  { %v2036_v23 = vrot.slane %v2017_v48, %v8939_v36  ;;  %v2027_v25 = vcombine.high %v2017_v48, %v2017_v48  ;;  %v2040_v27 = vrot.slane %v2025_v49, %v8939_v36  ;;  %v2024_v60 = vrot.slane %v1996_v47, %v10916_v17  ;;  %v10924_v47 = vld [vmem:[#allocation53_spill] sm:$0xff] }
0x1174   :  { %v2069_v5 = vmul.f32 %v2032_v21, %v8992_v15  ;;  %v2048_v8 = vrot.slane %v2010_v51, %v8939_v36  ;;  %v2026_v22 = vcombine.high %v2010_v51, %v2010_v51  ;;  %v10925_v51 = vld [vmem:[#allocation57_spill] sm:$0xff] }
0x1175   :  { %v2070_v57 = vmul.f32 %v2036_v23, %v8998_v19  ;;  %v2044_v58 = vrot.slane %v2027_v25, %v8939_v36  ;;  %v2052_v13 = vrot.slane %v2024_v60, %v8939_v36  ;;  %v2028_v2 = vcombine.high %v2024_v60, %v2024_v60  ;;  %v10917_v19 = vld [vmem:[#allocation48_spill] sm:$0xff] }
0x1176   :  { %v2077_v18 = vsel %vm271_vm1, %v2069_v5, 0.0  ;;  %v2071_v59 = vmul.f32 %v2040_v27, %v9004_v35  ;;  %v2073_v28 = vmul.f32 %v2048_v8, %v10918_v29  ;;  %v2056_v37 = vrot.slane %v2026_v22, %v8939_v36  ;;  %v10926_v25 = vld [vmem:[#allocation56_spill] sm:$0xff]  ;;  %v10927_v5 = vld [vmem:[#allocation58_spill] sm:$0xff] }
0x1177   :  { %2078 = vadd.xlane.f32.xlu1 %v2077_v18  ;;  %v2080_v31 = vsel %vm271_vm1, %v2070_v57, 0.0  ;;  %v2072_v38 = vmul.f32 %v2044_v58, %v9024_v9  ;;  %v2074_v24 = vmul.f32 %v2052_v13, %v10917_v19  ;;  %v2060_v14 = vrot.slane %v2028_v2, %v8939_v36  ;;  %v10928_v18 = vld [vmem:[#allocation59_spill] sm:$0xff] }
0x1178   :  { %2081 = vadd.xlane.f32.xlu0 %v2080_v31  ;;  %v2083_v26 = vsel %vm271_vm1, %v2071_v59, 0.0  ;;  %v2089_v32 = vsel %vm271_vm1, %v2073_v28, 0.0  ;;  %v2075_v52 = vmul.f32 %v2056_v37, %v10920_v33  ;;  %v10929_v31 = vld [vmem:[#allocation60_spill] sm:$0xff] }
0x1179   :  { %v2086_v15 = vsel %vm271_vm1, %v2072_v38, 0.0  ;;  %v2092_v9 = vsel %vm271_vm1, %v2074_v24, 0.0  ;;  %v2076_v35 = vmul.f32 %v2060_v14, %v10919_v0 }
0x117a   :  { %v2095_v30 = vsel %vm271_vm1, %v2075_v52, 0.0 }
0x117b   :  { %2087 = vadd.xlane.f32.xlu1 %v2086_v15  ;;  %v2098_v46 = vsel %vm271_vm1, %v2076_v35, 0.0 }
0x117c   :  { %2084 = vadd.xlane.f32.xlu0 %v2083_v26 }
0x117f   :  { %2093 = vadd.xlane.f32.xlu1 %v2092_v9 }
0x1180   :  { %2090 = vadd.xlane.f32.xlu0 %v2089_v32 }
0x1183   :  { %2099 = vadd.xlane.f32.xlu1 %v2098_v46 }
0x1184   :  { %2096 = vadd.xlane.f32.xlu0 %v2095_v30 }
0x1200   :  { %v2079_v63 = vpop.xlane.xlu1 %2078 }
0x1201   :  { %v2101_v61 = vadd.f32 %v2079_v63, %v10921_v11  ;;  %v2082_v44 = vpop.xlane.xlu0 %2081 }
0x1202   :  { %v2102_v55 = vadd.f32 %v2082_v44, %v10922_v43 }
0x1203   :  { %2118 = vperm.xlu0 %7859, %v2101_v61  }
0x1204   :  { %v2088_v41 = vpop.xlane.xlu1 %2087  ;;  %2121 = vperm.xlu1 %7860, %v2102_v55  }
0x1205   :  { %v2104_v42 = vadd.f32 %v2088_v41, %v10923_v53  ;;  %v2085_v45 = vpop.xlane.xlu0 %2084 }
0x1206   :  { %v2103_v48 = vadd.f32 %v2085_v45, %v10924_v47 }
0x1207   :  { %2127 = vperm.xlu0 %7859, %v2104_v42  }
0x1208   :  { %v2094_v49 = vpop.xlane.xlu1 %2093  ;;  %2124 = vperm.xlu1 %7860, %v2103_v48  }
0x1209   :  { %v2106_v21 = vadd.f32 %v2094_v49, %v10925_v51  ;;  %v2091_v23 = vpop.xlane.xlu0 %2090 }
0x120a   :  { %v2105_v27 = vadd.f32 %v2091_v23, %v10926_v25  ;;  %v10930_v23 = vld [vmem:[#allocation40_spill] sm:$0xff] }
0x120b   :  { %2133 = vperm.xlu0 %7859, %v2106_v21  }
0x120c   :  { %v2100_v60 = vpop.xlane.xlu1 %2099  ;;  %2130 = vperm.xlu1 %7860, %v2105_v27  }
0x120d   :  { %v2108_v57 = vadd.f32 %v2100_v60, %v10927_v5  ;;  %v2097_v58 = vpop.xlane.xlu0 %2096 }
0x120e   :  { %v2107_v13 = vadd.f32 %v2097_v58, %v10928_v18  ;;  %v10931_v58 = vld [vmem:[#allocation42_spill] sm:$0xff] }
0x120f   :  { %2139 = vperm.xlu0 %7859, %v2108_v57  }
0x1210   :  { %2136 = vperm.xlu1 %7860, %v2107_v13  }
0x127e   :  { %v2119_v8 = vpop.permute.xlu0 %2118 }
0x127f   :  { %v2122_v2 = vpop.permute.xlu1 %2121  ;;  %v2144_v22 = vrot.slane %v2119_v8, %v10929_v31 }
0x1280   :  { %v2148_v38 = vrot.slane %v2122_v2, %v10929_v31 }
0x1282   :  { %v2128_v59 = vpop.permute.xlu0 %2127  ;;  %v2173_v24 = vsel %vm1087_vm2, %v2148_v38, %v2144_v22  ;;  %v10932_v22 = vld [vmem:[#allocation43_spill] sm:$0xff] }
0x1283   :  { %v2125_v15 = vpop.permute.xlu1 %2124  ;;  %v2156_v29 = vrot.slane %v2128_v59, %v10929_v31 }
0x1284   :  { %v2152_v19 = vrot.slane %v2125_v15, %v10929_v31 }
0x1286   :  { %v2174_v14 = vsel %vm1089_vm3, %v2152_v19, %v2173_v24  ;;  %v2134_v26 = vpop.permute.xlu0 %2133 }
0x1287   :  { %v2131_v28 = vpop.permute.xlu1 %2130  ;;  %v2175_v9 = vsel %vm1091_vm4, %v2156_v29, %v2174_v14  ;;  %v2164_v32 = vrot.slane %v2134_v26, %v10929_v31  ;;  %v10933_v14 = vld [vmem:[#allocation41_spill] sm:$0xff] }
0x1288   :  { %v2160_v37 = vrot.slane %v2131_v28, %v10929_v31 }
0x128a   :  { %v2176_v0 = vsel %vm1093_vm5, %v2160_v37, %v2175_v9  ;;  %v2140_v35 = vpop.permute.xlu0 %2139  ;;  %v10934_v37 = vld [vmem:[#allocation44_spill] sm:$0xff] }
0x128b   :  { %v2137_v33 = vpop.permute.xlu1 %2136  ;;  %v2172_v46 = vrot.slane %v2140_v35, %v10929_v31  ;;  %v2177_v30 = vsel %vm1095_vm6, %v2164_v32, %v2176_v0  ;;  %v10935_v32 = vld [vmem:[#allocation51_spill] sm:$0xff] }
0x128c   :  { %v2168_v52 = vrot.slane %v2137_v33, %v10929_v31 }
0x128e   :  { %v2178_v63 = vsel %vm1097_vm7, %v2168_v52, %v2177_v30 }
0x128f   :  { %v2179_v44 = vsel %vm1099_vm8, %v2172_v46, %v2178_v63 }
0x1290   :  { %v2181_v41 = vsel %vm1102_vm9, %v2179_v44, -inf }
0x1291   :  { %2182 = vmax.xlane.f32.xlu1 %v2181_v41 }
0x131a   :  { %v2183_v45 = vpop.xlane.xlu1 %2182 }
0x131b   :  { %v2188_v49 = vrot.slane %v2183_v45, %v8939_v36  ;;  %v2192_v60 = vrot.slane %v2183_v45, %v10930_v23  ;;  %v2196_v8 = vrot.slane %v2183_v45, %v10931_v58  ;;  %v2200_v15 = vrot.slane %v2183_v45, %v10932_v22 }
0x131c   :  { %v2204_v26 = vrot.slane %v2183_v45, %v10933_v14  ;;  %v2208_v9 = vrot.slane %v2183_v45, %v10934_v37  ;;  %v2212_v33 = vrot.slane %v2183_v45, %v10935_v32 }
0x131d   :  { %v2225_v2 = vsub.f32 %v2101_v61, %v2188_v49  ;;  %v2226_v38 = vsub.f32 %v2102_v55, %v2192_v60  ;;  %v2227_v19 = vsub.f32 %v2103_v48, %v2196_v8  ;;  %v2228_v29 = vsub.f32 %v2104_v42, %v2200_v15  ;;  %v10936_v48 = vld [vmem:[#allocation50_spill] sm:$0xff] }
0x131e   :  { %v2229_v0 = vsub.f32 %v2105_v27, %v2204_v26  ;;  %v2230_v61 = vsub.f32 %v2106_v21, %v2208_v9  ;;  %v2216_v46 = vrot.slane %v2183_v45, %v10936_v48  ;;  %v2231_v30 = vsub.f32 %v2107_v13, %v2212_v33 }
0x131f   :  { %v2233_v59 = vmul.f32 1.442695, %v2225_v2  ;;  %v2235_v24 = vmul.f32 1.442695, %v2226_v38  ;;  %v2237_v28 = vmul.f32 1.442695, %v2227_v19 }
0x1320   :  { %v2239_v35 = vmul.f32 1.442695, %v2228_v29  ;;  %v2241_v55 = vmul.f32 1.442695, %v2229_v0  ;;  %v2243_v42 = vmul.f32 1.442695, %v2230_v61  ;;  %v2232_v27 = vsub.f32 %v2108_v57, %v2216_v46 }
0x1321   :  { %7927 = vpow2.f32 %v2233_v59  ;;  %v2245_v44 = vmul.f32 1.442695, %v2231_v30 }
0x1322   :  { %7929 = vpow2.f32 %v2235_v24  ;;  %v2247_v21 = vmul.f32 1.442695, %v2232_v27 }
0x1323   :  { %7931 = vpow2.f32 %v2237_v28 }
0x1324   :  { %7933 = vpow2.f32 %v2239_v35 }
0x1325   :  { %7935 = vpow2.f32 %v2241_v55 }
0x1326   :  { %7937 = vpow2.f32 %v2243_v42 }
0x1327   :  { %7939 = vpow2.f32 %v2245_v44 }
0x1328   :  { %7941 = vpow2.f32 %v2247_v21 }
0x132e   :  { %v9427_v52 = vpop.eup %7927 }
0x132f   :  { %2258 = vperm.xlu0 %7859, %v9427_v52   ;;  %v9431_v63 = vpop.eup %7929 }
0x1330   :  { %v9434_v41 = vpop.eup %7931 }
0x1331   :  { %v9437_v49 = vpop.eup %7933 }
0x1332   :  { %v9440_v13 = vpop.eup %7935 }
0x1333   :  { %2261 = vperm.xlu0 %7859, %v9431_v63   ;;  %v7938_v45 = vpop.eup %7937 }
0x1334   :  { %v9443_v57 = vpop.eup %7939 }
0x1335   :  { %v9446_v60 = vpop.eup %7941 }
0x1337   :  { %2264 = vperm.xlu0 %7859, %v9434_v41  }
0x133b   :  { %2267 = vperm.xlu0 %7859, %v9437_v49  }
0x133f   :  { %2270 = vperm.xlu0 %7859, %v9440_v13  }
0x1343   :  { %2273 = vperm.xlu0 %7859, %v7938_v45  }
0x1347   :  { %2276 = vperm.xlu0 %7859, %v9443_v57  }
0x134b   :  { %2279 = vperm.xlu0 %7859, %v9446_v60  }
0x13aa   :  { %v2259_v8 = vpop.permute.xlu0 %2258 }
0x13ab   :  { %v2284_v29 = vrot.slane %v2259_v8, %v10929_v31 }
0x13ae   :  { %v2262_v2 = vpop.permute.xlu0 %2261 }
0x13af   :  { %v2288_v24 = vrot.slane %v2262_v2, %v10929_v31 }
0x13b1   :  { %v2313_v35 = vsel %vm1087_vm2, %v2288_v24, %v2284_v29 }
0x13b2   :  { %v2265_v38 = vpop.permute.xlu0 %2264 }
0x13b3   :  { %v2292_v26 = vrot.slane %v2265_v38, %v10929_v31 }
0x13b5   :  { %v2314_v61 = vsel %vm1089_vm3, %v2292_v26, %v2313_v35 }
0x13b6   :  { %v2268_v59 = vpop.permute.xlu0 %2267 }
0x13b7   :  { %v2296_v28 = vrot.slane %v2268_v59, %v10929_v31 }
0x13b9   :  { %v2315_v46 = vsel %vm1091_vm4, %v2296_v28, %v2314_v61 }
0x13ba   :  { %v2271_v15 = vpop.permute.xlu0 %2270 }
0x13bb   :  { %v2300_v9 = vrot.slane %v2271_v15, %v10929_v31 }
0x13bd   :  { %v2316_v30 = vsel %vm1093_vm5, %v2300_v9, %v2315_v46 }
0x13be   :  { %v2274_v19 = vpop.permute.xlu0 %2273 }
0x13bf   :  { %v2304_v33 = vrot.slane %v2274_v19, %v10929_v31 }
0x13c1   :  { %v2317_v44 = vsel %vm1095_vm6, %v2304_v33, %v2316_v30 }
0x13c2   :  { %v2277_v0 = vpop.permute.xlu0 %2276 }
0x13c3   :  { %v2308_v55 = vrot.slane %v2277_v0, %v10929_v31 }
0x13c5   :  { %v2318_v21 = vsel %vm1097_vm7, %v2308_v55, %v2317_v44 }
0x13c6   :  { %v2280_v42 = vpop.permute.xlu0 %2279 }
0x13c7   :  { %v2312_v27 = vrot.slane %v2280_v42, %v10929_v31 }
0x13c9   :  { %v2319_v8 = vsel %vm1099_vm8, %v2312_v27, %v2318_v21 }
0x13ca   :  { %v2321_v2 = vsel %vm1102_vm9, %v2319_v8, 0.0 }
0x13cb   :  { %2322 = vadd.xlane.f32.xlu0 %v2321_v2 }
0x1454   :  { %v2323_v38 = vpop.xlane.xlu0 %2322 }
0x1455   :  { %v2348_v59 = vrot.slane %v2323_v38, %v10934_v37  ;;  %v2328_v15 = vrot.slane %v2323_v38, %v8939_v36  ;;  %v2332_v19 = vrot.slane %v2323_v38, %v10930_v23  ;;  %v2336_v24 = vrot.slane %v2323_v38, %v10931_v58 }
0x1456   :  { %v2340_v26 = vrot.slane %v2323_v38, %v10932_v22  ;;  %v2344_v29 = vrot.slane %v2323_v38, %v10933_v14  ;;  %v2352_v33 = vrot.slane %v2323_v38, %v10935_v32  ;;  %v2356_v46 = vrot.slane %v2323_v38, %v10936_v48 }
0x1457   :  { %7943 = vrcp.f32 %v2348_v59 }
0x1458   :  { %7945 = vrcp.f32 %v2328_v15 }
0x1459   :  { %7947 = vrcp.f32 %v2332_v19 }
0x145a   :  { %7949 = vrcp.f32 %v2336_v24  ;;  %v9497_v24 = vld [vmem:[%s10897_s29 + $0x28] sm:$0xff] }
0x145b   :  { %7951 = vrcp.f32 %v2340_v26 }
0x145c   :  { %7953 = vrcp.f32 %v2344_v29 }
0x145d   :  { %7955 = vrcp.f32 %v2352_v33 }
0x145e   :  { %7957 = vrcp.f32 %v2356_v46 }
0x1464   :  { %v7944_v28 = vpop.eup %7943 }
0x1465   :  { %v7946_v9 = vpop.eup %7945  ;;  %v2376_v0 = vmul.f32 %v7944_v28, %v7938_v45 }
0x1466   :  { %v2366_v35 = vmul.f32 %v7946_v9, %v9427_v52  ;;  %v7948_v61 = vpop.eup %7947  ;;  %v9503_v9 = vld [vmem:[%s10897_s29 + $0x10] sm:$0xff] }
0x1467   :  { %2408 = vperm.xlu0 %7859, %v2376_v0   ;;  %v2368_v55 = vmul.f32 %v7948_v61, %v9431_v63  ;;  %v7950_v30 = vpop.eup %7949 }
0x1468   :  { %2383 = vperm.xlu1 %7860, %v2366_v35   ;;  %v2370_v42 = vmul.f32 %v7950_v30, %v9434_v41  ;;  %v7952_v27 = vpop.eup %7951  ;;  %v9483_v41 = vld [vmem:[%s10897_s29] sm:$0xff] }
0x1469   :  { %v2372_v52 = vmul.f32 %v7952_v27, %v9437_v49  ;;  %v7954_v45 = vpop.eup %7953 }
0x146a   :  { %v2374_v44 = vmul.f32 %v7954_v45, %v9440_v13  ;;  %v7956_v21 = vpop.eup %7955  ;;  %v9489_v13 = vld [vmem:[%s10897_s29 + $0x8] sm:$0xff] }
0x146b   :  { %v2378_v63 = vmul.f32 %v7956_v21, %v9443_v57  ;;  %v7958_v8 = vpop.eup %7957 }
0x146c   :  { %2388 = vperm.xlu1 %7860, %v2368_v55   ;;  %v2380_v2 = vmul.f32 %v7958_v8, %v9446_v60 }
0x1470   :  { %2393 = vperm.xlu1 %7860, %v2370_v42   ;;  %v9511_v42 = vld [vmem:[%s10897_s29 + $0x18] sm:$0xff] }
0x1474   :  { %2398 = vperm.xlu1 %7860, %v2372_v52  }
0x1478   :  { %2403 = vperm.xlu1 %7860, %v2374_v44  }
0x147c   :  { %2413 = vperm.xlu1 %7860, %v2378_v63  }
0x1480   :  { %2418 = vperm.xlu1 %7860, %v2380_v2  }
0x14e2   :  { %v2409_v15 = vpop.permute.xlu0 %2408 }
0x14e3   :  { %v2384_v38 = vpop.permute.xlu1 %2383  ;;  %v2426_v26 = vmul.f32 %v9497_v24, %v2409_v15 }
0x14e4   :  { %v2421_v49 = vmul.f32 %v9483_v41, %v2384_v38 }
0x14e5   :  { %v2464_v61 = vsel %vm271_vm1, %v2426_v26, 0.0 }
0x14e6   :  { %v2429_v60 = vsel %vm271_vm1, %v2421_v49, 0.0  ;;  %v2465_v44 = vrot.slane %v2464_v61, 4  ;;  %v9518_v49 = vld [vmem:[%s10897_s29 + $0x20] sm:$0xff] }
0x14e7   :  { %v2389_v59 = vpop.permute.xlu1 %2388  ;;  %v2430_v35 = vrot.slane %v2429_v60, 4 }
0x14e8   :  { %v2422_v57 = vmul.f32 %v9489_v13, %v2389_v59 }
0x14e9   :  { %v2431_v52 = vadd.f32 %v2430_v35, %v2429_v60 }
0x14ea   :  { %v2436_v19 = vsel %vm271_vm1, %v2422_v57, 0.0 }
0x14eb   :  { %v2437_v29 = vrot.slane %v2436_v19, 4  ;;  %v2394_v28 = vpop.permute.xlu1 %2393  ;;  %v2432_v15 = vrot.slane %v2431_v52, 2 }
0x14ec   :  { %v2423_v0 = vmul.f32 %v9503_v9, %v2394_v28 }
0x14ed   :  { %v2438_v55 = vadd.f32 %v2437_v29, %v2436_v19  ;;  %v2466_v19 = vadd.f32 %v2465_v44, %v2464_v61 }
0x14ee   :  { %v2443_v33 = vsel %vm271_vm1, %v2423_v0, 0.0 }
0x14ef   :  { %v2444_v46 = vrot.slane %v2443_v33, 4  ;;  %v2399_v30 = vpop.permute.xlu1 %2398  ;;  %v2439_v63 = vrot.slane %v2438_v55, 2  ;;  %v2467_v48 = vrot.slane %v2466_v19, 2 }
0x14f0   :  { %v2424_v27 = vmul.f32 %v9511_v42, %v2399_v30  ;;  %v2433_v30 = vadd.f32 %v2432_v15, %v2431_v52 }
0x14f1   :  { %v2445_v45 = vadd.f32 %v2444_v46, %v2443_v33  ;;  %v2440_v26 = vadd.f32 %v2439_v63, %v2438_v55  ;;  %v9525_v33 = vld [vmem:[%s10897_s29 + $0x30] sm:$0xff] }
0x14f2   :  { %v2450_v21 = vsel %vm271_vm1, %v2424_v27, 0.0 }
0x14f3   :  { %v2451_v8 = vrot.slane %v2450_v21, 4  ;;  %v2404_v2 = vpop.permute.xlu1 %2403  ;;  %v2446_v38 = vrot.slane %v2445_v45, 2  ;;  %v2441_v44 = vrot.slane %v2440_v26, 1 }
0x14f4   :  { %v2425_v59 = vmul.f32 %v9518_v49, %v2404_v2 }
0x14f5   :  { %v2452_v57 = vadd.f32 %v2451_v8, %v2450_v21  ;;  %v2447_v35 = vadd.f32 %v2446_v38, %v2445_v45  ;;  %v9532_v45 = vld [vmem:[%s10897_s29 + $0x38] sm:$0xff] }
0x14f6   :  { %v2457_v60 = vsel %vm271_vm1, %v2425_v59, 0.0  ;;  %v2434_v59 = vrot.slane %v2433_v30, 1 }
0x14f7   :  { %v2453_v29 = vrot.slane %v2452_v57, 2  ;;  %v2458_v28 = vrot.slane %v2457_v60, 4  ;;  %v2414_v0 = vpop.permute.xlu1 %2413  ;;  %v2448_v8 = vrot.slane %v2447_v35, 1 }
0x14f8   :  { %v2427_v46 = vmul.f32 %v9525_v33, %v2414_v0  ;;  %v2435_v14 = vadd.f32 %v2434_v59, %v2433_v30 }
0x14f9   :  { %v2454_v27 = vadd.f32 %v2453_v29, %v2452_v57  ;;  %v2459_v2 = vadd.f32 %v2458_v28, %v2457_v60  ;;  %v2468_v57 = vadd.f32 %v2467_v48, %v2466_v19  ;;  %v2442_v29 = vadd.f32 %v2441_v44, %v2440_v26 }
0x14fa   :  { %v2471_v61 = vsel %vm271_vm1, %v2427_v46, 0.0  ;;  %v2449_v37 = vadd.f32 %v2448_v8, %v2447_v35  ;;  %v9622_v8 = vld [vmem:[#allocation17 + $0x8] sm:$0xff] }
0x14fb   :  { %v2460_v21 = vrot.slane %v2459_v2, 2  ;;  %v2472_v55 = vrot.slane %v2471_v61, 4  ;;  %v2419_v63 = vpop.permute.xlu1 %2418  ;;  %v2455_v0 = vrot.slane %v2454_v27, 1  ;;  %v2469_v18 = vrot.slane %v2468_v57, 1 }
0x14fc   :  { %v2428_v38 = vmul.f32 %v9532_v45, %v2419_v63  ;;  %v2563_v63 = vsel %vm1087_vm2, %v2442_v29, %v2435_v14  ;;  %v9606_v14 = vld [vmem:[#allocation16] sm:$0xff] }
0x14fd   :  { %v2461_v52 = vadd.f32 %v2460_v21, %v2459_v2  ;;  %v2473_v15 = vadd.f32 %v2472_v55, %v2471_v61  ;;  %v2456_v22 = vadd.f32 %v2455_v0, %v2454_v27  ;;  %v2564_v2 = vsel %vm1089_vm3, %v2449_v37, %v2563_v63  ;;  %v9612_v37 = vld [vmem:[#allocation17 + $0x18] sm:$0xff]  ;;  %v9618_v55 = vld [vmem:[#allocation17 + $0x10] sm:$0xff] }
0x14fe   :  { %v2478_v60 = vsel %vm271_vm1, %v2428_v38, 0.0  ;;  %v2470_v44 = vadd.f32 %v2469_v18, %v2468_v57  ;;  %v10937_v38 = vld [vmem:[#allocation36_spill] sm:$0xff] }
0x14ff   :  { %v2462_v28 = vrot.slane %v2461_v52, 1  ;;  %v2474_v46 = vrot.slane %v2473_v15, 2  ;;  %v2479_v32 = vrot.slane %v2478_v60, 4  ;;  %v2565_v48 = vsel %vm1091_vm4, %v2456_v22, %v2564_v2  ;;  %v9602_v22 = vld [vmem:[#allocation16 + $0x8] sm:$0xff] }
0x1500   :  { %v367_v59 = vadd.f32 %v9290_v39, %v10937_v38 }
0x1501   :  { %v2475_v58 = vadd.f32 %v2474_v46, %v2473_v15  ;;  %v2480_v23 = vadd.f32 %v2479_v32, %v2478_v60  ;;  %v2463_v31 = vadd.f32 %v2462_v28, %v2461_v52 }
0x1503   :  { %v2476_v5 = vrot.slane %v2475_v58, 1  ;;  %v2481_v25 = vrot.slane %v2480_v23, 2  ;;  %v2566_v61 = vsel %vm1093_vm5, %v2463_v31, %v2565_v48 }
0x1504   :  { %v2567_v27 = vsel %vm1095_vm6, %v2470_v44, %v2566_v61 }
0x1505   :  { %v2482_v19 = vadd.f32 %v2481_v25, %v2480_v23  ;;  %v2477_v26 = vadd.f32 %v2476_v5, %v2475_v58  ;;  %v9592_v58 = vld [vmem:[#allocation16 + $0x18] sm:$0xff] }
0x1507   :  { %v2483_v35 = vrot.slane %v2482_v19, 1  ;;  %v2568_v32 = vsel %vm1097_vm7, %v2477_v26, %v2567_v27 }
0x1509   :  { %v2484_v30 = vadd.f32 %v2483_v35, %v2482_v19 }
0x150b   :  { %v2569_v21 = vsel %vm1099_vm8, %v2484_v30, %v2568_v32 }
0x150c   :  { %7525 = vmatmul.mubr.msk.f32.vlgmr.msra.gmra.mxu1 %vm271_vm1, %v2569_v21  ;;  %v9644_v21 = vld [vmem:[#allocation20 + $0x18] sm:$0xff] }
0x150d   :  { %7539 = vmatpush3.msra.mxu1 %v9232_v40  ;;  %7546 = vmatprep.mubr.msk.f32.mxu1 %vm8584_vm0, %v10914_v12  ;;  %v9559_v40 = vld [vmem:[%s10777_s10 + $0x18] sm:$0xff] }
0x150e   :  { %7540 = vmatprep.subr.mxu1 %v10914_v12 }
0x150f   :  { %7541 = vmatpush3.msra.mxu1 %v9238_v56  ;;  %v9568_v56 = vld [vmem:[%s10777_s10 + $0x10] sm:$0xff] }
0x1510   :  { %7542 = vmatprep.subr.mxu1 %v10914_v12 }
0x1511   :  { %7543 = vmatpush3.msra.mxu1 %v9242_v50  ;;  %v9575_v50 = vld [vmem:[%s10777_s10 + $0x8] sm:$0xff] }
0x1512   :  { %7544 = vmatprep.subr.mxu1 %v10914_v12 }
0x1513   :  { %7545 = vmatpush3.msra.mxu1 %v9246_v10  ;;  %v9582_v10 = vld [vmem:[%s10777_s10] sm:$0xff] }
0x1514   :  { %7547 = vmatmul.mubr.msk.f32.vlgmr.msra.gmra.mxu1 %vm271_vm1, %v9302_v54  ;;  %7560 = vmatprep.subr.mxu1 %v10914_v12 }
0x1515   :  { %7561 = vmatpush3.msra.mxu1 %v9559_v40  ;;  %7568 = vmatprep.mubr.msk.f32.mxu1 %vm8584_vm0, %v10914_v12 }
0x1516   :  { %7562 = vmatprep.subr.mxu1 %v10914_v12 }
0x1517   :  { %7563 = vmatpush3.msra.mxu1 %v9568_v56 }
0x1518   :  { %7564 = vmatprep.subr.mxu1 %v10914_v12 }
0x1519   :  { %7565 = vmatpush3.msra.mxu1 %v9575_v50 }
0x151a   :  { %7566 = vmatprep.subr.mxu1 %v10914_v12 }
0x151b   :  { %7567 = vmatpush3.msra.mxu1 %v9582_v10 }
0x151c   :  { %7582 = vmatprep.subr.mxu1 %v10914_v12 }
0x15cc   :  { %v2638_v54 = vpop.f32.mrf.mxu1 }
0x15cd   :  { %v2639_v25 = vadd.f32 %v2638_v54, %v9364_v62  ;;  %v9598_v62 = vld [vmem:[#allocation16 + $0x10] sm:$0xff]  ;;  %v9654_v54 = vld [vmem:[#allocation20 + $0x8] sm:$0xff] }
0x15ce   :  { %v7526_v5 = vpop.f32.mrf.mxu1 }
0x15cf   :  { %7959 = vtanh.f32 %v2639_v25  ;;  %v9658_v25 = vld [vmem:[#allocation20] sm:$0xff] }
0x15d4   :  { %v2783_v18 = vpop.f32.mrf.mxu1 }
0x15d6   :  { %v7548_v31 = vpop.f32.mrf.mxu1 }
0x15dc   :  { %v7960_v23 = vpop.eup %7959 }
0x15dd   :  { %6956 = vst.msk [vmem:[%s10783_s16 + $0x8] sm:$0xff] %vm271_vm1, %v7960_v23  ;;  %7536 = vmatmul.mubr.msk.f32.vlgmr.msra.gmra.mxu0 %vm271_vm1, %v7960_v23 }
0x15de   :  { %7550 = vmatpush3.msra.mxu0 %v9592_v58  ;;  %7557 = vmatprep.mubr.msk.f32.mxu0 %vm8584_vm0, %v10914_v12 }
0x15df   :  { %7551 = vmatprep.subr.mxu0 %v10914_v12 }
0x15e0   :  { %7552 = vmatpush3.msra.mxu0 %v9598_v62 }
0x15e1   :  { %7553 = vmatprep.subr.mxu0 %v10914_v12 }
0x15e2   :  { %7554 = vmatpush3.msra.mxu0 %v9602_v22 }
0x15e3   :  { %7555 = vmatprep.subr.mxu0 %v10914_v12 }
0x15e4   :  { %7556 = vmatpush3.msra.mxu0 %v9606_v14 }
0x15e5   :  { %7558 = vmatmul.mubr.msk.f32.vlgmr.msra.gmra.mxu0 %vm271_vm1, %v9330_v3  ;;  %7571 = vmatprep.subr.mxu0 %v10914_v12  ;;  %v9626_v3 = vld [vmem:[#allocation17] sm:$0xff] }
0x15e6   :  { %7572 = vmatpush3.msra.mxu0 %v9612_v37  ;;  %7579 = vmatprep.mubr.msk.f32.mxu0 %vm8584_vm0, %v10914_v12 }
0x15e7   :  { %7573 = vmatprep.subr.mxu0 %v10914_v12 }
0x15e8   :  { %7574 = vmatpush3.msra.mxu0 %v9618_v55 }
0x15e9   :  { %7575 = vmatprep.subr.mxu0 %v10914_v12 }
0x15ea   :  { %7576 = vmatpush3.msra.mxu0 %v9622_v8 }
0x15eb   :  { %7577 = vmatprep.subr.mxu0 %v10914_v12 }
0x15ec   :  { %7578 = vmatpush3.msra.mxu0 %v9626_v3 }
0x15ed   :  { %7593 = vmatprep.subr.mxu0 %v10914_v12 }
0x169d   :  { %v2712_v0 = vpop.f32.mrf.mxu0 }
0x169e   :  { %v2716_v52 = vadd.f32 %v2712_v0, %v367_v59 }
0x169f   :  { %v7537_v15 = vpop.f32.mrf.mxu0 }
0x16a0   :  { %v2787_v57 = vadd.f32 %v2783_v18, %v2716_v52 }
0x16a2   :  { %7961 = vtanh.f32 %v2787_v57  ;;  %v7102_v46 = vmul.f32 -1.442695, %v2787_v57 }
0x16a4   :  { %7963 = vpow2.f32 %v7102_v46 }
0x16a5   :  { %v2878_v60 = vpop.f32.mrf.mxu0 }
0x16a7   :  { %v7559_v29 = vpop.f32.mrf.mxu0 }
0x16af   :  { %v7962_v28 = vpop.eup %7961 }
0x16b0   :  { %2797 = vrot.lane.b32.xlu1 %v7962_v28, %s8585_s4 }
0x16b1   :  { %v7964_v63 = vpop.eup %7963 }
0x16b2   :  { %v2791_v2 = vadd.f32 1.0, %v7964_v63 }
0x16b4   :  { %7965 = vrcp.f32 %v2791_v2 }
0x16c1   :  { %v7966_v48 = vpop.eup %7965 }
0x16c2   :  { %v2795_v39 = vmul.f32 %v7966_v48, %v9297_v7  ;;  %v9650_v7 = vld [vmem:[#allocation20 + $0x10] sm:$0xff] }
0x1722   :  { %v2798_v19 = vpop.permute.xlu1 %2797 }
0x1723   :  { %v2800_v26 = vmul.f32 %v7966_v48, %v2798_v19  ;;  %v9684_v19 = vld [vmem:[#allocation19 + $0x10] sm:$0xff] }
0x1724   :  { %10940 = vst [vmem:[#allocation46_spill] sm:$0xff] %v9684_v19 }
0x1725   :  { %2802 = vrot.lane.b32.xlu1 %v2800_v26, %s8586_s0  ;;  %v9690_v26 = vld [vmem:[#allocation19 + $0x8] sm:$0xff] }
0x1726   :  { %10941 = vst [vmem:[#allocation49_spill] sm:$0xff] %v9690_v26 }
0x1797   :  { %v2803_v61 = vpop.permute.xlu1 %2802 }
0x1798   :  { %v9635_v44 = vadd.f32 %v2803_v61, %v2795_v39 }
0x179a   :  { %7967 = vtanh.f32 %v9635_v44 }
0x17a7   :  { %v7968_v35 = vpop.eup %7967 }
0x17a8   :  { %2808 = vrot.lane.b32.xlu1 %v7968_v35, %s8585_s4 }
0x181a   :  { %v2809_v30 = vpop.permute.xlu1 %2808 }
0x181b   :  { %v2811_v27 = vmul.f32 %v7966_v48, %v2809_v30 }
0x181d   :  { %2883 = vrot.lane.b32.xlu0 %v2811_v27, %s8586_s0 }
0x188f   :  { %v9640_v32 = vpop.permute.xlu0 %2883 }
0x1890   :  { %7569 = vmatmul.mubr.msk.f32.vlgmr.msra.gmra.mxu1 %vm271_vm1, %v9640_v32 }
0x1891   :  { %7583 = vmatpush3.msra.mxu1 %v9644_v21  ;;  %7590 = vmatprep.mubr.msk.f32.mxu1 %vm8584_vm0, %v10914_v12 }
0x1892   :  { %7584 = vmatprep.subr.mxu1 %v10914_v12 }
0x1893   :  { %7585 = vmatpush3.msra.mxu1 %v9650_v7 }
0x1894   :  { %7586 = vmatprep.subr.mxu1 %v10914_v12 }
0x1895   :  { %7587 = vmatpush3.msra.mxu1 %v9654_v54 }
0x1896   :  { %7588 = vmatprep.subr.mxu1 %v10914_v12 }
0x1897   :  { %7589 = vmatpush3.msra.mxu1 %v9658_v25 }
0x1898   :  { %7604 = vmatprep.subr.mxu1 %v10914_v12 }
0x1950   :  { %v2953_v5 = vpop.f32.mrf.mxu1 }
0x1951   :  { %v2954_v18 = vadd.f32 %v2953_v5, %v2878_v60 }
0x1952   :  { %v7570_v31 = vpop.f32.mrf.mxu1 }
0x1953   :  { %v2957_v23 = vadd.f32 %v9319_v16, %v2954_v18 }
0x1955   :  { %7969 = vtanh.f32 %v2957_v23  ;;  %v7105_v59 = vmul.f32 -1.442695, %v2957_v23 }
0x1957   :  { %7971 = vpow2.f32 %v7105_v59 }
0x1962   :  { %v7970_v38 = vpop.eup %7969 }
0x1963   :  { %2967 = vrot.lane.b32.xlu1 %v7970_v38, %s8585_s4 }
0x1964   :  { %v7972_v0 = vpop.eup %7971 }
0x1965   :  { %v2961_v52 = vadd.f32 1.0, %v7972_v0 }
0x1967   :  { %7973 = vrcp.f32 %v2961_v52 }
0x1974   :  { %v7974_v15 = vpop.eup %7973 }
0x1975   :  { %v2965_v28 = vmul.f32 %v7974_v15, %v9325_v4  ;;  %v9677_v4 = vld [vmem:[#allocation19 + $0x18] sm:$0xff] }
0x1976   :  { %10939 = vst [vmem:[#allocation48_spill] sm:$0xff] %v9677_v4 }
0x19d5   :  { %v2968_v57 = vpop.permute.xlu1 %2967 }
0x19d6   :  { %v2970_v29 = vmul.f32 %v7974_v15, %v2968_v57 }
0x19d8   :  { %2972 = vrot.lane.b32.xlu0 %v2970_v29, %s8586_s0 }
0x1a4a   :  { %v2973_v60 = vpop.permute.xlu0 %2972 }
0x1a4b   :  { %v9666_v46 = vadd.f32 %v2973_v60, %v2965_v28 }
0x1a4d   :  { %10938 = vst [vmem:[#allocation39_spill] sm:$0xff] %v9666_v46  ;;  %7975 = vtanh.f32 %v9666_v46 }
0x1a5a   :  { %v7976_v16 = vpop.eup %7975 }
0x1a5b   :  { %2978 = vrot.lane.b32.xlu1 %v7976_v16, %s8585_s4 }
0x1acd   :  { %v2979_v63 = vpop.permute.xlu1 %2978 }
0x1ace   :  { %v2981_v2 = vmul.f32 %v7974_v15, %v2979_v63 }
0x1ad0   :  { %2983 = vrot.lane.b32.xlu0 %v2981_v2, %s8586_s0 }
0x1b42   :  { %v9671_v48 = vpop.permute.xlu0 %2983 }
0x1b43   :  { %7580 = vmatmul.mubr.msk.f32.vlgmr.msra.gmra.mxu0 %vm271_vm1, %v9671_v48  ;;  %7591 = vmatmul.mubr.msk.f32.vlgmr.msra.gmra.mxu1 %vm271_vm1, %v9671_v48 }
0x1b44   :  { %7594 = vmatpush3.msra.mxu0 %v9677_v4  ;;  %7601 = vmatprep.mubr.msk.f32.mxu0 %vm8584_vm0, %v10914_v12 }
0x1b45   :  { %7595 = vmatprep.subr.mxu0 %v10914_v12  ;;  %7605 = vmatpush3.msra.mxu1 %v9340_v34  ;;  %v9696_v34 = vld [vmem:[#allocation19] sm:$0xff] }
0x1b46   :  { %7596 = vmatpush3.msra.mxu0 %v9684_v19  ;;  %7606 = vmatprep.subr.mxu1 %v10914_v12  ;;  %10942 = vst [vmem:[#allocation47_spill] sm:$0xff] %v9696_v34 }
0x1b47   :  { %7597 = vmatprep.subr.mxu0 %v10914_v12  ;;  %7607 = vmatpush3.msra.mxu1 %v9346_v20 }
0x1b48   :  { %7598 = vmatpush3.msra.mxu0 %v9690_v26  ;;  %7608 = vmatprep.subr.mxu1 %v10914_v12  ;;  %v10952_v26 = vld [vmem:[#allocation51_spill] sm:$0xff] }
0x1b49   :  { %7599 = vmatprep.subr.mxu0 %v10914_v12  ;;  %7609 = vmatpush3.msra.mxu1 %v9352_v1 }
0x1b4a   :  { %7600 = vmatpush3.msra.mxu0 %v9696_v34  ;;  %7610 = vmatprep.subr.mxu1 %v10914_v12 }
0x1b4b   :  { %7615 = vmatprep.subr.mxu0 %v10914_v12  ;;  %7611 = vmatpush3.msra.mxu1 %v9358_v6 }
0x1b4c   :  { %7612 = vmatprep.mubr.msk.f32.mxu1 %vm8584_vm0, %v10914_v12  ;;  %7626 = vmatprep.subr.mxu1 %v10914_v12 }
0x1c03   :  { %v3053_v20 = vpop.f32.mrf.mxu0  ;;  %v9705_v39 = vpop.f32.mrf.mxu1 }
0x1c04   :  { %v3058_v61 = vcombine.high %v3053_v20, %v3053_v20  ;;  %v3065_v1 = vrot.slane %v3053_v20, %v10916_v17 }
0x1c05   :  { %v7581_v35 = vpop.f32.mrf.mxu0  ;;  %v7592_v30 = vpop.f32.mrf.mxu1 }
0x1c06   :  { %v3072_v27 = vrot.slane %v3058_v61, %v10916_v17  ;;  %v3073_v5 = vcombine.high %v3065_v1, %v3065_v1  ;;  %v3081_v18 = vrot.slane %v3065_v1, %v10916_v17 }
0x1c08   :  { %v3074_v31 = vcombine.high %v3072_v27, %v3072_v27  ;;  %v3095_v6 = vrot.slane %v3073_v5, %v10916_v17  ;;  %v3103_v23 = vcombine.high %v3081_v18, %v3081_v18  ;;  %v3088_v38 = vrot.slane %v3072_v27, %v10916_v17 }
0x1c09   :  { %v3110_v59 = vrot.slane %v3081_v18, %v8939_v36 }
0x1c0a   :  { %v3114_v0 = vrot.slane %v3095_v6, %v8939_v36  ;;  %v3105_v52 = vcombine.high %v3095_v6, %v3095_v6  ;;  %v3118_v15 = vrot.slane %v3103_v23, %v8939_v36  ;;  %v3102_v57 = vrot.slane %v3074_v31, %v10916_v17 }
0x1c0b   :  { %v3147_v29 = vmul.f32 %v9483_v41, %v3110_v59  ;;  %v3126_v2 = vrot.slane %v3088_v38, %v8939_v36  ;;  %v3104_v30 = vcombine.high %v3088_v38, %v3088_v38 }
0x1c0c   :  { %v3148_v28 = vmul.f32 %v9489_v13, %v3114_v0  ;;  %v3122_v60 = vrot.slane %v3105_v52, %v8939_v36  ;;  %v3130_v63 = vrot.slane %v3102_v57, %v8939_v36  ;;  %v3106_v20 = vcombine.high %v3102_v57, %v3102_v57 }
0x1c0d   :  { %v3155_v16 = vsel %vm271_vm1, %v3147_v29, 0.0  ;;  %v3149_v35 = vmul.f32 %v9503_v9, %v3118_v15  ;;  %v3151_v6 = vmul.f32 %v9518_v49, %v3126_v2  ;;  %v3134_v23 = vrot.slane %v3104_v30, %v8939_v36 }
0x1c0e   :  { %3156 = vadd.xlane.f32.xlu1 %v3155_v16  ;;  %v3158_v61 = vsel %vm271_vm1, %v3148_v28, 0.0  ;;  %v3150_v1 = vmul.f32 %v9511_v42, %v3122_v60  ;;  %v3152_v5 = vmul.f32 %v9497_v24, %v3130_v63  ;;  %v3138_v18 = vrot.slane %v3106_v20, %v8939_v36 }
0x1c0f   :  { %3159 = vadd.xlane.f32.xlu0 %v3158_v61  ;;  %v3161_v31 = vsel %vm271_vm1, %v3149_v35, 0.0  ;;  %v3167_v38 = vsel %vm271_vm1, %v3151_v6, 0.0  ;;  %v3153_v52 = vmul.f32 %v9525_v33, %v3134_v23 }
0x1c10   :  { %v3164_v27 = vsel %vm271_vm1, %v3150_v1, 0.0  ;;  %v3170_v59 = vsel %vm271_vm1, %v3152_v5, 0.0  ;;  %v3154_v0 = vmul.f32 %v9532_v45, %v3138_v18 }
0x1c11   :  { %v3173_v57 = vsel %vm271_vm1, %v3153_v52, 0.0 }
0x1c12   :  { %3165 = vadd.xlane.f32.xlu1 %v3164_v27  ;;  %v3176_v15 = vsel %vm271_vm1, %v3154_v0, 0.0  ;;  %v10943_v27 = vld [vmem:[#allocation56_spill] sm:$0xff] }
0x1c13   :  { %3162 = vadd.xlane.f32.xlu0 %v3161_v31  ;;  %v10944_v31 = vld [vmem:[#allocation58_spill] sm:$0xff] }
0x1c16   :  { %3171 = vadd.xlane.f32.xlu1 %v3170_v59  ;;  %v10945_v59 = vld [vmem:[#allocation59_spill] sm:$0xff] }
0x1c17   :  { %3168 = vadd.xlane.f32.xlu0 %v3167_v38 }
0x1c1a   :  { %3177 = vadd.xlane.f32.xlu1 %v3176_v15  ;;  %v10946_v15 = vld [vmem:[#allocation60_spill] sm:$0xff] }
0x1c1b   :  { %3174 = vadd.xlane.f32.xlu0 %v3173_v57 }
0x1c97   :  { %v3157_v29 = vpop.xlane.xlu1 %3156 }
0x1c98   :  { %v3179_v28 = vadd.f32 %v3157_v29, %v10921_v11  ;;  %v3160_v60 = vpop.xlane.xlu0 %3159 }
0x1c99   :  { %v3180_v16 = vadd.f32 %v3160_v60, %v10922_v43 }
0x1c9a   :  { %3196 = vperm.xlu0 %7859, %v3179_v28  }
0x1c9b   :  { %v3166_v63 = vpop.xlane.xlu1 %3165  ;;  %3199 = vperm.xlu1 %7860, %v3180_v16  }
0x1c9c   :  { %v3182_v2 = vadd.f32 %v3166_v63, %v10923_v53  ;;  %v3163_v20 = vpop.xlane.xlu0 %3162 }
0x1c9d   :  { %v3181_v61 = vadd.f32 %v3163_v20, %v10924_v47 }
0x1c9e   :  { %3205 = vperm.xlu0 %7859, %v3182_v2  }
0x1c9f   :  { %v3172_v1 = vpop.xlane.xlu1 %3171  ;;  %3202 = vperm.xlu1 %7860, %v3181_v61  }
0x1ca0   :  { %v3184_v35 = vadd.f32 %v3172_v1, %v10925_v51  ;;  %v3169_v30 = vpop.xlane.xlu0 %3168 }
0x1ca1   :  { %v3183_v5 = vadd.f32 %v3169_v30, %v10943_v27 }
0x1ca2   :  { %3211 = vperm.xlu0 %7859, %v3184_v35  }
0x1ca3   :  { %v3178_v18 = vpop.xlane.xlu1 %3177  ;;  %3208 = vperm.xlu1 %7860, %v3183_v5  }
0x1ca4   :  { %v3186_v6 = vadd.f32 %v3178_v18, %v10944_v31  ;;  %v3175_v23 = vpop.xlane.xlu0 %3174 }
0x1ca5   :  { %v3185_v0 = vadd.f32 %v3175_v23, %v10945_v59 }
0x1ca6   :  { %3217 = vperm.xlu0 %7859, %v3186_v6  }
0x1ca7   :  { %3214 = vperm.xlu1 %7860, %v3185_v0  }
0x1d15   :  { %v3197_v38 = vpop.permute.xlu0 %3196 }
0x1d16   :  { %v3200_v52 = vpop.permute.xlu1 %3199  ;;  %v3222_v60 = vrot.slane %v3197_v38, %v10946_v15 }
0x1d17   :  { %v3226_v57 = vrot.slane %v3200_v52, %v10946_v15 }
0x1d19   :  { %v3206_v29 = vpop.permute.xlu0 %3205  ;;  %v3251_v1 = vsel %vm1087_vm2, %v3226_v57, %v3222_v60 }
0x1d1a   :  { %v3203_v63 = vpop.permute.xlu1 %3202  ;;  %v3234_v31 = vrot.slane %v3206_v29, %v10946_v15 }
0x1d1b   :  { %v3230_v20 = vrot.slane %v3203_v63, %v10946_v15 }
0x1d1d   :  { %v3252_v30 = vsel %vm1089_vm3, %v3230_v20, %v3251_v1  ;;  %v3212_v18 = vpop.permute.xlu0 %3211 }
0x1d1e   :  { %v3209_v23 = vpop.permute.xlu1 %3208  ;;  %v3253_v27 = vsel %vm1091_vm4, %v3234_v31, %v3252_v30  ;;  %v3242_v38 = vrot.slane %v3212_v18, %v10946_v15  ;;  %v10948_v18 = vld [vmem:[#allocation42_spill] sm:$0xff] }
0x1d1f   :  { %v3238_v59 = vrot.slane %v3209_v23, %v10946_v15 }
0x1d21   :  { %v3254_v52 = vsel %vm1093_vm5, %v3238_v59, %v3253_v27  ;;  %v3218_v51 = vpop.permute.xlu0 %3217  ;;  %v10947_v59 = vld [vmem:[#allocation40_spill] sm:$0xff] }
0x1d22   :  { %v3215_v47 = vpop.permute.xlu1 %3214  ;;  %v3250_v57 = vrot.slane %v3218_v51, %v10946_v15  ;;  %v3255_v60 = vsel %vm1095_vm6, %v3242_v38, %v3254_v52  ;;  %v10949_v51 = vld [vmem:[#allocation43_spill] sm:$0xff] }
0x1d23   :  { %v3246_v63 = vrot.slane %v3215_v47, %v10946_v15 }
0x1d25   :  { %v3256_v20 = vsel %vm1097_vm7, %v3246_v63, %v3255_v60  ;;  %v10950_v63 = vld [vmem:[#allocation41_spill] sm:$0xff] }
0x1d26   :  { %v3257_v29 = vsel %vm1099_vm8, %v3250_v57, %v3256_v20 }
0x1d27   :  { %v3259_v1 = vsel %vm1102_vm9, %v3257_v29, -inf  ;;  %v10951_v29 = vld [vmem:[#allocation44_spill] sm:$0xff] }
0x1d28   :  { %3260 = vmax.xlane.f32.xlu1 %v3259_v1 }
0x1db1   :  { %v3261_v31 = vpop.xlane.xlu1 %3260 }
0x1db2   :  { %v3266_v27 = vrot.slane %v3261_v31, %v8939_v36  ;;  %v3270_v30 = vrot.slane %v3261_v31, %v10947_v59  ;;  %v3274_v23 = vrot.slane %v3261_v31, %v10948_v18  ;;  %v3278_v11 = vrot.slane %v3261_v31, %v10949_v51 }
0x1db3   :  { %v3282_v57 = vrot.slane %v3261_v31, %v10950_v63  ;;  %v3286_v1 = vrot.slane %v3261_v31, %v10951_v29  ;;  %v3290_v19 = vrot.slane %v3261_v31, %v10952_v26 }
0x1db4   :  { %v3303_v53 = vsub.f32 %v3179_v28, %v3266_v27  ;;  %v3304_v47 = vsub.f32 %v3180_v16, %v3270_v30  ;;  %v3305_v52 = vsub.f32 %v3181_v61, %v3274_v23  ;;  %v3306_v60 = vsub.f32 %v3182_v2, %v3278_v11 }
0x1db5   :  { %v3307_v17 = vsub.f32 %v3183_v5, %v3282_v57  ;;  %v3308_v28 = vsub.f32 %v3184_v35, %v3286_v1  ;;  %v3309_v27 = vsub.f32 %v3185_v0, %v3290_v19 }
0x1db6   :  { %v3311_v43 = vmul.f32 1.442695, %v3303_v53  ;;  %v3313_v38 = vmul.f32 1.442695, %v3304_v47  ;;  %v3315_v20 = vmul.f32 1.442695, %v3305_v52 }
0x1db7   :  { %v3317_v34 = vmul.f32 1.442695, %v3306_v60  ;;  %v3319_v53 = vmul.f32 1.442695, %v3307_v17  ;;  %v3321_v11 = vmul.f32 1.442695, %v3308_v28 }
0x1db8   :  { %7977 = vpow2.f32 %v3311_v43  ;;  %v10953_v43 = vld [vmem:[#allocation50_spill] sm:$0xff]  ;;  %v3323_v30 = vmul.f32 1.442695, %v3309_v27 }
0x1db9   :  { %7979 = vpow2.f32 %v3313_v38  ;;  %v3294_v61 = vrot.slane %v3261_v31, %v10953_v43 }
0x1dba   :  { %7981 = vpow2.f32 %v3315_v20 }
0x1dbb   :  { %7983 = vpow2.f32 %v3317_v34  ;;  %v3310_v5 = vsub.f32 %v3186_v6, %v3294_v61 }
0x1dbc   :  { %7985 = vpow2.f32 %v3319_v53 }
0x1dbd   :  { %7987 = vpow2.f32 %v3321_v11  ;;  %v3325_v17 = vmul.f32 1.442695, %v3310_v5 }
0x1dbe   :  { %7989 = vpow2.f32 %v3323_v30 }
0x1dbf   :  { %7991 = vpow2.f32 %v3325_v17 }
0x1dc5   :  { %v9768_v16 = vpop.eup %7977 }
0x1dc6   :  { %3336 = vperm.xlu0 %7859, %v9768_v16   ;;  %v9772_v2 = vpop.eup %7979 }
0x1dc7   :  { %v9775_v23 = vpop.eup %7981 }
0x1dc8   :  { %v9778_v34 = vpop.eup %7983 }
0x1dc9   :  { %v9781_v19 = vpop.eup %7985 }
0x1dca   :  { %3339 = vperm.xlu0 %7859, %v9772_v2   ;;  %v7988_v35 = vpop.eup %7987 }
0x1dcb   :  { %v9784_v6 = vpop.eup %7989 }
0x1dcc   :  { %v9787_v0 = vpop.eup %7991 }
0x1dce   :  { %3342 = vperm.xlu0 %7859, %v9775_v23  }
0x1dd2   :  { %3345 = vperm.xlu0 %7859, %v9778_v34  }
0x1dd6   :  { %3348 = vperm.xlu0 %7859, %v9781_v19  }
0x1dda   :  { %3351 = vperm.xlu0 %7859, %v7988_v35  }
0x1dde   :  { %3354 = vperm.xlu0 %7859, %v9784_v6  }
0x1de2   :  { %3357 = vperm.xlu0 %7859, %v9787_v0  }
0x1e41   :  { %v3337_v31 = vpop.permute.xlu0 %3336 }
0x1e42   :  { %v3362_v28 = vrot.slane %v3337_v31, %v10946_v15 }
0x1e45   :  { %v3340_v47 = vpop.permute.xlu0 %3339 }
0x1e46   :  { %v3366_v20 = vrot.slane %v3340_v47, %v10946_v15 }
0x1e48   :  { %v3391_v11 = vsel %vm1087_vm2, %v3366_v20, %v3362_v28 }
0x1e49   :  { %v3343_v52 = vpop.permute.xlu0 %3342 }
0x1e4a   :  { %v3370_v1 = vrot.slane %v3343_v52, %v10946_v15 }
0x1e4c   :  { %v3392_v30 = vsel %vm1089_vm3, %v3370_v1, %v3391_v11 }
0x1e4d   :  { %v3346_v38 = vpop.permute.xlu0 %3345 }
0x1e4e   :  { %v3374_v53 = vrot.slane %v3346_v38, %v10946_v15 }
0x1e50   :  { %v3393_v4 = vsel %vm1091_vm4, %v3374_v53, %v3392_v30 }
0x1e51   :  { %v3349_v57 = vpop.permute.xlu0 %3348 }
0x1e52   :  { %v3378_v61 = vrot.slane %v3349_v57, %v10946_v15 }
0x1e54   :  { %v3394_v47 = vsel %vm1093_vm5, %v3378_v61, %v3393_v4 }
0x1e55   :  { %v3352_v60 = vpop.permute.xlu0 %3351 }
0x1e56   :  { %v3382_v5 = vrot.slane %v3352_v60, %v10946_v15 }
0x1e58   :  { %v3395_v31 = vsel %vm1095_vm6, %v3382_v5, %v3394_v47 }
0x1e59   :  { %v3355_v27 = vpop.permute.xlu0 %3354 }
0x1e5a   :  { %v3386_v17 = vrot.slane %v3355_v27, %v10946_v15 }
0x1e5c   :  { %v3396_v57 = vsel %vm1097_vm7, %v3386_v17, %v3395_v31 }
0x1e5d   :  { %v3358_v52 = vpop.permute.xlu0 %3357 }
0x1e5e   :  { %v3390_v38 = vrot.slane %v3358_v52, %v10946_v15 }
0x1e60   :  { %v3397_v46 = vsel %vm1099_vm8, %v3390_v38, %v3396_v57 }
0x1e61   :  { %v3399_v20 = vsel %vm1102_vm9, %v3397_v46, 0.0 }
0x1e62   :  { %3400 = vadd.xlane.f32.xlu0 %v3399_v20 }
0x1eeb   :  { %v3401_v60 = vpop.xlane.xlu0 %3400 }
0x1eec   :  { %v3426_v1 = vrot.slane %v3401_v60, %v10951_v29  ;;  %v3406_v28 = vrot.slane %v3401_v60, %v8939_v36  ;;  %v3410_v53 = vrot.slane %v3401_v60, %v10947_v59  ;;  %v3414_v4 = vrot.slane %v3401_v60, %v10948_v18 }
0x1eed   :  { %v3418_v61 = vrot.slane %v3401_v60, %v10949_v51  ;;  %v3422_v27 = vrot.slane %v3401_v60, %v10950_v63  ;;  %v3430_v17 = vrot.slane %v3401_v60, %v10952_v26  ;;  %v3434_v31 = vrot.slane %v3401_v60, %v10953_v43 }
0x1eee   :  { %7993 = vrcp.f32 %v3426_v1 }
0x1eef   :  { %7995 = vrcp.f32 %v3406_v28 }
0x1ef0   :  { %7997 = vrcp.f32 %v3410_v53 }
0x1ef1   :  { %7999 = vrcp.f32 %v3414_v4 }
0x1ef2   :  { %8001 = vrcp.f32 %v3418_v61 }
0x1ef3   :  { %8003 = vrcp.f32 %v3422_v27 }
0x1ef4   :  { %8005 = vrcp.f32 %v3430_v17 }
0x1ef5   :  { %8007 = vrcp.f32 %v3434_v31 }
0x1efb   :  { %v7994_v46 = vpop.eup %7993 }
0x1efc   :  { %v7996_v11 = vpop.eup %7995  ;;  %v3454_v5 = vmul.f32 %v7994_v46, %v7988_v35 }
0x1efd   :  { %v3444_v30 = vmul.f32 %v7996_v11, %v9768_v16  ;;  %v7998_v47 = vpop.eup %7997 }
0x1efe   :  { %3486 = vperm.xlu0 %7859, %v3454_v5   ;;  %v3446_v52 = vmul.f32 %v7998_v47, %v9772_v2  ;;  %v8000_v38 = vpop.eup %7999 }
0x1eff   :  { %3461 = vperm.xlu1 %7860, %v3444_v30   ;;  %v3448_v57 = vmul.f32 %v8000_v38, %v9775_v23  ;;  %v8002_v20 = vpop.eup %8001 }
0x1f00   :  { %v3450_v16 = vmul.f32 %v8002_v20, %v9778_v34  ;;  %v8004_v35 = vpop.eup %8003 }
0x1f01   :  { %v3452_v1 = vmul.f32 %v8004_v35, %v9781_v19  ;;  %v8006_v28 = vpop.eup %8005 }
0x1f02   :  { %v3456_v2 = vmul.f32 %v8006_v28, %v9784_v6  ;;  %v8008_v53 = vpop.eup %8007 }
0x1f03   :  { %3466 = vperm.xlu1 %7860, %v3446_v52   ;;  %v3458_v60 = vmul.f32 %v8008_v53, %v9787_v0 }
0x1f07   :  { %3471 = vperm.xlu1 %7860, %v3448_v57  }
0x1f0b   :  { %3476 = vperm.xlu1 %7860, %v3450_v16  }
0x1f0f   :  { %3481 = vperm.xlu1 %7860, %v3452_v1  }
0x1f13   :  { %3491 = vperm.xlu1 %7860, %v3456_v2  }
0x1f17   :  { %3496 = vperm.xlu1 %7860, %v3458_v60  }
0x1f79   :  { %v3487_v27 = vpop.permute.xlu0 %3486 }
0x1f7a   :  { %v3462_v4 = vpop.permute.xlu1 %3461  ;;  %v3504_v11 = vmul.f32 %v9497_v24, %v3487_v27 }
0x1f7b   :  { %v3499_v23 = vmul.f32 %v9483_v41, %v3462_v4 }
0x1f7c   :  { %v3542_v47 = vsel %vm271_vm1, %v3504_v11, 0.0 }
0x1f7d   :  { %v3507_v46 = vsel %vm271_vm1, %v3499_v23, 0.0  ;;  %v3543_v20 = vrot.slane %v3542_v47, 4 }
0x1f7e   :  { %v3467_v61 = vpop.permute.xlu1 %3466  ;;  %v3508_v17 = vrot.slane %v3507_v46, 4 }
0x1f7f   :  { %v3500_v34 = vmul.f32 %v9489_v13, %v3467_v61  ;;  %v3544_v60 = vadd.f32 %v3543_v20, %v3542_v47 }
0x1f80   :  { %v3509_v38 = vadd.f32 %v3508_v17, %v3507_v46 }
0x1f81   :  { %v3514_v19 = vsel %vm271_vm1, %v3500_v34, 0.0 }
0x1f82   :  { %v3515_v5 = vrot.slane %v3514_v19, 4  ;;  %v3472_v6 = vpop.permute.xlu1 %3471  ;;  %v3510_v2 = vrot.slane %v3509_v38, 2 }
0x1f83   :  { %v3501_v30 = vmul.f32 %v9503_v9, %v3472_v6  ;;  %v3545_v6 = vrot.slane %v3544_v60, 2 }
0x1f84   :  { %v3516_v41 = vadd.f32 %v3515_v5, %v3514_v19  ;;  %v3511_v19 = vadd.f32 %v3510_v2, %v3509_v38 }
0x1f85   :  { %v3521_v0 = vsel %vm271_vm1, %v3501_v30, 0.0 }
0x1f86   :  { %v3522_v52 = vrot.slane %v3521_v0, 4  ;;  %v3477_v31 = vpop.permute.xlu1 %3476  ;;  %v3517_v24 = vrot.slane %v3516_v41, 2 }
0x1f87   :  { %v3502_v13 = vmul.f32 %v9511_v42, %v3477_v31 }
0x1f88   :  { %v3523_v57 = vadd.f32 %v3522_v52, %v3521_v0  ;;  %v3518_v23 = vadd.f32 %v3517_v24, %v3516_v41  ;;  %v3512_v41 = vrot.slane %v3511_v19, 1 }
0x1f89   :  { %v3528_v16 = vsel %vm271_vm1, %v3502_v13, 0.0 }
0x1f8a   :  { %v3529_v35 = vrot.slane %v3528_v16, 4  ;;  %v3482_v1 = vpop.permute.xlu1 %3481  ;;  %v3524_v28 = vrot.slane %v3523_v57, 2  ;;  %v3519_v17 = vrot.slane %v3518_v23, 1 }
0x1f8b   :  { %v3503_v9 = vmul.f32 %v9518_v49, %v3482_v1 }
0x1f8c   :  { %v3530_v53 = vadd.f32 %v3529_v35, %v3528_v16  ;;  %v3525_v34 = vadd.f32 %v3524_v28, %v3523_v57  ;;  %v3546_v57 = vadd.f32 %v3545_v6, %v3544_v60  ;;  %v3520_v38 = vadd.f32 %v3519_v17, %v3518_v23 }
0x1f8d   :  { %v3535_v4 = vsel %vm271_vm1, %v3503_v9, 0.0  ;;  %v3513_v9 = vadd.f32 %v3512_v41, %v3511_v19  ;;  %v9859_v41 = vld [vmem:[#allocation13] sm:$0xff] }
0x1f8e   :  { %v3531_v61 = vrot.slane %v3530_v53, 2  ;;  %v3536_v27 = vrot.slane %v3535_v4, 4  ;;  %v3492_v42 = vpop.permute.xlu1 %3491  ;;  %v3526_v47 = vrot.slane %v3525_v34, 1 }
0x1f8f   :  { %v3505_v46 = vmul.f32 %v9525_v33, %v3492_v42 }
0x1f90   :  { %v3532_v11 = vadd.f32 %v3531_v61, %v3530_v53  ;;  %v3537_v5 = vadd.f32 %v3536_v27, %v3535_v4  ;;  %v3527_v28 = vadd.f32 %v3526_v47, %v3525_v34  ;;  %v3547_v27 = vrot.slane %v3546_v57, 1  ;;  %v9851_v47 = vld [vmem:[#allocation13 + $0x10] sm:$0xff] }
0x1f91   :  { %v3549_v30 = vsel %vm271_vm1, %v3505_v46, 0.0 }
0x1f92   :  { %v3538_v49 = vrot.slane %v3537_v5, 2  ;;  %v3550_v0 = vrot.slane %v3549_v30, 4  ;;  %v3497_v52 = vpop.permute.xlu1 %3496  ;;  %v3533_v13 = vrot.slane %v3532_v11, 1  ;;  %v3548_v17 = vadd.f32 %v3547_v27, %v3546_v57  ;;  %v9932_v27 = vld [vmem:[%s10779_s12] ss:$0 sm:$0xff] }
0x1f93   :  { %v3506_v31 = vmul.f32 %v9532_v45, %v3497_v52  ;;  %v3641_v45 = vsel %vm1087_vm2, %v3520_v38, %v3513_v9  ;;  %v9845_v52 = vld [vmem:[#allocation13 + $0x18] sm:$0xff] }
0x1f94   :  { %v3539_v20 = vadd.f32 %v3538_v49, %v3537_v5  ;;  %v3551_v16 = vadd.f32 %v3550_v0, %v3549_v30  ;;  %v3534_v2 = vadd.f32 %v3533_v13, %v3532_v11  ;;  %v3642_v5 = vsel %vm1089_vm3, %v3527_v28, %v3641_v45 }
0x1f95   :  { %v3556_v33 = vsel %vm271_vm1, %v3506_v31, 0.0  ;;  %v9855_v31 = vld [vmem:[#allocation13 + $0x8] sm:$0xff] }
0x1f96   :  { %v3540_v24 = vrot.slane %v3539_v20, 1  ;;  %v3552_v35 = vrot.slane %v3551_v16, 2  ;;  %v3557_v1 = vrot.slane %v3556_v33, 4  ;;  %v3643_v60 = vsel %vm1091_vm4, %v3534_v2, %v3642_v5 }
0x1f98   :  { %v3553_v53 = vadd.f32 %v3552_v35, %v3551_v16  ;;  %v3558_v4 = vadd.f32 %v3557_v1, %v3556_v33  ;;  %v3541_v61 = vadd.f32 %v3540_v24, %v3539_v20 }
0x1f9a   :  { %v3554_v42 = vrot.slane %v3553_v53, 1  ;;  %v3559_v46 = vrot.slane %v3558_v4, 2  ;;  %v3644_v30 = vsel %vm1093_vm5, %v3541_v61, %v3643_v60 }
0x1f9b   :  { %v3645_v11 = vsel %vm1095_vm6, %v3548_v17, %v3644_v30 }
0x1f9c   :  { %v3560_v6 = vadd.f32 %v3559_v46, %v3558_v4  ;;  %v3555_v23 = vadd.f32 %v3554_v42, %v3553_v53 }
0x1f9e   :  { %v3561_v34 = vrot.slane %v3560_v6, 1  ;;  %v3646_v49 = vsel %vm1097_vm7, %v3555_v23, %v3645_v11 }
0x1fa0   :  { %v3562_v19 = vadd.f32 %v3561_v34, %v3560_v6  ;;  %v10955_v6 = vld [vmem:[#allocation39_spill] sm:$0xff] }
0x1fa2   :  { %v3647_v0 = vsel %vm1099_vm8, %v3562_v19, %v3646_v49 }
0x1fa3   :  { %7602 = vmatmul.mubr.msk.f32.vlgmr.msra.gmra.mxu0 %vm271_vm1, %v3647_v0  ;;  %v10956_v0 = vld [vmem:[#allocation48_spill] sm:$0xff] }
0x1fa4   :  { %7616 = vmatpush3.msra.mxu0 %v9845_v52  ;;  %7623 = vmatprep.mubr.msk.f32.mxu0 %vm8584_vm0, %v10914_v12 }
0x1fa5   :  { %7617 = vmatprep.subr.mxu0 %v10914_v12 }
0x1fa6   :  { %7618 = vmatpush3.msra.mxu0 %v9851_v47 }
0x1fa7   :  { %7619 = vmatprep.subr.mxu0 %v10914_v12 }
0x1fa8   :  { %7620 = vmatpush3.msra.mxu0 %v9855_v31 }
0x1fa9   :  { %7621 = vmatprep.subr.mxu0 %v10914_v12 }
0x1faa   :  { %7622 = vmatpush3.msra.mxu0 %v9859_v41 }
0x1fab   :  { %7624 = vmatmul.mubr.msk.f32.vlgmr.msra.gmra.mxu0 %vm271_vm1, %v9640_v32  ;;  %7637 = vmatprep.subr.mxu0 %v10914_v12 }
0x1fac   :  { %7638 = vmatpush3.msra.mxu0 %v9559_v40  ;;  %7645 = vmatprep.mubr.msk.f32.mxu0 %vm8584_vm0, %v10914_v12 }
0x1fad   :  { %7639 = vmatprep.subr.mxu0 %v10914_v12 }
0x1fae   :  { %7640 = vmatpush3.msra.mxu0 %v9568_v56  ;;  %v9903_v56 = vld [vmem:[#allocation14] ss:$0 sm:$0xff] }
0x1faf   :  { %7641 = vmatprep.subr.mxu0 %v10914_v12 }
0x1fb0   :  { %7642 = vmatpush3.msra.mxu0 %v9575_v50  ;;  %v10954_v50 = vld [vmem:[#allocation35_spill] sm:$0xff] }
0x1fb1   :  { %7643 = vmatprep.subr.mxu0 %v10914_v12 }
0x1fb2   :  { %7644 = vmatpush3.msra.mxu0 %v9582_v10  ;;  %v372_v10 = vadd.f32 %v9903_v56, %v10954_v50  ;;  %v9971_v50 = vld [vmem:[#allocation11] sm:$0xff] }
0x1fb3   :  { %7659 = vmatprep.subr.mxu0 %v10914_v12 }
0x2063   :  { %v3716_v32 = vpop.f32.mrf.mxu0 }
0x2064   :  { %v3717_v40 = vadd.f32 %v3716_v32, %v9705_v39  ;;  %v9953_v32 = vld [vmem:[#allocation11 + $0x18] sm:$0xff] }
0x2065   :  { %v7603_v13 = vpop.f32.mrf.mxu0 }
0x2066   :  { %8009 = vtanh.f32 %v3717_v40  ;;  %v10957_v40 = vld [vmem:[#allocation46_spill] sm:$0xff]  ;;  %v9959_v13 = vld [vmem:[#allocation11 + $0x10] sm:$0xff] }
0x206b   :  { %v3861_v20 = vpop.f32.mrf.mxu0 }
0x206d   :  { %v7625_v16 = vpop.f32.mrf.mxu0 }
0x206e   :  { %v9965_v16 = vld [vmem:[#allocation11 + $0x8] sm:$0xff] }
0x2073   :  { %v8010_v57 = vpop.eup %8009 }
0x2074   :  { %6957 = vst.msk [vmem:[%s10783_s16 + $0x10] sm:$0xff] %vm271_vm1, %v8010_v57  ;;  %7613 = vmatmul.mubr.msk.f32.vlgmr.msra.gmra.mxu1 %vm271_vm1, %v8010_v57  ;;  %v10959_v57 = vld [vmem:[#allocation47_spill] sm:$0xff] }
0x2075   :  { %7627 = vmatpush3.msra.mxu1 %v9592_v58  ;;  %7634 = vmatprep.mubr.msk.f32.mxu1 %vm8584_vm0, %v10914_v12 }
0x2076   :  { %7628 = vmatprep.subr.mxu1 %v10914_v12 }
0x2077   :  { %7629 = vmatpush3.msra.mxu1 %v9598_v62 }
0x2078   :  { %7630 = vmatprep.subr.mxu1 %v10914_v12 }
0x2079   :  { %7631 = vmatpush3.msra.mxu1 %v9602_v22 }
0x207a   :  { %7632 = vmatprep.subr.mxu1 %v10914_v12 }
0x207b   :  { %7633 = vmatpush3.msra.mxu1 %v9606_v14 }
0x207c   :  { %7635 = vmatmul.mubr.msk.f32.vlgmr.msra.gmra.mxu1 %vm271_vm1, %v9671_v48  ;;  %7648 = vmatprep.subr.mxu1 %v10914_v12 }
0x207d   :  { %7649 = vmatpush3.msra.mxu1 %v9612_v37  ;;  %7656 = vmatprep.mubr.msk.f32.mxu1 %vm8584_vm0, %v10914_v12 }
0x207e   :  { %7650 = vmatprep.subr.mxu1 %v10914_v12 }
0x207f   :  { %7651 = vmatpush3.msra.mxu1 %v9618_v55 }
0x2080   :  { %7652 = vmatprep.subr.mxu1 %v10914_v12 }
0x2081   :  { %7653 = vmatpush3.msra.mxu1 %v9622_v8 }
0x2082   :  { %7654 = vmatprep.subr.mxu1 %v10914_v12 }
0x2083   :  { %7655 = vmatpush3.msra.mxu1 %v9626_v3 }
0x2084   :  { %7670 = vmatprep.subr.mxu1 %v10914_v12 }
0x2134   :  { %v3790_v58 = vpop.f32.mrf.mxu1 }
0x2135   :  { %v3794_v62 = vadd.f32 %v3790_v58, %v372_v10 }
0x2136   :  { %v7614_v22 = vpop.f32.mrf.mxu1 }
0x2137   :  { %v3865_v14 = vadd.f32 %v3861_v20, %v3794_v62  ;;  %v10958_v20 = vld [vmem:[#allocation49_spill] sm:$0xff] }
0x2138   :  { %v10960_v22 = vld [vmem:[#allocation45_spill] sm:$0xff] }
0x2139   :  { %8011 = vtanh.f32 %v3865_v14  ;;  %v7111_v8 = vmul.f32 -1.442695, %v3865_v14 }
0x213b   :  { %8013 = vpow2.f32 %v7111_v8 }
0x213c   :  { %v3956_v37 = vpop.f32.mrf.mxu1 }
0x213e   :  { %v7636_v55 = vpop.f32.mrf.mxu1 }
0x2146   :  { %v8012_v48 = vpop.eup %8011 }
0x2147   :  { %3875 = vrot.lane.b32.xlu1 %v8012_v48, %s8585_s4 }
0x2148   :  { %v8014_v3 = vpop.eup %8013 }
0x2149   :  { %v3869_v39 = vadd.f32 1.0, %v8014_v3 }
0x214b   :  { %8015 = vrcp.f32 %v3869_v39 }
0x2158   :  { %v8016_v33 = vpop.eup %8015 }
0x2159   :  { %v3873_v35 = vmul.f32 %v8016_v33, %v9635_v44 }
0x21b9   :  { %v3876_v38 = vpop.permute.xlu1 %3875 }
0x21ba   :  { %v3878_v24 = vmul.f32 %v8016_v33, %v3876_v38 }
0x21bc   :  { %3880 = vrot.lane.b32.xlu1 %v3878_v24, %s8586_s0 }
0x222e   :  { %v3881_v1 = vpop.permute.xlu1 %3880 }
0x222f   :  { %v9910_v28 = vadd.f32 %v3881_v1, %v3873_v35 }
0x2231   :  { %8017 = vtanh.f32 %v9910_v28 }
0x223e   :  { %v8018_v9 = vpop.eup %8017 }
0x223f   :  { %3886 = vrot.lane.b32.xlu1 %v8018_v9, %s8585_s4 }
0x22b1   :  { %v3887_v2 = vpop.permute.xlu1 %3886 }
0x22b2   :  { %v3889_v53 = vmul.f32 %v8016_v33, %v3887_v2 }
0x22b4   :  { %3961 = vrot.lane.b32.xlu0 %v3889_v53, %s8586_s0 }
0x2326   :  { %v9915_v4 = vpop.permute.xlu0 %3961 }
0x2327   :  { %7646 = vmatmul.mubr.msk.f32.vlgmr.msra.gmra.mxu0 %vm271_vm1, %v9915_v4 }
0x2328   :  { %7660 = vmatpush3.msra.mxu0 %v9644_v21  ;;  %7667 = vmatprep.mubr.msk.f32.mxu0 %vm8584_vm0, %v10914_v12 }
0x2329   :  { %7661 = vmatprep.subr.mxu0 %v10914_v12 }
0x232a   :  { %7662 = vmatpush3.msra.mxu0 %v9650_v7 }
0x232b   :  { %7663 = vmatprep.subr.mxu0 %v10914_v12 }
0x232c   :  { %7664 = vmatpush3.msra.mxu0 %v9654_v54 }
0x232d   :  { %7665 = vmatprep.subr.mxu0 %v10914_v12 }
0x232e   :  { %7666 = vmatpush3.msra.mxu0 %v9658_v25 }
0x232f   :  { %7681 = vmatprep.subr.mxu0 %v10914_v12 }
0x23e7   :  { %v4031_v44 = vpop.f32.mrf.mxu0 }
0x23e8   :  { %v4032_v61 = vadd.f32 %v4031_v44, %v3956_v37  ;;  %v9991_v44 = vld [vmem:[%s10897_s29] sm:$0xff] }
0x23e9   :  { %v7647_v21 = vpop.f32.mrf.mxu0 }
0x23ea   :  { %v4035_v7 = vadd.f32 %v9932_v27, %v4032_v61  ;;  %v9997_v21 = vld [vmem:[%s10897_s29 + $0x8] sm:$0xff] }
0x23ec   :  { %8019 = vtanh.f32 %v4035_v7  ;;  %v7114_v54 = vmul.f32 -1.442695, %v4035_v7 }
0x23ee   :  { %8021 = vpow2.f32 %v7114_v54 }
0x23f9   :  { %v8020_v45 = vpop.eup %8019 }
0x23fa   :  { %4045 = vrot.lane.b32.xlu1 %v8020_v45, %s8585_s4 }
0x23fb   :  { %v8022_v42 = vpop.eup %8021 }
0x23fc   :  { %v4039_v25 = vadd.f32 1.0, %v8022_v42 }
0x23fe   :  { %8023 = vrcp.f32 %v4039_v25 }
0x240b   :  { %v8024_v46 = vpop.eup %8023 }
0x240c   :  { %v4043_v23 = vmul.f32 %v8024_v46, %v10955_v6 }
0x246c   :  { %v4046_v5 = vpop.permute.xlu1 %4045 }
0x246d   :  { %v4048_v60 = vmul.f32 %v8024_v46, %v4046_v5 }
0x246f   :  { %4050 = vrot.lane.b32.xlu0 %v4048_v60, %s8586_s0  ;;  %v10008_v60 = vld [vmem:[%s10897_s29 + $0x18] sm:$0xff] }
0x24e1   :  { %v4051_v30 = vpop.permute.xlu0 %4050 }
0x24e2   :  { %v9938_v17 = vadd.f32 %v4051_v30, %v4043_v23  ;;  %v10014_v23 = vld [vmem:[%s10897_s29 + $0x10] sm:$0xff] }
0x24e4   :  { %8025 = vtanh.f32 %v9938_v17 }
0x24f1   :  { %v8026_v34 = vpop.eup %8025 }
0x24f2   :  { %4056 = vrot.lane.b32.xlu1 %v8026_v34, %s8585_s4 }
0x2564   :  { %v4057_v19 = vpop.permute.xlu1 %4056 }
0x2565   :  { %v4059_v11 = vmul.f32 %v8024_v46, %v4057_v19 }
0x2567   :  { %4061 = vrot.lane.b32.xlu0 %v4059_v11, %s8586_s0  ;;  %v10021_v11 = vld [vmem:[%s10897_s29 + $0x28] sm:$0xff] }
0x25d9   :  { %v9943_v49 = vpop.permute.xlu0 %4061 }
0x25da   :  { %7657 = vmatmul.mubr.msk.f32.vlgmr.msra.gmra.mxu1 %vm271_vm1, %v9943_v49  ;;  %7668 = vmatmul.mubr.msk.f32.vlgmr.msra.gmra.mxu0 %vm271_vm1, %v9943_v49 }
0x25db   :  { %7671 = vmatpush3.msra.mxu1 %v10956_v0  ;;  %7678 = vmatprep.mubr.msk.f32.mxu1 %vm8584_vm0, %v10914_v12 }
0x25dc   :  { %7672 = vmatprep.subr.mxu1 %v10914_v12  ;;  %7682 = vmatpush3.msra.mxu0 %v9953_v32 }
0x25dd   :  { %7673 = vmatpush3.msra.mxu1 %v10957_v40  ;;  %7683 = vmatprep.subr.mxu0 %v10914_v12 }
0x25de   :  { %7674 = vmatprep.subr.mxu1 %v10914_v12  ;;  %7684 = vmatpush3.msra.mxu0 %v9959_v13 }
0x25df   :  { %7675 = vmatpush3.msra.mxu1 %v10958_v20  ;;  %7685 = vmatprep.subr.mxu0 %v10914_v12 }
0x25e0   :  { %7676 = vmatprep.subr.mxu1 %v10914_v12  ;;  %7686 = vmatpush3.msra.mxu0 %v9965_v16 }
0x25e1   :  { %7677 = vmatpush3.msra.mxu1 %v10959_v57  ;;  %7687 = vmatprep.subr.mxu0 %v10914_v12  ;;  %v10029_v57 = vld [vmem:[%s10897_s29 + $0x20] sm:$0xff] }
0x25e2   :  { %7692 = vmatprep.subr.mxu1 %v10914_v12  ;;  %7688 = vmatpush3.msra.mxu0 %v9971_v50 }
0x25e3   :  { %7689 = vmatprep.mubr.msk.f32.mxu0 %vm8584_vm0, %v10914_v12  ;;  %7703 = vmatprep.subr.mxu0 %v10914_v12 }
0x269a   :  { %v4131_v10 = vpop.f32.mrf.mxu1  ;;  %v9977_v58 = vpop.f32.mrf.mxu0 }
0x269b   :  { %v4136_v62 = vcombine.high %v4131_v10, %v4131_v10  ;;  %v4143_v14 = vrot.slane %v4131_v10, %v10960_v22 }
0x269c   :  { %v7658_v37 = vpop.f32.mrf.mxu1  ;;  %v7669_v55 = vpop.f32.mrf.mxu0 }
0x269d   :  { %v4150_v48 = vrot.slane %v4136_v62, %v10960_v22  ;;  %v4151_v8 = vcombine.high %v4143_v14, %v4143_v14  ;;  %v4159_v3 = vrot.slane %v4143_v14, %v10960_v22  ;;  %v10037_v37 = vld [vmem:[%s10897_s29 + $0x38] sm:$0xff] }
0x269f   :  { %v4152_v39 = vcombine.high %v4150_v48, %v4150_v48  ;;  %v4173_v33 = vrot.slane %v4151_v8, %v10960_v22  ;;  %v4181_v38 = vcombine.high %v4159_v3, %v4159_v3  ;;  %v4166_v24 = vrot.slane %v4150_v48, %v10960_v22  ;;  %v10044_v8 = vld [vmem:[%s10897_s29 + $0x30] sm:$0xff] }
0x26a0   :  { %v4188_v35 = vrot.slane %v4159_v3, %v8939_v36 }
0x26a1   :  { %v4192_v1 = vrot.slane %v4173_v33, %v8939_v36  ;;  %v4183_v9 = vcombine.high %v4173_v33, %v4173_v33  ;;  %v4196_v2 = vrot.slane %v4181_v38, %v8939_v36  ;;  %v4180_v53 = vrot.slane %v4152_v39, %v10960_v22 }
0x26a2   :  { %v4225_v61 = vmul.f32 %v9991_v44, %v4188_v35  ;;  %v4204_v25 = vrot.slane %v4166_v24, %v8939_v36  ;;  %v4182_v34 = vcombine.high %v4166_v24, %v4166_v24  ;;  %v10961_v24 = vld [vmem:[#allocation52_spill] sm:$0xff] }
0x26a3   :  { %v4226_v7 = vmul.f32 %v9997_v21, %v4192_v1  ;;  %v4200_v45 = vrot.slane %v4183_v9, %v8939_v36  ;;  %v4208_v42 = vrot.slane %v4180_v53, %v8939_v36  ;;  %v4184_v46 = vcombine.high %v4180_v53, %v4180_v53  ;;  %v10962_v9 = vld [vmem:[#allocation54_spill] sm:$0xff] }
0x26a4   :  { %v4233_v54 = vsel %vm271_vm1, %v4225_v61, 0.0  ;;  %v4227_v30 = vmul.f32 %v10014_v23, %v4196_v2  ;;  %v4229_v10 = vmul.f32 %v10029_v57, %v4204_v25  ;;  %v4212_v62 = vrot.slane %v4182_v34, %v8939_v36  ;;  %v10963_v61 = vld [vmem:[#allocation55_spill] sm:$0xff] }
0x26a5   :  { %4234 = vadd.xlane.f32.xlu1 %v4233_v54  ;;  %v4236_v5 = vsel %vm271_vm1, %v4226_v7, 0.0  ;;  %v4228_v6 = vmul.f32 %v10008_v60, %v4200_v45  ;;  %v4230_v0 = vmul.f32 %v10021_v11, %v4208_v42  ;;  %v4216_v40 = vrot.slane %v4184_v46, %v8939_v36  ;;  %v10964_v54 = vld [vmem:[#allocation53_spill] sm:$0xff] }
0x26a6   :  { %4237 = vadd.xlane.f32.xlu0 %v4236_v5  ;;  %v4239_v20 = vsel %vm271_vm1, %v4227_v30, 0.0  ;;  %v4245_v48 = vsel %vm271_vm1, %v4229_v10, 0.0  ;;  %v4231_v3 = vmul.f32 %v10044_v8, %v4212_v62  ;;  %v10965_v46 = vld [vmem:[#allocation57_spill] sm:$0xff]  ;;  %v10966_v30 = vld [vmem:[#allocation56_spill] sm:$0xff]  ;;  %v10968_v10 = vld [vmem:[#allocation59_spill] sm:$0xff] }
0x26a7   :  { %v4242_v19 = vsel %vm271_vm1, %v4228_v6, 0.0  ;;  %v4248_v14 = vsel %vm271_vm1, %v4230_v0, 0.0  ;;  %v4232_v55 = vmul.f32 %v10037_v37, %v4216_v40  ;;  %v10967_v0 = vld [vmem:[#allocation58_spill] sm:$0xff] }
0x26a8   :  { %v4251_v33 = vsel %vm271_vm1, %v4231_v3, 0.0 }
0x26a9   :  { %4243 = vadd.xlane.f32.xlu1 %v4242_v19  ;;  %v4254_v39 = vsel %vm271_vm1, %v4232_v55, 0.0 }
0x26aa   :  { %4240 = vadd.xlane.f32.xlu0 %v4239_v20 }
0x26ad   :  { %4249 = vadd.xlane.f32.xlu1 %v4248_v14 }
0x26ae   :  { %4246 = vadd.xlane.f32.xlu0 %v4245_v48 }
0x26b1   :  { %4255 = vadd.xlane.f32.xlu1 %v4254_v39 }
0x26b2   :  { %4252 = vadd.xlane.f32.xlu0 %v4251_v33 }
0x272e   :  { %v4235_v38 = vpop.xlane.xlu1 %4234 }
0x272f   :  { %v4257_v35 = vadd.f32 %v4235_v38, %v10961_v24  ;;  %v4238_v1 = vpop.xlane.xlu0 %4237 }
0x2730   :  { %v4258_v2 = vadd.f32 %v4238_v1, %v10962_v9 }
0x2731   :  { %4274 = vperm.xlu0 %7859, %v4257_v35  }
0x2732   :  { %v4244_v53 = vpop.xlane.xlu1 %4243  ;;  %4277 = vperm.xlu1 %7860, %v4258_v2  }
0x2733   :  { %v4260_v7 = vadd.f32 %v4244_v53, %v10963_v61  ;;  %v4241_v45 = vpop.xlane.xlu0 %4240 }
0x2734   :  { %v4259_v42 = vadd.f32 %v4241_v45, %v10964_v54 }
0x2735   :  { %4283 = vperm.xlu0 %7859, %v4260_v7  }
0x2736   :  { %v4250_v25 = vpop.xlane.xlu1 %4249  ;;  %4280 = vperm.xlu1 %7860, %v4259_v42  }
0x2737   :  { %v4262_v5 = vadd.f32 %v4250_v25, %v10965_v46  ;;  %v4247_v6 = vpop.xlane.xlu0 %4246 }
0x2738   :  { %v4261_v34 = vadd.f32 %v4247_v6, %v10966_v30 }
0x2739   :  { %4289 = vperm.xlu0 %7859, %v4262_v5  }
0x273a   :  { %v4256_v19 = vpop.xlane.xlu1 %4255  ;;  %4286 = vperm.xlu1 %7860, %v4261_v34  }
0x273b   :  { %v4264_v40 = vadd.f32 %v4256_v19, %v10967_v0  ;;  %v4253_v20 = vpop.xlane.xlu0 %4252 }
0x273c   :  { %v4263_v62 = vadd.f32 %v4253_v20, %v10968_v10 }
0x273d   :  { %4295 = vperm.xlu0 %7859, %v4264_v40  }
0x273e   :  { %4292 = vperm.xlu1 %7860, %v4263_v62  }
0x27ac   :  { %v4275_v14 = vpop.permute.xlu0 %4274 }
0x27ad   :  { %v4278_v55 = vpop.permute.xlu1 %4277  ;;  %v4300_v39 = vrot.slane %v4275_v14, %v10946_v15 }
0x27ae   :  { %v4304_v48 = vrot.slane %v4278_v55, %v10946_v15 }
0x27b0   :  { %v4284_v3 = vpop.permute.xlu0 %4283  ;;  %v4329_v1 = vsel %vm1087_vm2, %v4304_v48, %v4300_v39 }
0x27b1   :  { %v4281_v33 = vpop.permute.xlu1 %4280  ;;  %v4312_v25 = vrot.slane %v4284_v3, %v10946_v15 }
0x27b2   :  { %v4308_v38 = vrot.slane %v4281_v33, %v10946_v15 }
0x27b4   :  { %v4330_v53 = vsel %vm1089_vm3, %v4308_v38, %v4329_v1  ;;  %v4290_v45 = vpop.permute.xlu0 %4289 }
0x27b5   :  { %v4287_v6 = vpop.permute.xlu1 %4286  ;;  %v4331_v20 = vsel %vm1091_vm4, %v4312_v25, %v4330_v53  ;;  %v4320_v14 = vrot.slane %v4290_v45, %v10946_v15 }
0x27b6   :  { %v4316_v19 = vrot.slane %v4287_v6, %v10946_v15 }
0x27b8   :  { %v4332_v55 = vsel %vm1093_vm5, %v4316_v19, %v4331_v20  ;;  %v4296_v10 = vpop.permute.xlu0 %4295 }
0x27b9   :  { %v4293_v0 = vpop.permute.xlu1 %4292  ;;  %v4328_v48 = vrot.slane %v4296_v10, %v10946_v15  ;;  %v4333_v39 = vsel %vm1095_vm6, %v4320_v14, %v4332_v55 }
0x27ba   :  { %v4324_v33 = vrot.slane %v4293_v0, %v10946_v15 }
0x27bc   :  { %v4334_v38 = vsel %vm1097_vm7, %v4324_v33, %v4333_v39 }
0x27bd   :  { %v4335_v3 = vsel %vm1099_vm8, %v4328_v48, %v4334_v38 }
0x27be   :  { %v4337_v1 = vsel %vm1102_vm9, %v4335_v3, -inf }
0x27bf   :  { %4338 = vmax.xlane.f32.xlu1 %v4337_v1 }
0x2848   :  { %v4339_v53 = vpop.xlane.xlu1 %4338 }
0x2849   :  { %v4344_v25 = vrot.slane %v4339_v53, %v8939_v36  ;;  %v4348_v6 = vrot.slane %v4339_v53, %v10947_v59  ;;  %v4352_v45 = vrot.slane %v4339_v53, %v10948_v18  ;;  %v4356_v10 = vrot.slane %v4339_v53, %v10949_v51 }
0x284a   :  { %v4360_v33 = vrot.slane %v4339_v53, %v10950_v63  ;;  %v4364_v38 = vrot.slane %v4339_v53, %v10951_v29  ;;  %v4368_v30 = vrot.slane %v4339_v53, %v10952_v26 }
0x284b   :  { %v4381_v19 = vsub.f32 %v4257_v35, %v4344_v25  ;;  %v4382_v0 = vsub.f32 %v4258_v2, %v4348_v6  ;;  %v4383_v55 = vsub.f32 %v4259_v42, %v4352_v45  ;;  %v4384_v48 = vsub.f32 %v4260_v7, %v4356_v10 }
0x284c   :  { %v4385_v3 = vsub.f32 %v4261_v34, %v4360_v33  ;;  %v4386_v35 = vsub.f32 %v4262_v5, %v4364_v38  ;;  %v4372_v42 = vrot.slane %v4339_v53, %v10953_v43  ;;  %v4387_v6 = vsub.f32 %v4263_v62, %v4368_v30 }
0x284d   :  { %v4389_v20 = vmul.f32 1.442695, %v4381_v19  ;;  %v4391_v14 = vmul.f32 1.442695, %v4382_v0  ;;  %v4393_v39 = vmul.f32 1.442695, %v4383_v55 }
0x284e   :  { %v4395_v1 = vmul.f32 1.442695, %v4384_v48  ;;  %v4397_v2 = vmul.f32 1.442695, %v4385_v3  ;;  %v4399_v7 = vmul.f32 1.442695, %v4386_v35  ;;  %v4388_v34 = vsub.f32 %v4264_v40, %v4372_v42 }
0x284f   :  { %8027 = vpow2.f32 %v4389_v20  ;;  %v4401_v19 = vmul.f32 1.442695, %v4387_v6 }
0x2850   :  { %8029 = vpow2.f32 %v4391_v14  ;;  %v4403_v5 = vmul.f32 1.442695, %v4388_v34 }
0x2851   :  { %8031 = vpow2.f32 %v4393_v39 }
0x2852   :  { %8033 = vpow2.f32 %v4395_v1 }
0x2853   :  { %8035 = vpow2.f32 %v4397_v2 }
0x2854   :  { %8037 = vpow2.f32 %v4399_v7 }
0x2855   :  { %8039 = vpow2.f32 %v4401_v19 }
0x2856   :  { %8041 = vpow2.f32 %v4403_v5 }
0x285c   :  { %v10080_v25 = vpop.eup %8027 }
0x285d   :  { %4414 = vperm.xlu0 %7859, %v10080_v25   ;;  %v10084_v45 = vpop.eup %8029 }
0x285e   :  { %v10087_v0 = vpop.eup %8031 }
0x285f   :  { %v10090_v20 = vpop.eup %8033 }
0x2860   :  { %v10093_v30 = vpop.eup %8035 }
0x2861   :  { %4417 = vperm.xlu0 %7859, %v10084_v45   ;;  %v8038_v62 = vpop.eup %8037 }
0x2862   :  { %v10096_v40 = vpop.eup %8039 }
0x2863   :  { %v10099_v53 = vpop.eup %8041 }
0x2865   :  { %4420 = vperm.xlu0 %7859, %v10087_v0  }
0x2869   :  { %4423 = vperm.xlu0 %7859, %v10090_v20  }
0x286d   :  { %4426 = vperm.xlu0 %7859, %v10093_v30  }
0x2871   :  { %4429 = vperm.xlu0 %7859, %v8038_v62  }
0x2875   :  { %4432 = vperm.xlu0 %7859, %v10096_v40  }
0x2879   :  { %4435 = vperm.xlu0 %7859, %v10099_v53  }
0x28d8   :  { %v4415_v10 = vpop.permute.xlu0 %4414 }
0x28d9   :  { %v4440_v1 = vrot.slane %v4415_v10, %v10946_v15 }
0x28dc   :  { %v4418_v55 = vpop.permute.xlu0 %4417 }
0x28dd   :  { %v4444_v38 = vrot.slane %v4418_v55, %v10946_v15 }
0x28df   :  { %v4469_v6 = vsel %vm1087_vm2, %v4444_v38, %v4440_v1 }
0x28e0   :  { %v4421_v14 = vpop.permute.xlu0 %4420 }
0x28e1   :  { %v4448_v3 = vrot.slane %v4421_v14, %v10946_v15 }
0x28e3   :  { %v4470_v34 = vsel %vm1089_vm3, %v4448_v3, %v4469_v6 }
0x28e4   :  { %v4424_v33 = vpop.permute.xlu0 %4423 }
0x28e5   :  { %v4452_v35 = vrot.slane %v4424_v33, %v10946_v15 }
0x28e7   :  { %v4471_v5 = vsel %vm1091_vm4, %v4452_v35, %v4470_v34 }
0x28e8   :  { %v4427_v48 = vpop.permute.xlu0 %4426 }
0x28e9   :  { %v4456_v2 = vrot.slane %v4427_v48, %v10946_v15 }
0x28eb   :  { %v4472_v55 = vsel %vm1093_vm5, %v4456_v2, %v4471_v5 }
0x28ec   :  { %v4430_v39 = vpop.permute.xlu0 %4429 }
0x28ed   :  { %v4460_v7 = vrot.slane %v4430_v39, %v10946_v15 }
0x28ef   :  { %v4473_v10 = vsel %vm1095_vm6, %v4460_v7, %v4472_v55 }
0x28f0   :  { %v4433_v42 = vpop.permute.xlu0 %4432 }
0x28f1   :  { %v4464_v19 = vrot.slane %v4433_v42, %v10946_v15 }
0x28f3   :  { %v4474_v48 = vsel %vm1097_vm7, %v4464_v19, %v4473_v10 }
0x28f4   :  { %v4436_v14 = vpop.permute.xlu0 %4435 }
0x28f5   :  { %v4468_v33 = vrot.slane %v4436_v14, %v10946_v15 }
0x28f7   :  { %v4475_v46 = vsel %vm1099_vm8, %v4468_v33, %v4474_v48 }
0x28f8   :  { %v4477_v38 = vsel %vm1102_vm9, %v4475_v46, 0.0 }
0x28f9   :  { %4478 = vadd.xlane.f32.xlu0 %v4477_v38 }
0x2982   :  { %v4479_v39 = vpop.xlane.xlu0 %4478 }
0x2983   :  { %v4484_v3 = vrot.slane %v4479_v39, %v8939_v36  ;;  %v4488_v1 = vrot.slane %v4479_v39, %v10947_v59  ;;  %v4504_v35 = vrot.slane %v4479_v39, %v10951_v29  ;;  %v4492_v2 = vrot.slane %v4479_v39, %v10948_v18 }
0x2984   :  { %v4496_v42 = vrot.slane %v4479_v39, %v10949_v51  ;;  %v4500_v6 = vrot.slane %v4479_v39, %v10950_v63  ;;  %v4508_v7 = vrot.slane %v4479_v39, %v10952_v26  ;;  %v4512_v55 = vrot.slane %v4479_v39, %v10953_v43 }
0x2985   :  { %8043 = vrcp.f32 %v4484_v3 }
0x2986   :  { %8045 = vrcp.f32 %v4488_v1 }
0x2987   :  { %8047 = vrcp.f32 %v4504_v35 }
0x2988   :  { %8049 = vrcp.f32 %v4492_v2 }
0x2989   :  { %8051 = vrcp.f32 %v4496_v42 }
0x298a   :  { %8053 = vrcp.f32 %v4500_v6 }
0x298b   :  { %8055 = vrcp.f32 %v4508_v7 }
0x298c   :  { %8057 = vrcp.f32 %v4512_v55 }
0x2992   :  { %v8044_v46 = vpop.eup %8043 }
0x2993   :  { %v4522_v34 = vmul.f32 %v8044_v46, %v10080_v25  ;;  %v8046_v19 = vpop.eup %8045 }
0x2994   :  { %v8048_v5 = vpop.eup %8047  ;;  %v4524_v14 = vmul.f32 %v8046_v19, %v10084_v45 }
0x2995   :  { %4539 = vperm.xlu1 %7860, %v4522_v34   ;;  %v8050_v10 = vpop.eup %8049  ;;  %v4532_v33 = vmul.f32 %v8048_v5, %v8038_v62 }
0x2996   :  { %v4526_v48 = vmul.f32 %v8050_v10, %v10087_v0  ;;  %v8052_v38 = vpop.eup %8051 }
0x2997   :  { %4564 = vperm.xlu0 %7859, %v4532_v33   ;;  %v4528_v3 = vmul.f32 %v8052_v38, %v10090_v20  ;;  %v8054_v25 = vpop.eup %8053 }
0x2998   :  { %v4530_v1 = vmul.f32 %v8054_v25, %v10093_v30  ;;  %v8056_v35 = vpop.eup %8055 }
0x2999   :  { %4544 = vperm.xlu1 %7860, %v4524_v14   ;;  %v4534_v39 = vmul.f32 %v8056_v35, %v10096_v40  ;;  %v8058_v45 = vpop.eup %8057 }
0x299a   :  { %v4536_v62 = vmul.f32 %v8058_v45, %v10099_v53 }
0x299d   :  { %4549 = vperm.xlu1 %7860, %v4526_v48  }
0x29a1   :  { %4554 = vperm.xlu1 %7860, %v4528_v3  }
0x29a5   :  { %4559 = vperm.xlu1 %7860, %v4530_v1  }
0x29a9   :  { %4569 = vperm.xlu1 %7860, %v4534_v39  }
0x29ad   :  { %4574 = vperm.xlu1 %7860, %v4536_v62  }
0x2a10   :  { %v4540_v2 = vpop.permute.xlu1 %4539 }
0x2a11   :  { %v4577_v0 = vmul.f32 %v9991_v44, %v4540_v2 }
0x2a12   :  { %v4565_v6 = vpop.permute.xlu0 %4564 }
0x2a13   :  { %v4585_v46 = vsel %vm271_vm1, %v4577_v0, 0.0  ;;  %v4582_v7 = vmul.f32 %v10021_v11, %v4565_v6 }
0x2a14   :  { %v4545_v42 = vpop.permute.xlu1 %4544  ;;  %v4586_v5 = vrot.slane %v4585_v46, 4 }
0x2a15   :  { %v4578_v20 = vmul.f32 %v9997_v21, %v4545_v42  ;;  %v4620_v55 = vsel %vm271_vm1, %v4582_v7, 0.0 }
0x2a16   :  { %v4587_v38 = vadd.f32 %v4586_v5, %v4585_v46  ;;  %v4621_v25 = vrot.slane %v4620_v55, 4 }
0x2a17   :  { %v4592_v30 = vsel %vm271_vm1, %v4578_v20, 0.0 }
0x2a18   :  { %v4593_v34 = vrot.slane %v4592_v30, 4  ;;  %v4550_v40 = vpop.permute.xlu1 %4549  ;;  %v4588_v0 = vrot.slane %v4587_v38, 2  ;;  %v4622_v6 = vadd.f32 %v4621_v25, %v4620_v55 }
0x2a19   :  { %v4579_v19 = vmul.f32 %v10014_v23, %v4550_v40 }
0x2a1a   :  { %v4594_v14 = vadd.f32 %v4593_v34, %v4592_v30  ;;  %v4589_v5 = vadd.f32 %v4588_v0, %v4587_v38 }
0x2a1b   :  { %v4599_v53 = vsel %vm271_vm1, %v4579_v19, 0.0 }
0x2a1c   :  { %v4600_v10 = vrot.slane %v4599_v53, 4  ;;  %v4555_v33 = vpop.permute.xlu1 %4554  ;;  %v4595_v35 = vrot.slane %v4594_v14, 2 }
0x2a1d   :  { %v4580_v48 = vmul.f32 %v10008_v60, %v4555_v33  ;;  %v4623_v33 = vrot.slane %v4622_v6, 2 }
0x2a1e   :  { %v4601_v3 = vadd.f32 %v4600_v10, %v4599_v53  ;;  %v4596_v30 = vadd.f32 %v4595_v35, %v4594_v14  ;;  %v4590_v14 = vrot.slane %v4589_v5, 1 }
0x2a1f   :  { %v4606_v1 = vsel %vm271_vm1, %v4580_v48, 0.0 }
0x2a20   :  { %v4607_v39 = vrot.slane %v4606_v1, 4  ;;  %v4560_v45 = vpop.permute.xlu1 %4559  ;;  %v4602_v62 = vrot.slane %v4601_v3, 2  ;;  %v4597_v43 = vrot.slane %v4596_v30, 1 }
0x2a21   :  { %v4581_v2 = vmul.f32 %v10029_v57, %v4560_v45 }
0x2a22   :  { %v4608_v42 = vadd.f32 %v4607_v39, %v4606_v1  ;;  %v4603_v46 = vadd.f32 %v4602_v62, %v4601_v3  ;;  %v4624_v3 = vadd.f32 %v4623_v33, %v4622_v6  ;;  %v4598_v38 = vadd.f32 %v4597_v43, %v4596_v30 }
0x2a23   :  { %v4613_v20 = vsel %vm271_vm1, %v4581_v2, 0.0 }
0x2a24   :  { %v4609_v7 = vrot.slane %v4608_v42, 2  ;;  %v4614_v34 = vrot.slane %v4613_v20, 4  ;;  %v4570_v40 = vpop.permute.xlu1 %4569  ;;  %v4604_v55 = vrot.slane %v4603_v46, 1  ;;  %v4625_v51 = vrot.slane %v4624_v3, 1 }
0x2a25   :  { %v4583_v19 = vmul.f32 %v10044_v8, %v4570_v40 }
0x2a26   :  { %v4610_v53 = vadd.f32 %v4609_v7, %v4608_v42  ;;  %v4615_v10 = vadd.f32 %v4614_v34, %v4613_v20  ;;  %v4605_v7 = vadd.f32 %v4604_v55, %v4603_v46  ;;  %v4591_v34 = vadd.f32 %v4590_v14, %v4589_v5  ;;  %v10205_v55 = vld [vmem:[#allocation16 + $0x18] sm:$0xff]  ;;  %v10219_v14 = vld [vmem:[#allocation16] sm:$0xff] }
0x2a27   :  { %v4627_v48 = vsel %vm271_vm1, %v4583_v19, 0.0  ;;  %v4626_v33 = vadd.f32 %v4625_v51, %v4624_v3  ;;  %v10188_v51 = vld [vmem:[%s10777_s10 + $0x8] sm:$0xff]  ;;  %v10969_v3 = vld [vmem:[#allocation38_spill] sm:$0xff] }
0x2a28   :  { %v4616_v45 = vrot.slane %v4615_v10, 2  ;;  %v4628_v26 = vrot.slane %v4627_v48, 4  ;;  %v4575_v1 = vpop.permute.xlu1 %4574  ;;  %v4611_v35 = vrot.slane %v4610_v53, 1 }
0x2a29   :  { %v4584_v25 = vmul.f32 %v10037_v37, %v4575_v1  ;;  %v4719_v1 = vsel %vm1087_vm2, %v4598_v38, %v4591_v34 }
0x2a2a   :  { %v4617_v39 = vadd.f32 %v4616_v45, %v4615_v10  ;;  %v4629_v2 = vadd.f32 %v4628_v26, %v4627_v48  ;;  %v4612_v40 = vadd.f32 %v4611_v35, %v4610_v53  ;;  %v4720_v26 = vsel %vm1089_vm3, %v4605_v7, %v4719_v1  ;;  %v10225_v35 = vld [vmem:[#allocation17 + $0x18] sm:$0xff] }
0x2a2b   :  { %v4634_v62 = vsel %vm271_vm1, %v4584_v25, 0.0  ;;  %v10215_v25 = vld [vmem:[#allocation16 + $0x8] sm:$0xff] }
0x2a2c   :  { %v4618_v0 = vrot.slane %v4617_v39, 1  ;;  %v4630_v42 = vrot.slane %v4629_v2, 2  ;;  %v4635_v20 = vrot.slane %v4634_v62, 4  ;;  %v4721_v6 = vsel %vm1091_vm4, %v4612_v40, %v4720_v26 }
0x2a2e   :  { %v4631_v19 = vadd.f32 %v4630_v42, %v4629_v2  ;;  %v4636_v29 = vadd.f32 %v4635_v20, %v4634_v62  ;;  %v4619_v63 = vadd.f32 %v4618_v0, %v4617_v39  ;;  %v10231_v39 = vld [vmem:[#allocation17 + $0x10] sm:$0xff]  ;;  %v10235_v2 = vld [vmem:[#allocation17 + $0x8] sm:$0xff]  ;;  %v377_v62 = vadd.f32 %v9903_v56, %v10969_v3 }
0x2a30   :  { %v4632_v18 = vrot.slane %v4631_v19, 1  ;;  %v4637_v59 = vrot.slane %v4636_v29, 2  ;;  %v4722_v43 = vsel %vm1093_vm5, %v4619_v63, %v4721_v6  ;;  %v10195_v63 = vld [vmem:[%s10777_s10] sm:$0xff] }
0x2a31   :  { %v4723_v53 = vsel %vm1095_vm6, %v4626_v33, %v4722_v43 }
0x2a32   :  { %v4638_v10 = vadd.f32 %v4637_v59, %v4636_v29  ;;  %v4633_v30 = vadd.f32 %v4632_v18, %v4631_v19  ;;  %v10172_v59 = vld [vmem:[%s10777_s10 + $0x18] sm:$0xff]  ;;  %v10181_v18 = vld [vmem:[%s10777_s10 + $0x10] sm:$0xff] }
0x2a34   :  { %v4639_v46 = vrot.slane %v4638_v10, 1  ;;  %v4724_v48 = vsel %vm1097_vm7, %v4633_v30, %v4723_v53 }
0x2a36   :  { %v4640_v5 = vadd.f32 %v4639_v46, %v4638_v10 }
0x2a38   :  { %v4725_v45 = vsel %vm1099_vm8, %v4640_v5, %v4724_v48 }
0x2a39   :  { %7679 = vmatmul.mubr.msk.f32.vlgmr.msra.gmra.mxu1 %vm271_vm1, %v4725_v45  ;;  %v10257_v45 = vld [vmem:[#allocation20 + $0x18] sm:$0xff] }
0x2a3a   :  { %7693 = vmatpush3.msra.mxu1 %v9845_v52  ;;  %7700 = vmatprep.mubr.msk.f32.mxu1 %vm8584_vm0, %v10914_v12 }
0x2a3b   :  { %7694 = vmatprep.subr.mxu1 %v10914_v12 }
0x2a3c   :  { %7695 = vmatpush3.msra.mxu1 %v9851_v47 }
0x2a3d   :  { %7696 = vmatprep.subr.mxu1 %v10914_v12 }
0x2a3e   :  { %7697 = vmatpush3.msra.mxu1 %v9855_v31 }
0x2a3f   :  { %7698 = vmatprep.subr.mxu1 %v10914_v12 }
0x2a40   :  { %7699 = vmatpush3.msra.mxu1 %v9859_v41 }
0x2a41   :  { %7701 = vmatmul.mubr.msk.f32.vlgmr.msra.gmra.mxu1 %vm271_vm1, %v9915_v4  ;;  %7714 = vmatprep.subr.mxu1 %v10914_v12 }
0x2a42   :  { %7715 = vmatpush3.msra.mxu1 %v10172_v59  ;;  %7722 = vmatprep.mubr.msk.f32.mxu1 %vm8584_vm0, %v10914_v12 }
0x2a43   :  { %7716 = vmatprep.subr.mxu1 %v10914_v12 }
0x2a44   :  { %7717 = vmatpush3.msra.mxu1 %v10181_v18 }
0x2a45   :  { %7718 = vmatprep.subr.mxu1 %v10914_v12 }
0x2a46   :  { %7719 = vmatpush3.msra.mxu1 %v10188_v51 }
0x2a47   :  { %7720 = vmatprep.subr.mxu1 %v10914_v12 }
0x2a48   :  { %7721 = vmatpush3.msra.mxu1 %v10195_v63 }
0x2a49   :  { %7736 = vmatprep.subr.mxu1 %v10914_v12 }
0x2af9   :  { %v4794_v29 = vpop.f32.mrf.mxu1 }
0x2afa   :  { %v4795_v52 = vadd.f32 %v4794_v29, %v9977_v58  ;;  %v10211_v58 = vld [vmem:[#allocation16 + $0x10] sm:$0xff]  ;;  %v10267_v29 = vld [vmem:[#allocation20 + $0x8] sm:$0xff] }
0x2afb   :  { %v7680_v47 = vpop.f32.mrf.mxu1 }
0x2afc   :  { %8059 = vtanh.f32 %v4795_v52  ;;  %v10271_v52 = vld [vmem:[#allocation20] sm:$0xff] }
0x2b01   :  { %v4939_v31 = vpop.f32.mrf.mxu1 }
0x2b03   :  { %v7702_v41 = vpop.f32.mrf.mxu1 }
0x2b09   :  { %v8060_v4 = vpop.eup %8059 }
0x2b0a   :  { %6958 = vst.msk [vmem:[%s10783_s16 + $0x18] sm:$0xff] %vm271_vm1, %v8060_v4  ;;  %7690 = vmatmul.mubr.msk.f32.vlgmr.msra.gmra.mxu0 %vm271_vm1, %v8060_v4 }
0x2b0b   :  { %7704 = vmatpush3.msra.mxu0 %v10205_v55  ;;  %7711 = vmatprep.mubr.msk.f32.mxu0 %vm8584_vm0, %v10914_v12 }
0x2b0c   :  { %7705 = vmatprep.subr.mxu0 %v10914_v12 }
0x2b0d   :  { %7706 = vmatpush3.msra.mxu0 %v10211_v58 }
0x2b0e   :  { %7707 = vmatprep.subr.mxu0 %v10914_v12 }
0x2b0f   :  { %7708 = vmatpush3.msra.mxu0 %v10215_v25 }
0x2b10   :  { %7709 = vmatprep.subr.mxu0 %v10914_v12 }
0x2b11   :  { %7710 = vmatpush3.msra.mxu0 %v10219_v14 }
0x2b12   :  { %7712 = vmatmul.mubr.msk.f32.vlgmr.msra.gmra.mxu0 %vm271_vm1, %v9943_v49  ;;  %7725 = vmatprep.subr.mxu0 %v10914_v12  ;;  %v10239_v49 = vld [vmem:[#allocation17] sm:$0xff] }
0x2b13   :  { %7726 = vmatpush3.msra.mxu0 %v10225_v35  ;;  %7733 = vmatprep.mubr.msk.f32.mxu0 %vm8584_vm0, %v10914_v12 }
0x2b14   :  { %7727 = vmatprep.subr.mxu0 %v10914_v12 }
0x2b15   :  { %7728 = vmatpush3.msra.mxu0 %v10231_v39 }
0x2b16   :  { %7729 = vmatprep.subr.mxu0 %v10914_v12 }
0x2b17   :  { %7730 = vmatpush3.msra.mxu0 %v10235_v2 }
0x2b18   :  { %7731 = vmatprep.subr.mxu0 %v10914_v12 }
0x2b19   :  { %7732 = vmatpush3.msra.mxu0 %v10239_v49 }
0x2b1a   :  { %7747 = vmatprep.subr.mxu0 %v10914_v12 }
0x2bca   :  { %v4868_v38 = vpop.f32.mrf.mxu0 }
0x2bcb   :  { %v4872_v0 = vadd.f32 %v4868_v38, %v377_v62 }
0x2bcc   :  { %v7691_v42 = vpop.f32.mrf.mxu0 }
0x2bcd   :  { %v4943_v20 = vadd.f32 %v4939_v31, %v4872_v0 }
0x2bcf   :  { %8061 = vtanh.f32 %v4943_v20  ;;  %v7120_v19 = vmul.f32 -1.442695, %v4943_v20 }
0x2bd1   :  { %8063 = vpow2.f32 %v7120_v19 }
0x2bd2   :  { %v5034_v7 = vpop.f32.mrf.mxu0 }
0x2bd4   :  { %v7713_v34 = vpop.f32.mrf.mxu0 }
0x2bdc   :  { %v8062_v40 = vpop.eup %8061 }
0x2bdd   :  { %4953 = vrot.lane.b32.xlu1 %v8062_v40, %s8585_s4 }
0x2bde   :  { %v8064_v1 = vpop.eup %8063 }
0x2bdf   :  { %v4947_v26 = vadd.f32 1.0, %v8064_v1 }
0x2be1   :  { %8065 = vrcp.f32 %v4947_v26 }
0x2bee   :  { %v8066_v6 = vpop.eup %8065 }
0x2bef   :  { %v4951_v56 = vmul.f32 %v8066_v6, %v9910_v28  ;;  %v10263_v28 = vld [vmem:[#allocation20 + $0x10] sm:$0xff] }
0x2c4f   :  { %v4954_v10 = vpop.permute.xlu1 %4953 }
0x2c50   :  { %v4956_v43 = vmul.f32 %v8066_v6, %v4954_v10  ;;  %v10297_v10 = vld [vmem:[#allocation19 + $0x10] sm:$0xff] }
0x2c52   :  { %4958 = vrot.lane.b32.xlu1 %v4956_v43, %s8586_s0  ;;  %v10303_v43 = vld [vmem:[#allocation19 + $0x8] sm:$0xff] }
0x2cc4   :  { %v4959_v30 = vpop.permute.xlu1 %4958 }
0x2cc5   :  { %v10248_v33 = vadd.f32 %v4959_v30, %v4951_v56 }
0x2cc7   :  { %8067 = vtanh.f32 %v10248_v33 }
0x2cd4   :  { %v8068_v46 = vpop.eup %8067 }
0x2cd5   :  { %4964 = vrot.lane.b32.xlu1 %v8068_v46, %s8585_s4 }
0x2d47   :  { %v4965_v5 = vpop.permute.xlu1 %4964 }
0x2d48   :  { %v4967_v53 = vmul.f32 %v8066_v6, %v4965_v5 }
0x2d4a   :  { %5039 = vrot.lane.b32.xlu0 %v4967_v53, %s8586_s0 }
0x2dbc   :  { %v10253_v48 = vpop.permute.xlu0 %5039 }
0x2dbd   :  { %7723 = vmatmul.mubr.msk.f32.vlgmr.msra.gmra.mxu1 %vm271_vm1, %v10253_v48 }
0x2dbe   :  { %7737 = vmatpush3.msra.mxu1 %v10257_v45  ;;  %7744 = vmatprep.mubr.msk.f32.mxu1 %vm8584_vm0, %v10914_v12 }
0x2dbf   :  { %7738 = vmatprep.subr.mxu1 %v10914_v12 }
0x2dc0   :  { %7739 = vmatpush3.msra.mxu1 %v10263_v28 }
0x2dc1   :  { %7740 = vmatprep.subr.mxu1 %v10914_v12 }
0x2dc2   :  { %7741 = vmatpush3.msra.mxu1 %v10267_v29 }
0x2dc3   :  { %7742 = vmatprep.subr.mxu1 %v10914_v12 }
0x2dc4   :  { %7743 = vmatpush3.msra.mxu1 %v10271_v52 }
0x2dc5   :  { %7758 = vmatprep.subr.mxu1 %v10914_v12 }
0x2e7d   :  { %v5109_v47 = vpop.f32.mrf.mxu1 }
0x2e7e   :  { %v5110_v31 = vadd.f32 %v5109_v47, %v5034_v7 }
0x2e7f   :  { %v7724_v41 = vpop.f32.mrf.mxu1 }
0x2e80   :  { %v5113_v4 = vadd.f32 %v9932_v27, %v5110_v31 }
0x2e82   :  { %8069 = vtanh.f32 %v5113_v4  ;;  %v7123_v62 = vmul.f32 -1.442695, %v5113_v4 }
0x2e84   :  { %8071 = vpow2.f32 %v7123_v62 }
0x2e8f   :  { %v8070_v3 = vpop.eup %8069 }
0x2e90   :  { %5123 = vrot.lane.b32.xlu1 %v8070_v3, %s8585_s4 }
0x2e91   :  { %v8072_v38 = vpop.eup %8071 }
0x2e92   :  { %v5117_v0 = vadd.f32 1.0, %v8072_v38 }
0x2e94   :  { %8073 = vrcp.f32 %v5117_v0 }
0x2ea1   :  { %v8074_v42 = vpop.eup %8073 }
0x2ea2   :  { %v5121_v40 = vmul.f32 %v8074_v42, %v9938_v17  ;;  %v10290_v17 = vld [vmem:[#allocation19 + $0x18] sm:$0xff] }
0x2f02   :  { %v5124_v20 = vpop.permute.xlu1 %5123 }
0x2f03   :  { %v5126_v34 = vmul.f32 %v8074_v42, %v5124_v20 }
0x2f05   :  { %5128 = vrot.lane.b32.xlu0 %v5126_v34, %s8586_s0 }
0x2f77   :  { %v5129_v7 = vpop.permute.xlu0 %5128 }
0x2f78   :  { %v10279_v19 = vadd.f32 %v5129_v7, %v5121_v40 }
0x2f7a   :  { %8075 = vtanh.f32 %v10279_v19 }
0x2f87   :  { %v8076_v27 = vpop.eup %8075 }
0x2f88   :  { %5134 = vrot.lane.b32.xlu1 %v8076_v27, %s8585_s4 }
0x2ffa   :  { %v5135_v1 = vpop.permute.xlu1 %5134 }
0x2ffb   :  { %v5137_v26 = vmul.f32 %v8074_v42, %v5135_v1 }
0x2ffd   :  { %5139 = vrot.lane.b32.xlu0 %v5137_v26, %s8586_s0 }
0x306f   :  { %v10284_v6 = vpop.permute.xlu0 %5139 }
0x3070   :  { %7734 = vmatmul.mubr.msk.f32.vlgmr.msra.gmra.mxu0 %vm271_vm1, %v10284_v6  ;;  %7745 = vmatmul.mubr.msk.f32.vlgmr.msra.gmra.mxu1 %vm271_vm1, %v10284_v6 }
0x3071   :  { %7748 = vmatpush3.msra.mxu0 %v10290_v17  ;;  %7755 = vmatprep.mubr.msk.f32.mxu0 %vm8584_vm0, %v10914_v12 }
0x3072   :  { %7749 = vmatprep.subr.mxu0 %v10914_v12  ;;  %7759 = vmatpush3.msra.mxu1 %v9953_v32  ;;  %v10309_v32 = vld [vmem:[#allocation19] sm:$0xff] }
0x3073   :  { %7750 = vmatpush3.msra.mxu0 %v10297_v10  ;;  %7760 = vmatprep.subr.mxu1 %v10914_v12 }
0x3074   :  { %7751 = vmatprep.subr.mxu0 %v10914_v12  ;;  %7761 = vmatpush3.msra.mxu1 %v9959_v13 }
0x3075   :  { %7752 = vmatpush3.msra.mxu0 %v10303_v43  ;;  %7762 = vmatprep.subr.mxu1 %v10914_v12 }
0x3076   :  { %7753 = vmatprep.subr.mxu0 %v10914_v12  ;;  %7763 = vmatpush3.msra.mxu1 %v9965_v16 }
0x3077   :  { %7754 = vmatpush3.msra.mxu0 %v10309_v32  ;;  %7764 = vmatprep.subr.mxu1 %v10914_v12 }
0x3078   :  { %7769 = vmatprep.subr.mxu0 %v10914_v12  ;;  %7765 = vmatpush3.msra.mxu1 %v9971_v50 }
0x3079   :  { %7766 = vmatprep.mubr.msk.f32.mxu1 %vm8584_vm0, %v10914_v12  ;;  %7780 = vmatprep.subr.mxu1 %v10914_v12 }
0x3130   :  { %v5209_v13 = vpop.f32.mrf.mxu0  ;;  %v10318_v56 = vpop.f32.mrf.mxu1 }
0x3131   :  { %v5214_v30 = vcombine.high %v5209_v13, %v5209_v13  ;;  %v5221_v16 = vrot.slane %v5209_v13, %v10960_v22 }
0x3132   :  { %v7735_v46 = vpop.f32.mrf.mxu0  ;;  %v7746_v5 = vpop.f32.mrf.mxu1 }
0x3133   :  { %v5228_v53 = vrot.slane %v5214_v30, %v10960_v22  ;;  %v5229_v47 = vcombine.high %v5221_v16, %v5221_v16  ;;  %v5237_v31 = vrot.slane %v5221_v16, %v10960_v22 }
0x3135   :  { %v5230_v41 = vcombine.high %v5228_v53, %v5228_v53  ;;  %v5251_v50 = vrot.slane %v5229_v47, %v10960_v22  ;;  %v5259_v4 = vcombine.high %v5237_v31, %v5237_v31  ;;  %v5244_v3 = vrot.slane %v5228_v53, %v10960_v22 }
0x3136   :  { %v5266_v62 = vrot.slane %v5237_v31, %v8939_v36 }
0x3137   :  { %v5270_v38 = vrot.slane %v5251_v50, %v8939_v36  ;;  %v5261_v0 = vcombine.high %v5251_v50, %v5251_v50  ;;  %v5274_v42 = vrot.slane %v5259_v4, %v8939_v36  ;;  %v5258_v20 = vrot.slane %v5230_v41, %v10960_v22 }
0x3138   :  { %v5303_v34 = vmul.f32 %v9991_v44, %v5266_v62  ;;  %v5282_v26 = vrot.slane %v5244_v3, %v8939_v36  ;;  %v5260_v5 = vcombine.high %v5244_v3, %v5244_v3 }
0x3139   :  { %v5304_v40 = vmul.f32 %v9997_v21, %v5270_v38  ;;  %v5278_v7 = vrot.slane %v5261_v0, %v8939_v36  ;;  %v5286_v1 = vrot.slane %v5258_v20, %v8939_v36  ;;  %v5262_v13 = vcombine.high %v5258_v20, %v5258_v20 }
0x313a   :  { %v5311_v27 = vsel %vm271_vm1, %v5303_v34, 0.0  ;;  %v5305_v46 = vmul.f32 %v10014_v23, %v5274_v42  ;;  %v5307_v31 = vmul.f32 %v10029_v57, %v5282_v26  ;;  %v5290_v41 = vrot.slane %v5260_v5, %v8939_v36  ;;  %v10973_v5 = vld [vmem:[#allocation59_spill] sm:$0xff] }
0x313b   :  { %5312 = vadd.xlane.f32.xlu1 %v5311_v27  ;;  %v5314_v30 = vsel %vm271_vm1, %v5304_v40, 0.0  ;;  %v5306_v16 = vmul.f32 %v10008_v60, %v5278_v7  ;;  %v5308_v21 = vmul.f32 %v10021_v11, %v5286_v1  ;;  %v5294_v53 = vrot.slane %v5262_v13, %v8939_v36  ;;  %v10970_v40 = vld [vmem:[#allocation57_spill] sm:$0xff]  ;;  %v10971_v1 = vld [vmem:[#allocation56_spill] sm:$0xff] }
0x313c   :  { %5315 = vadd.xlane.f32.xlu0 %v5314_v30  ;;  %v5317_v47 = vsel %vm271_vm1, %v5305_v46, 0.0  ;;  %v5323_v50 = vsel %vm271_vm1, %v5307_v31, 0.0  ;;  %v5309_v4 = vmul.f32 %v10044_v8, %v5290_v41  ;;  %v10972_v30 = vld [vmem:[#allocation58_spill] sm:$0xff] }
0x313d   :  { %v5320_v44 = vsel %vm271_vm1, %v5306_v16, 0.0  ;;  %v5326_v60 = vsel %vm271_vm1, %v5308_v21, 0.0  ;;  %v5310_v23 = vmul.f32 %v10037_v37, %v5294_v53 }
0x313e   :  { %v5329_v3 = vsel %vm271_vm1, %v5309_v4, 0.0 }
0x313f   :  { %5321 = vadd.xlane.f32.xlu1 %v5320_v44  ;;  %v5332_v11 = vsel %vm271_vm1, %v5310_v23, 0.0 }
0x3140   :  { %5318 = vadd.xlane.f32.xlu0 %v5317_v47 }
0x3143   :  { %5327 = vadd.xlane.f32.xlu1 %v5326_v60 }
0x3144   :  { %5324 = vadd.xlane.f32.xlu0 %v5323_v50 }
0x3147   :  { %5333 = vadd.xlane.f32.xlu1 %v5332_v11 }
0x3148   :  { %5330 = vadd.xlane.f32.xlu0 %v5329_v3 }
0x31c4   :  { %v5313_v57 = vpop.xlane.xlu1 %5312 }
0x31c5   :  { %v5335_v62 = vadd.f32 %v5313_v57, %v10961_v24  ;;  %v5316_v38 = vpop.xlane.xlu0 %5315 }
0x31c6   :  { %v5336_v0 = vadd.f32 %v5316_v38, %v10962_v9 }
0x31c7   :  { %5352 = vperm.xlu0 %7859, %v5335_v62  }
0x31c8   :  { %v5322_v37 = vpop.xlane.xlu1 %5321  ;;  %5355 = vperm.xlu1 %7860, %v5336_v0  }
0x31c9   :  { %v5338_v42 = vadd.f32 %v5322_v37, %v10963_v61  ;;  %v5319_v20 = vpop.xlane.xlu0 %5318 }
0x31ca   :  { %v5337_v8 = vadd.f32 %v5319_v20, %v10964_v54 }
0x31cb   :  { %5361 = vperm.xlu0 %7859, %v5338_v42  }
0x31cc   :  { %v5328_v34 = vpop.xlane.xlu1 %5327  ;;  %5358 = vperm.xlu1 %7860, %v5337_v8  }
0x31cd   :  { %v5340_v7 = vadd.f32 %v5328_v34, %v10970_v40  ;;  %v5325_v27 = vpop.xlane.xlu0 %5324 }
0x31ce   :  { %v5339_v26 = vadd.f32 %v5325_v27, %v10971_v1  ;;  %v10979_v1 = vld [vmem:[#allocation51_spill] sm:$0xff] }
0x31cf   :  { %5367 = vperm.xlu0 %7859, %v5340_v7  }
0x31d0   :  { %v5334_v13 = vpop.xlane.xlu1 %5333  ;;  %5364 = vperm.xlu1 %7860, %v5339_v26  }
0x31d1   :  { %v5342_v16 = vadd.f32 %v5334_v13, %v10972_v30  ;;  %v5331_v46 = vpop.xlane.xlu0 %5330 }
0x31d2   :  { %v5341_v44 = vadd.f32 %v5331_v46, %v10973_v5 }
0x31d3   :  { %5373 = vperm.xlu0 %7859, %v5342_v16  }
0x31d4   :  { %5370 = vperm.xlu1 %7860, %v5341_v44  }
0x3242   :  { %v5353_v21 = vpop.permute.xlu0 %5352 }
0x3243   :  { %v5356_v53 = vpop.permute.xlu1 %5355  ;;  %v5378_v41 = vrot.slane %v5353_v21, %v10946_v15 }
0x3244   :  { %v5382_v47 = vrot.slane %v5356_v53, %v10946_v15 }
0x3246   :  { %v5362_v31 = vpop.permute.xlu0 %5361  ;;  %v5407_v50 = vsel %vm1087_vm2, %v5382_v47, %v5378_v41 }
0x3247   :  { %v5359_v60 = vpop.permute.xlu1 %5358  ;;  %v5390_v3 = vrot.slane %v5362_v31, %v10946_v15 }
0x3248   :  { %v5386_v23 = vrot.slane %v5359_v60, %v10946_v15 }
0x324a   :  { %v5408_v4 = vsel %vm1089_vm3, %v5386_v23, %v5407_v50  ;;  %v5368_v11 = vpop.permute.xlu0 %5367  ;;  %v10974_v50 = vld [vmem:[#allocation40_spill] sm:$0xff] }
0x324b   :  { %v5365_v57 = vpop.permute.xlu1 %5364  ;;  %v5409_v37 = vsel %vm1091_vm4, %v5390_v3, %v5408_v4  ;;  %v5398_v27 = vrot.slane %v5368_v11, %v10946_v15  ;;  %v10975_v11 = vld [vmem:[#allocation42_spill] sm:$0xff] }
0x324c   :  { %v5394_v38 = vrot.slane %v5365_v57, %v10946_v15 }
0x324e   :  { %v5410_v20 = vsel %vm1093_vm5, %v5394_v38, %v5409_v37  ;;  %v5374_v34 = vpop.permute.xlu0 %5373 }
0x324f   :  { %v5371_v13 = vpop.permute.xlu1 %5370  ;;  %v5406_v21 = vrot.slane %v5374_v34, %v10946_v15  ;;  %v5411_v53 = vsel %vm1095_vm6, %v5398_v27, %v5410_v20  ;;  %v10976_v34 = vld [vmem:[#allocation43_spill] sm:$0xff] }
0x3250   :  { %v5402_v46 = vrot.slane %v5371_v13, %v10946_v15 }
0x3252   :  { %v5412_v47 = vsel %vm1097_vm7, %v5402_v46, %v5411_v53  ;;  %v10977_v46 = vld [vmem:[#allocation41_spill] sm:$0xff] }
0x3253   :  { %v5413_v31 = vsel %vm1099_vm8, %v5406_v21, %v5412_v47 }
0x3254   :  { %v5415_v41 = vsel %vm1102_vm9, %v5413_v31, -inf  ;;  %v10978_v31 = vld [vmem:[#allocation44_spill] sm:$0xff] }
0x3255   :  { %5416 = vmax.xlane.f32.xlu1 %v5415_v41 }
0x32de   :  { %v5417_v60 = vpop.xlane.xlu1 %5416 }
0x32df   :  { %v5422_v23 = vrot.slane %v5417_v60, %v8939_v36  ;;  %v5426_v4 = vrot.slane %v5417_v60, %v10974_v50  ;;  %v5430_v3 = vrot.slane %v5417_v60, %v10975_v11  ;;  %v5434_v13 = vrot.slane %v5417_v60, %v10976_v34 }
0x32e0   :  { %v5438_v21 = vrot.slane %v5417_v60, %v10977_v46  ;;  %v5442_v41 = vrot.slane %v5417_v60, %v10978_v31  ;;  %v5446_v40 = vrot.slane %v5417_v60, %v10979_v1 }
0x32e1   :  { %v5459_v57 = vsub.f32 %v5335_v62, %v5422_v23  ;;  %v5460_v38 = vsub.f32 %v5336_v0, %v5426_v4  ;;  %v5461_v20 = vsub.f32 %v5337_v8, %v5430_v3  ;;  %v5462_v53 = vsub.f32 %v5338_v42, %v5434_v13  ;;  %v10980_v8 = vld [vmem:[#allocation50_spill] sm:$0xff] }
0x32e2   :  { %v5463_v5 = vsub.f32 %v5339_v26, %v5438_v21  ;;  %v5464_v62 = vsub.f32 %v5340_v7, %v5442_v41  ;;  %v5450_v4 = vrot.slane %v5417_v60, %v10980_v8  ;;  %v5465_v3 = vsub.f32 %v5341_v44, %v5446_v40 }
0x32e3   :  { %v5467_v37 = vmul.f32 1.442695, %v5459_v57  ;;  %v5469_v27 = vmul.f32 1.442695, %v5460_v38  ;;  %v5471_v47 = vmul.f32 1.442695, %v5461_v20 }
0x32e4   :  { %v5473_v30 = vmul.f32 1.442695, %v5462_v53  ;;  %v5475_v0 = vmul.f32 1.442695, %v5463_v5  ;;  %v5477_v42 = vmul.f32 1.442695, %v5464_v62  ;;  %v5466_v26 = vsub.f32 %v5342_v16, %v5450_v4 }
0x32e5   :  { %8077 = vpow2.f32 %v5467_v37  ;;  %v5479_v38 = vmul.f32 1.442695, %v5465_v3 }
0x32e6   :  { %8079 = vpow2.f32 %v5469_v27  ;;  %v5481_v7 = vmul.f32 1.442695, %v5466_v26 }
0x32e7   :  { %8081 = vpow2.f32 %v5471_v47 }
0x32e8   :  { %8083 = vpow2.f32 %v5473_v30 }
0x32e9   :  { %8085 = vpow2.f32 %v5475_v0 }
0x32ea   :  { %8087 = vpow2.f32 %v5477_v42 }
0x32eb   :  { %8089 = vpow2.f32 %v5479_v38 }
0x32ec   :  { %8091 = vpow2.f32 %v5481_v7 }
0x32f2   :  { %v10381_v23 = vpop.eup %8077 }
0x32f3   :  { %5492 = vperm.xlu0 %7859, %v10381_v23   ;;  %v10385_v57 = vpop.eup %8079 }
0x32f4   :  { %v10388_v37 = vpop.eup %8081 }
0x32f5   :  { %v10391_v30 = vpop.eup %8083 }
0x32f6   :  { %v10394_v40 = vpop.eup %8085 }
0x32f7   :  { %5495 = vperm.xlu0 %7859, %v10385_v57   ;;  %v8088_v5 = vpop.eup %8087 }
0x32f8   :  { %v10397_v16 = vpop.eup %8089 }
0x32f9   :  { %v10400_v44 = vpop.eup %8091 }
0x32fb   :  { %5498 = vperm.xlu0 %7859, %v10388_v37  }
0x32ff   :  { %5501 = vperm.xlu0 %7859, %v10391_v30  }
0x3303   :  { %5504 = vperm.xlu0 %7859, %v10394_v40  }
0x3307   :  { %5507 = vperm.xlu0 %7859, %v8088_v5  }
0x330b   :  { %5510 = vperm.xlu0 %7859, %v10397_v16  }
0x330f   :  { %5513 = vperm.xlu0 %7859, %v10400_v44  }
0x336e   :  { %v5493_v60 = vpop.permute.xlu0 %5492 }
0x336f   :  { %v5518_v62 = vrot.slane %v5493_v60, %v10946_v15 }
0x3372   :  { %v5496_v13 = vpop.permute.xlu0 %5495 }
0x3373   :  { %v5522_v47 = vrot.slane %v5496_v13, %v10946_v15 }
0x3375   :  { %v5547_v42 = vsel %vm1087_vm2, %v5522_v47, %v5518_v62 }
0x3376   :  { %v5499_v20 = vpop.permute.xlu0 %5498 }
0x3377   :  { %v5526_v41 = vrot.slane %v5499_v20, %v10946_v15 }
0x3379   :  { %v5548_v38 = vsel %vm1089_vm3, %v5526_v41, %v5547_v42 }
0x337a   :  { %v5502_v27 = vpop.permute.xlu0 %5501 }
0x337b   :  { %v5530_v0 = vrot.slane %v5502_v27, %v10946_v15 }
0x337d   :  { %v5549_v54 = vsel %vm1091_vm4, %v5530_v0, %v5548_v38 }
0x337e   :  { %v5505_v21 = vpop.permute.xlu0 %5504 }
0x337f   :  { %v5534_v4 = vrot.slane %v5505_v21, %v10946_v15 }
0x3381   :  { %v5550_v13 = vsel %vm1093_vm5, %v5534_v4, %v5549_v54 }
0x3382   :  { %v5508_v53 = vpop.permute.xlu0 %5507 }
0x3383   :  { %v5538_v26 = vrot.slane %v5508_v53, %v10946_v15 }
0x3385   :  { %v5551_v60 = vsel %vm1095_vm6, %v5538_v26, %v5550_v13 }
0x3386   :  { %v5511_v3 = vpop.permute.xlu0 %5510 }
0x3387   :  { %v5542_v7 = vrot.slane %v5511_v3, %v10946_v15 }
0x3389   :  { %v5552_v21 = vsel %vm1097_vm7, %v5542_v7, %v5551_v60 }
0x338a   :  { %v5514_v20 = vpop.permute.xlu0 %5513 }
0x338b   :  { %v5546_v27 = vrot.slane %v5514_v20, %v10946_v15 }
0x338d   :  { %v5553_v61 = vsel %vm1099_vm8, %v5546_v27, %v5552_v21 }
0x338e   :  { %v5555_v47 = vsel %vm1102_vm9, %v5553_v61, 0.0 }
0x338f   :  { %5556 = vadd.xlane.f32.xlu0 %v5555_v47 }
0x3418   :  { %v5557_v53 = vpop.xlane.xlu0 %5556 }
0x3419   :  { %v5562_v41 = vrot.slane %v5557_v53, %v8939_v36  ;;  %v5566_v62 = vrot.slane %v5557_v53, %v10974_v50  ;;  %v5582_v54 = vrot.slane %v5557_v53, %v10978_v31  ;;  %v5570_v0 = vrot.slane %v5557_v53, %v10975_v11 }
0x341a   :  { %v5574_v4 = vrot.slane %v5557_v53, %v10976_v34  ;;  %v5578_v3 = vrot.slane %v5557_v53, %v10977_v46  ;;  %v5586_v42 = vrot.slane %v5557_v53, %v10979_v1  ;;  %v5590_v13 = vrot.slane %v5557_v53, %v10980_v8  ;;  %v10479_v8 = vld [vmem:[%s10897_s29 + $0x30] sm:$0xff] }
0x341b   :  { %8093 = vrcp.f32 %v5562_v41  ;;  %10984 = vst [vmem:[#allocation48_spill] sm:$0xff] %v10479_v8 }
0x341c   :  { %8095 = vrcp.f32 %v5566_v62 }
0x341d   :  { %8097 = vrcp.f32 %v5582_v54 }
0x341e   :  { %8099 = vrcp.f32 %v5570_v0 }
0x341f   :  { %8101 = vrcp.f32 %v5574_v4 }
0x3420   :  { %8103 = vrcp.f32 %v5578_v3 }
0x3421   :  { %8105 = vrcp.f32 %v5586_v42  ;;  %v10451_v42 = vld [vmem:[%s10897_s29 + $0x28] sm:$0xff] }
0x3422   :  { %8107 = vrcp.f32 %v5590_v13  ;;  %10981 = vst [vmem:[#allocation36_spill] sm:$0xff] %v10451_v42  ;;  %v10457_v13 = vld [vmem:[%s10897_s29 + $0x10] sm:$0xff] }
0x3423   :  { %10982 = vst [vmem:[#allocation35_spill] sm:$0xff] %v10457_v13 }
0x3428   :  { %v8094_v61 = vpop.eup %8093 }
0x3429   :  { %v5600_v26 = vmul.f32 %v8094_v61, %v10381_v23  ;;  %v8096_v38 = vpop.eup %8095 }
0x342a   :  { %v8098_v7 = vpop.eup %8097  ;;  %v5602_v20 = vmul.f32 %v8096_v38, %v10385_v57 }
0x342b   :  { %5617 = vperm.xlu1 %7860, %v5600_v26   ;;  %v8100_v60 = vpop.eup %8099  ;;  %v5610_v27 = vmul.f32 %v8098_v7, %v8088_v5 }
0x342c   :  { %v5604_v21 = vmul.f32 %v8100_v60, %v10388_v37  ;;  %v8102_v47 = vpop.eup %8101  ;;  %v10437_v37 = vld [vmem:[%s10897_s29] sm:$0xff] }
0x342d   :  { %5642 = vperm.xlu0 %7859, %v5610_v27   ;;  %v5606_v41 = vmul.f32 %v8102_v47, %v10391_v30  ;;  %v8104_v23 = vpop.eup %8103 }
0x342e   :  { %v5608_v62 = vmul.f32 %v8104_v23, %v10394_v40  ;;  %v8106_v54 = vpop.eup %8105  ;;  %v10443_v40 = vld [vmem:[%s10897_s29 + $0x8] sm:$0xff] }
0x342f   :  { %5622 = vperm.xlu1 %7860, %v5602_v20   ;;  %v5612_v53 = vmul.f32 %v8106_v54, %v10397_v16  ;;  %v8108_v57 = vpop.eup %8107 }
0x3430   :  { %v5614_v5 = vmul.f32 %v8108_v57, %v10400_v44 }
0x3433   :  { %5627 = vperm.xlu1 %7860, %v5604_v21  }
0x3437   :  { %5632 = vperm.xlu1 %7860, %v5606_v41  }
0x343b   :  { %5637 = vperm.xlu1 %7860, %v5608_v62   ;;  %v10465_v62 = vld [vmem:[%s10897_s29 + $0x18] sm:$0xff] }
0x343f   :  { %5647 = vperm.xlu1 %7860, %v5612_v53  }
0x3443   :  { %5652 = vperm.xlu1 %7860, %v5614_v5  }
0x34a6   :  { %v5618_v0 = vpop.permute.xlu1 %5617 }
0x34a7   :  { %v5655_v30 = vmul.f32 %v10437_v37, %v5618_v0 }
0x34a8   :  { %v5643_v3 = vpop.permute.xlu0 %5642 }
0x34a9   :  { %v5663_v44 = vsel %vm271_vm1, %v5655_v30, 0.0  ;;  %v5660_v26 = vmul.f32 %v10451_v42, %v5643_v3 }
0x34aa   :  { %v5623_v4 = vpop.permute.xlu1 %5622  ;;  %v5664_v60 = vrot.slane %v5663_v44, 4 }
0x34ab   :  { %v5656_v16 = vmul.f32 %v10443_v40, %v5623_v4  ;;  %v5698_v21 = vsel %vm271_vm1, %v5660_v26, 0.0 }
0x34ac   :  { %v5665_v53 = vadd.f32 %v5664_v60, %v5663_v44  ;;  %v5699_v5 = vrot.slane %v5698_v21, 4 }
0x34ad   :  { %v5670_v61 = vsel %vm271_vm1, %v5656_v16, 0.0 }
0x34ae   :  { %v5671_v38 = vrot.slane %v5670_v61, 4  ;;  %v5628_v7 = vpop.permute.xlu1 %5627 }
0x34af   :  { %v5657_v20 = vmul.f32 %v10457_v13, %v5628_v7 }
0x34b0   :  { %v5672_v47 = vadd.f32 %v5671_v38, %v5670_v61  ;;  %v10472_v61 = vld [vmem:[%s10897_s29 + $0x20] sm:$0xff]  ;;  %v5666_v38 = vrot.slane %v5665_v53, 2 }
0x34b1   :  { %v5677_v27 = vsel %vm271_vm1, %v5657_v20, 0.0  ;;  %10983 = vst [vmem:[#allocation39_spill] sm:$0xff] %v10472_v61  ;;  %v5700_v20 = vadd.f32 %v5699_v5, %v5698_v21 }
0x34b2   :  { %v5678_v41 = vrot.slane %v5677_v27, 4  ;;  %v5633_v23 = vpop.permute.xlu1 %5632  ;;  %v5673_v30 = vrot.slane %v5672_v47, 2  ;;  %v5667_v31 = vadd.f32 %v5666_v38, %v5665_v53 }
0x34b3   :  { %v5658_v54 = vmul.f32 %v10465_v62, %v5633_v23  ;;  %v5701_v34 = vrot.slane %v5700_v20, 2 }
0x34b4   :  { %v5679_v57 = vadd.f32 %v5678_v41, %v5677_v27  ;;  %v5674_v60 = vadd.f32 %v5673_v30, %v5672_v47 }
0x34b5   :  { %v5684_v0 = vsel %vm271_vm1, %v5658_v54, 0.0 }
0x34b6   :  { %v5685_v4 = vrot.slane %v5684_v0, 4  ;;  %v5638_v3 = vpop.permute.xlu1 %5637  ;;  %v5680_v16 = vrot.slane %v5679_v57, 2  ;;  %v5675_v5 = vrot.slane %v5674_v60, 1 }
0x34b7   :  { %v5659_v26 = vmul.f32 %v10472_v61, %v5638_v3 }
0x34b8   :  { %v5686_v7 = vadd.f32 %v5685_v4, %v5684_v0  ;;  %v5681_v54 = vadd.f32 %v5680_v16, %v5679_v57  ;;  %v10486_v57 = vld [vmem:[%s10897_s29 + $0x38] sm:$0xff] }
0x34b9   :  { %v5691_v44 = vsel %vm271_vm1, %v5659_v26, 0.0  ;;  %10985 = vst [vmem:[#allocation46_spill] sm:$0xff] %v10486_v57  ;;  %v5668_v26 = vrot.slane %v5667_v31, 1 }
0x34ba   :  { %v5687_v27 = vrot.slane %v5686_v7, 2  ;;  %v5692_v41 = vrot.slane %v5691_v44, 4  ;;  %v5648_v23 = vpop.permute.xlu1 %5647  ;;  %v5682_v4 = vrot.slane %v5681_v54, 1 }
0x34bb   :  { %v5661_v1 = vmul.f32 %v10479_v8, %v5648_v23  ;;  %v5669_v15 = vadd.f32 %v5668_v26, %v5667_v31 }
0x34bc   :  { %v5688_v46 = vadd.f32 %v5687_v27, %v5686_v7  ;;  %v5693_v3 = vadd.f32 %v5692_v41, %v5691_v44  ;;  %v5702_v7 = vadd.f32 %v5701_v34, %v5700_v20  ;;  %v5683_v50 = vadd.f32 %v5682_v4, %v5681_v54 }
0x34bd   :  { %v5705_v21 = vsel %vm271_vm1, %v5661_v1, 0.0  ;;  %v5676_v1 = vadd.f32 %v5675_v5, %v5674_v60 }
0x34be   :  { %v5694_v0 = vrot.slane %v5693_v3, 2  ;;  %v5706_v47 = vrot.slane %v5705_v21, 4  ;;  %v5653_v30 = vpop.permute.xlu1 %5652  ;;  %v5689_v23 = vrot.slane %v5688_v46, 1  ;;  %v5703_v42 = vrot.slane %v5702_v7, 1 }
0x34bf   :  { %v5662_v16 = vmul.f32 %v10486_v57, %v5653_v30  ;;  %v5797_v30 = vsel %vm1087_vm2, %v5676_v1, %v5669_v15  ;;  %v8245_v15 = vld [vmem:[#allocation13 + $0x18] sm:$0xff] }
0x34c0   :  { %v5695_v53 = vadd.f32 %v5694_v0, %v5693_v3  ;;  %v5707_v38 = vadd.f32 %v5706_v47, %v5705_v21  ;;  %v5690_v9 = vadd.f32 %v5689_v23, %v5688_v46  ;;  %v5798_v3 = vsel %vm1089_vm3, %v5683_v50, %v5797_v30  ;;  %v8248_v50 = vld [vmem:[#allocation13] sm:$0xff] }
0x34c1   :  { %v5712_v44 = vsel %vm271_vm1, %v5662_v16, 0.0  ;;  %v5704_v5 = vadd.f32 %v5703_v42, %v5702_v7 }
0x34c2   :  { %v5696_v27 = vrot.slane %v5695_v53, 1  ;;  %v5708_v41 = vrot.slane %v5707_v38, 2  ;;  %v5713_v11 = vrot.slane %v5712_v44, 4  ;;  %v5799_v34 = vsel %vm1091_vm4, %v5690_v9, %v5798_v3  ;;  %v8246_v9 = vld [vmem:[#allocation13 + $0x10] sm:$0xff] }
0x34c4   :  { %v5709_v24 = vadd.f32 %v5708_v41, %v5707_v38  ;;  %v5714_v8 = vadd.f32 %v5713_v11, %v5712_v44  ;;  %v5697_v61 = vadd.f32 %v5696_v27, %v5695_v53 }
0x34c6   :  { %v5710_v57 = vrot.slane %v5709_v24, 1  ;;  %v5715_v13 = vrot.slane %v5714_v8, 2  ;;  %v5800_v60 = vsel %vm1093_vm5, %v5697_v61, %v5799_v34 }
0x34c7   :  { %v5801_v46 = vsel %vm1095_vm6, %v5704_v5, %v5800_v60 }
0x34c8   :  { %v5716_v20 = vadd.f32 %v5715_v13, %v5714_v8  ;;  %v5711_v21 = vadd.f32 %v5710_v57, %v5709_v24  ;;  %v8247_v24 = vld [vmem:[#allocation13 + $0x8] sm:$0xff] }
0x34ca   :  { %v5717_v54 = vrot.slane %v5716_v20, 1  ;;  %v5802_v11 = vsel %vm1097_vm7, %v5711_v21, %v5801_v46 }
0x34cc   :  { %v5718_v31 = vadd.f32 %v5717_v54, %v5716_v20 }
0x34ce   :  { %v5803_v0 = vsel %vm1099_vm8, %v5718_v31, %v5802_v11 }
0x34cf   :  { %7756 = vmatmul.mubr.msk.f32.vlgmr.msra.gmra.mxu0 %vm271_vm1, %v5803_v0 }
0x34d0   :  { %7770 = vmatpush3.msra.mxu0 %v8245_v15  ;;  %7777 = vmatprep.mubr.msk.f32.mxu0 %vm8584_vm0, %v10914_v12 }
0x34d1   :  { %7771 = vmatprep.subr.mxu0 %v10914_v12 }
0x34d2   :  { %7772 = vmatpush3.msra.mxu0 %v8246_v9 }
0x34d3   :  { %7773 = vmatprep.subr.mxu0 %v10914_v12 }
0x34d4   :  { %7774 = vmatpush3.msra.mxu0 %v8247_v24 }
0x34d5   :  { %7775 = vmatprep.subr.mxu0 %v10914_v12 }
0x34d6   :  { %7776 = vmatpush3.msra.mxu0 %v8248_v50 }
0x34d7   :  { %7778 = vmatmul.mubr.msk.f32.vlgmr.msra.gmra.mxu0 %vm271_vm1, %v10253_v48  ;;  %7791 = vmatprep.subr.mxu0 %v10914_v12 }
0x34d8   :  { %7792 = vmatpush3.msra.mxu0 %v10172_v59  ;;  %7799 = vmatprep.mubr.msk.f32.mxu0 %vm8584_vm0, %v10914_v12 }
0x34d9   :  { %7793 = vmatprep.subr.mxu0 %v10914_v12 }
0x34da   :  { %7794 = vmatpush3.msra.mxu0 %v10181_v18  ;;  %v8249_v18 = vld [vmem:[#allocation14] ss:$0 sm:$0xff] }
0x34db   :  { %7795 = vmatprep.subr.mxu0 %v10914_v12 }
0x34dc   :  { %7796 = vmatpush3.msra.mxu0 %v10188_v51  ;;  %v10986_v51 = vld [vmem:[#allocation37_spill] sm:$0xff] }
0x34dd   :  { %7797 = vmatprep.subr.mxu0 %v10914_v12 }
0x34de   :  { %7798 = vmatpush3.msra.mxu0 %v10195_v63  ;;  %v382_v63 = vadd.f32 %v8249_v18, %v10986_v51 }
0x34df   :  { %7813 = vmatprep.subr.mxu0 %v10914_v12 }
0x358f   :  { %v5872_v48 = vpop.f32.mrf.mxu0 }
0x3590   :  { %v5873_v59 = vadd.f32 %v5872_v48, %v10318_v56 }
0x3591   :  { %v7757_v8 = vpop.f32.mrf.mxu0 }
0x3592   :  { %8109 = vtanh.f32 %v5873_v59 }
0x3597   :  { %v6017_v42 = vpop.f32.mrf.mxu0 }
0x3599   :  { %v7779_v13 = vpop.f32.mrf.mxu0 }
0x359f   :  { %v8110_v61 = vpop.eup %8109 }
0x35a0   :  { %6959 = vst.msk [vmem:[%s10783_s16 + $0x20] sm:$0xff] %vm271_vm1, %v8110_v61  ;;  %7767 = vmatmul.mubr.msk.f32.vlgmr.msra.gmra.mxu1 %vm271_vm1, %v8110_v61 }
0x35a1   :  { %7781 = vmatpush3.msra.mxu1 %v10205_v55  ;;  %7788 = vmatprep.mubr.msk.f32.mxu1 %vm8584_vm0, %v10914_v12 }
0x35a2   :  { %7782 = vmatprep.subr.mxu1 %v10914_v12 }
0x35a3   :  { %7783 = vmatpush3.msra.mxu1 %v10211_v58 }
0x35a4   :  { %7784 = vmatprep.subr.mxu1 %v10914_v12 }
0x35a5   :  { %7785 = vmatpush3.msra.mxu1 %v10215_v25 }
0x35a6   :  { %7786 = vmatprep.subr.mxu1 %v10914_v12 }
0x35a7   :  { %7787 = vmatpush3.msra.mxu1 %v10219_v14 }
0x35a8   :  { %7789 = vmatmul.mubr.msk.f32.vlgmr.msra.gmra.mxu1 %vm271_vm1, %v10284_v6  ;;  %7802 = vmatprep.subr.mxu1 %v10914_v12 }
0x35a9   :  { %7803 = vmatpush3.msra.mxu1 %v10225_v35  ;;  %7810 = vmatprep.mubr.msk.f32.mxu1 %vm8584_vm0, %v10914_v12 }
0x35aa   :  { %7804 = vmatprep.subr.mxu1 %v10914_v12 }
0x35ab   :  { %7805 = vmatpush3.msra.mxu1 %v10231_v39 }
0x35ac   :  { %7806 = vmatprep.subr.mxu1 %v10914_v12 }
0x35ad   :  { %7807 = vmatpush3.msra.mxu1 %v10235_v2 }
0x35ae   :  { %7808 = vmatprep.subr.mxu1 %v10914_v12 }
0x35af   :  { %7809 = vmatpush3.msra.mxu1 %v10239_v49 }
0x35b0   :  { %7824 = vmatprep.subr.mxu1 %v10914_v12 }
0x3660   :  { %v5946_v55 = vpop.f32.mrf.mxu1 }
0x3661   :  { %v5950_v58 = vadd.f32 %v5946_v55, %v382_v63 }
0x3662   :  { %v7768_v25 = vpop.f32.mrf.mxu1 }
0x3663   :  { %v6021_v14 = vadd.f32 %v6017_v42, %v5950_v58 }
0x3665   :  { %8111 = vtanh.f32 %v6021_v14  ;;  %v7129_v2 = vmul.f32 -1.442695, %v6021_v14 }
0x3667   :  { %8113 = vpow2.f32 %v7129_v2  ;;  %v10987_v2 = vld [vmem:[#allocation35_spill] sm:$0xff] }
0x3668   :  { %v6112_v35 = vpop.f32.mrf.mxu1 }
0x366a   :  { %v7790_v39 = vpop.f32.mrf.mxu1 }
0x3672   :  { %v8112_v6 = vpop.eup %8111 }
0x3673   :  { %6031 = vrot.lane.b32.xlu1 %v8112_v6, %s8585_s4 }
0x3674   :  { %v8114_v56 = vpop.eup %8113 }
0x3675   :  { %v6025_v47 = vadd.f32 1.0, %v8114_v56 }
0x3677   :  { %8115 = vrcp.f32 %v6025_v47 }
0x3684   :  { %v8116_v49 = vpop.eup %8115 }
0x3685   :  { %v6029_v16 = vmul.f32 %v8116_v49, %v10248_v33 }
0x36e5   :  { %v6032_v4 = vpop.permute.xlu1 %6031 }
0x36e6   :  { %v6034_v57 = vmul.f32 %v8116_v49, %v6032_v4 }
0x36e8   :  { %6036 = vrot.lane.b32.xlu1 %v6034_v57, %s8586_s0 }
0x375a   :  { %v6037_v26 = vpop.permute.xlu1 %6036 }
0x375b   :  { %v10548_v23 = vadd.f32 %v6037_v26, %v6029_v16  ;;  %v10989_v26 = vld [vmem:[#allocation39_spill] sm:$0xff] }
0x375d   :  { %8117 = vtanh.f32 %v10548_v23 }
0x376a   :  { %v8118_v53 = vpop.eup %8117 }
0x376b   :  { %6042 = vrot.lane.b32.xlu1 %v8118_v53, %s8585_s4 }
0x37dd   :  { %v6043_v38 = vpop.permute.xlu1 %6042 }
0x37de   :  { %v6045_v7 = vmul.f32 %v8116_v49, %v6043_v38  ;;  %v10988_v49 = vld [vmem:[#allocation36_spill] sm:$0xff] }
0x37e0   :  { %6117 = vrot.lane.b32.xlu0 %v6045_v7, %s8586_s0 }
0x3852   :  { %v6118_v44 = vpop.permute.xlu0 %6117 }
0x3853   :  { %7003 = vst.msk [vmem:[#allocation23] sm:$0xff] %vm271_vm1, %v6118_v44  ;;  %7800 = vmatmul.mubr.msk.f32.vlgmr.msra.gmra.mxu0 %vm271_vm1, %v6118_v44  ;;  %v10990_v44 = vld [vmem:[#allocation46_spill] sm:$0xff] }
0x3854   :  { %7814 = vmatpush3.msra.mxu0 %v10257_v45  ;;  %7821 = vmatprep.mubr.msk.f32.mxu0 %vm8584_vm0, %v10914_v12  ;;  %v8250_v45 = vld [vmem:[%s10779_s12] ss:$0 sm:$0xff]  ;;  %s8589_s12 = smov 96  }
0x3855   :  { %7815 = vmatprep.subr.mxu0 %v10914_v12 }
0x3856   :  { %7816 = vmatpush3.msra.mxu0 %v10263_v28 }
0x3857   :  { %7817 = vmatprep.subr.mxu0 %v10914_v12 }
0x3858   :  { %7818 = vmatpush3.msra.mxu0 %v10267_v29 }
0x3859   :  { %7819 = vmatprep.subr.mxu0 %v10914_v12 }
0x385a   :  { %7820 = vmatpush3.msra.mxu0 %v10271_v52 }
0x3913   :  { %v6187_v33 = vpop.f32.mrf.mxu0 }
0x3914   :  { %v6188_v1 = vadd.f32 %v6187_v33, %v6112_v35 }
0x3915   :  { %v7801_v27 = vpop.f32.mrf.mxu0 }
0x3916   :  { %v6191_v41 = vadd.f32 %v8250_v45, %v6188_v1  ;;  %v10991_v27 = vld [vmem:[#allocation48_spill] sm:$0xff] }
0x3918   :  { %8119 = vtanh.f32 %v6191_v41  ;;  %v7132_v28 = vmul.f32 -1.442695, %v6191_v41 }
0x391a   :  { %8121 = vpow2.f32 %v7132_v28 }
0x3925   :  { %v8120_v30 = vpop.eup %8119 }
0x3926   :  { %6201 = vrot.lane.b32.xlu1 %v8120_v30, %s8585_s4 }
0x3927   :  { %v8122_v3 = vpop.eup %8121 }
0x3928   :  { %v6195_v29 = vadd.f32 1.0, %v8122_v3  ;;  %v10992_v3 = vld [vmem:[#allocation52_spill] sm:$0xff] }
0x392a   :  { %8123 = vrcp.f32 %v6195_v29 }
0x3937   :  { %v8124_v34 = vpop.eup %8123 }
0x3938   :  { %v6199_v60 = vmul.f32 %v8124_v34, %v10279_v19 }
0x3998   :  { %v6202_v20 = vpop.permute.xlu1 %6201 }
0x3999   :  { %v6204_v52 = vmul.f32 %v8124_v34, %v6202_v20  ;;  %v10993_v20 = vld [vmem:[#allocation54_spill] sm:$0xff] }
0x399b   :  { %6206 = vrot.lane.b32.xlu0 %v6204_v52, %s8586_s0 }
0x3a0d   :  { %v6207_v21 = vpop.permute.xlu0 %6206 }
0x3a0e   :  { %v10570_v5 = vadd.f32 %v6207_v21, %v6199_v60  ;;  %v10994_v21 = vld [vmem:[#allocation55_spill] sm:$0xff] }
0x3a10   :  { %8125 = vtanh.f32 %v10570_v5 }
0x3a1d   :  { %v8126_v54 = vpop.eup %8125 }
0x3a1e   :  { %6212 = vrot.lane.b32.xlu1 %v8126_v54, %s8585_s4  ;;  %s8590_s4 = smov [#allocation23]  }
0x3a90   :  { %v6213_v31 = vpop.permute.xlu1 %6212 }
0x3a91   :  { %v6215_v46 = vmul.f32 %v8124_v34, %v6213_v31 }
0x3a93   :  { %6217 = vrot.lane.b32.xlu0 %v6215_v46, %s8586_s0  ;;  %v10995_v46 = vld [vmem:[#allocation53_spill] sm:$0xff]  ;;  %s7035_s0 = sshll.u32 %s8590_s4, 4  ;;  %s7036_s0 = int_to_ptr.vmem [resolvable:$true] %s7035_s0 }
0x3a94   :  { %s8491_s10 = scalar_lea.vmem %s7036_s0, 256  ;;  %p8496_p5 = scmp.lt.s32.totalorder %s7036_s0, %s7036_s0 }
0x3a95   :  { %p8492_p4 = scmp.ne.s32.totalorder %s7036_s0, %s8491_s10  ;;  %p8497_p6 = scmp.lt.s32.totalorder %s8491_s10, %s8491_s10 }
0x3a97   :  { %p8498_p7 = por %p8497_p6, %p8496_p5 }
0x3a99   :  { %p8499_p8 = pnand %p8498_p7, %p8492_p4 }
0x3b05   :  { %v6218_v11 = vpop.permute.xlu0 %6217 }
0x3b06   :  { %7006 = vst.msk [vmem:[#allocation23 + $0x8] sm:$0xff] %vm271_vm1, %v6218_v11  ;;  %7811 = vmatmul.mubr.msk.f32.vlgmr.msra.gmra.mxu1 %vm271_vm1, %v6218_v11  ;;  %7822 = vmatmul.mubr.msk.f32.vlgmr.msra.gmra.mxu0 %vm271_vm1, %v6218_v11 }
0x3b07   :  { %7825 = vmatpush3.msra.mxu1 %v10290_v17  ;;  %7832 = vmatprep.mubr.msk.f32.mxu1 %vm8584_vm0, %v10914_v12 }
0x3b08   :  { %7826 = vmatprep.subr.mxu1 %v10914_v12 }
0x3b09   :  { %7827 = vmatpush3.msra.mxu1 %v10297_v10 }
0x3b0a   :  { %7828 = vmatprep.subr.mxu1 %v10914_v12 }
0x3b0b   :  { %7829 = vmatpush3.msra.mxu1 %v10303_v43 }
0x3b0c   :  { %7830 = vmatprep.subr.mxu1 %v10914_v12 }
0x3b0d   :  { %7831 = vmatpush3.msra.mxu1 %v10309_v32 }
0x3bc6   :  { %v6287_v19 = vpop.f32.mrf.mxu1  ;;  %v10587_v0 = vpop.f32.mrf.mxu0 }
0x3bc7   :  { %v6292_v15 = vcombine.high %v6287_v19, %v6287_v19  ;;  %v6299_v17 = vrot.slane %v6287_v19, %v10960_v22 }
0x3bc8   :  { %v7812_v9 = vpop.f32.mrf.mxu1  ;;  %v7823_v24 = vpop.f32.mrf.mxu0 }
0x3bc9   :  { %v6306_v50 = vrot.slane %v6292_v15, %v10960_v22  ;;  %v6307_v48 = vcombine.high %v6299_v17, %v6299_v17  ;;  %v6315_v10 = vrot.slane %v6299_v17, %v10960_v22  ;;  %v10996_v15 = vld [vmem:[#allocation57_spill] sm:$0xff]  ;;  %v10997_v24 = vld [vmem:[#allocation56_spill] sm:$0xff] }
0x3bcb   :  { %v6308_v59 = vcombine.high %v6306_v50, %v6306_v50  ;;  %v6329_v43 = vrot.slane %v6307_v48, %v10960_v22  ;;  %v6337_v8 = vcombine.high %v6315_v10, %v6315_v10  ;;  %v6322_v12 = vrot.slane %v6306_v50, %v10960_v22 }
0x3bcc   :  { %v6344_v32 = vrot.slane %v6315_v10, %v8939_v36  ;;  %v10998_v10 = vld [vmem:[#allocation58_spill] sm:$0xff] }
0x3bcd   :  { %v6348_v42 = vrot.slane %v6329_v43, %v8939_v36  ;;  %v6339_v13 = vcombine.high %v6329_v43, %v6329_v43  ;;  %v6352_v61 = vrot.slane %v6337_v8, %v8939_v36  ;;  %v6336_v18 = vrot.slane %v6308_v59, %v10960_v22  ;;  %v10999_v8 = vld [vmem:[#allocation59_spill] sm:$0xff] }
0x3bce   :  { %v6381_v51 = vmul.f32 %v10437_v37, %v6344_v32  ;;  %v6360_v14 = vrot.slane %v6322_v12, %v8939_v36  ;;  %v6338_v56 = vcombine.high %v6322_v12, %v6322_v12 }
0x3bcf   :  { %v6382_v63 = vmul.f32 %v10443_v40, %v6348_v42  ;;  %v6356_v55 = vrot.slane %v6339_v13, %v8939_v36  ;;  %v6364_v25 = vrot.slane %v6336_v18, %v8939_v36  ;;  %v6340_v35 = vcombine.high %v6336_v18, %v6336_v18  ;;  %v11000_v13 = vld [vmem:[#allocation60_spill] sm:$0xff] }
0x3bd0   :  { %v6389_v58 = vsel %vm271_vm1, %v6381_v51, 0.0  ;;  %v6383_v22 = vmul.f32 %v10987_v2, %v6352_v61  ;;  %v6385_v53 = vmul.f32 %v10989_v26, %v6360_v14  ;;  %v6368_v38 = vrot.slane %v6338_v56, %v8939_v36 }
0x3bd1   :  { %6390 = vadd.xlane.f32.xlu1 %v6389_v58  ;;  %v6392_v39 = vsel %vm271_vm1, %v6382_v63, 0.0  ;;  %v6384_v6 = vmul.f32 %v10465_v62, %v6356_v55  ;;  %v6386_v4 = vmul.f32 %v10988_v49, %v6364_v25  ;;  %v6372_v57 = vrot.slane %v6340_v35, %v8939_v36 }
0x3bd2   :  { %6393 = vadd.xlane.f32.xlu0 %v6392_v39  ;;  %v6395_v16 = vsel %vm271_vm1, %v6383_v22, 0.0  ;;  %v6401_v1 = vsel %vm271_vm1, %v6385_v53, 0.0  ;;  %v6387_v45 = vmul.f32 %v10991_v27, %v6368_v38 }
0x3bd3   :  { %v6398_v47 = vsel %vm271_vm1, %v6384_v6, 0.0  ;;  %v6404_v7 = vsel %vm271_vm1, %v6386_v4, 0.0  ;;  %v6388_v33 = vmul.f32 %v10990_v44, %v6372_v57 }
0x3bd4   :  { %v6407_v30 = vsel %vm271_vm1, %v6387_v45, 0.0 }
0x3bd5   :  { %6399 = vadd.xlane.f32.xlu1 %v6398_v47  ;;  %v6410_v41 = vsel %vm271_vm1, %v6388_v33, 0.0 }
0x3bd6   :  { %6396 = vadd.xlane.f32.xlu0 %v6395_v16 }
0x3bd9   :  { %6405 = vadd.xlane.f32.xlu1 %v6404_v7 }
0x3bda   :  { %6402 = vadd.xlane.f32.xlu0 %v6401_v1 }
0x3bdd   :  { %6411 = vadd.xlane.f32.xlu1 %v6410_v41 }
0x3bde   :  { %6408 = vadd.xlane.f32.xlu0 %v6407_v30  ;;  %v11001_v30 = vld [vmem:[#allocation40_spill] sm:$0xff] }
0x3c5a   :  { %v6391_v28 = vpop.xlane.xlu1 %6390 }
0x3c5b   :  { %v6413_v29 = vadd.f32 %v6391_v28, %v10992_v3  ;;  %v6394_v34 = vpop.xlane.xlu0 %6393  ;;  %v11002_v3 = vld [vmem:[#allocation42_spill] sm:$0xff] }
0x3c5c   :  { %v6414_v52 = vadd.f32 %v6394_v34, %v10993_v20 }
0x3c5d   :  { %6430 = vperm.xlu0 %7859, %v6413_v29  }
0x3c5e   :  { %v6400_v60 = vpop.xlane.xlu1 %6399  ;;  %6433 = vperm.xlu1 %7860, %v6414_v52  }
0x3c5f   :  { %v6416_v54 = vadd.f32 %v6400_v60, %v10994_v21  ;;  %v6397_v31 = vpop.xlane.xlu0 %6396 }
0x3c60   :  { %v6415_v11 = vadd.f32 %v6397_v31, %v10995_v46  ;;  %v11003_v31 = vld [vmem:[#allocation43_spill] sm:$0xff] }
0x3c61   :  { %6439 = vperm.xlu0 %7859, %v6416_v54  }
0x3c62   :  { %v6406_v19 = vpop.xlane.xlu1 %6405  ;;  %6436 = vperm.xlu1 %7860, %v6415_v11  }
0x3c63   :  { %v6418_v17 = vadd.f32 %v6406_v19, %v10996_v15  ;;  %v6403_v9 = vpop.xlane.xlu0 %6402 }
0x3c64   :  { %v6417_v50 = vadd.f32 %v6403_v9, %v10997_v24  ;;  %v11004_v9 = vld [vmem:[#allocation41_spill] sm:$0xff] }
0x3c65   :  { %6445 = vperm.xlu0 %7859, %v6418_v17  }
0x3c66   :  { %v6412_v48 = vpop.xlane.xlu1 %6411  ;;  %6442 = vperm.xlu1 %7860, %v6417_v50  }
0x3c67   :  { %v6420_v59 = vadd.f32 %v6412_v48, %v10998_v10  ;;  %v6409_v43 = vpop.xlane.xlu0 %6408 }
0x3c68   :  { %v6419_v12 = vadd.f32 %v6409_v43, %v10999_v8  ;;  %v11005_v43 = vld [vmem:[#allocation44_spill] sm:$0xff] }
0x3c69   :  { %6451 = vperm.xlu0 %7859, %v6420_v59  }
0x3c6a   :  { %6448 = vperm.xlu1 %7860, %v6419_v12  }
0x3cd8   :  { %v6431_v32 = vpop.permute.xlu0 %6430 }
0x3cd9   :  { %v6434_v42 = vpop.permute.xlu1 %6433  ;;  %v6456_v51 = vrot.slane %v6431_v32, %v11000_v13 }
0x3cda   :  { %v6460_v61 = vrot.slane %v6434_v42, %v11000_v13 }
0x3cdc   :  { %v6440_v18 = vpop.permute.xlu0 %6439  ;;  %v6485_v58 = vsel %vm1087_vm2, %v6460_v61, %v6456_v51  ;;  %v11006_v61 = vld [vmem:[#allocation51_spill] sm:$0xff] }
0x3cdd   :  { %v6437_v63 = vpop.permute.xlu1 %6436  ;;  %v6468_v35 = vrot.slane %v6440_v18, %v11000_v13 }
0x3cde   :  { %v6464_v55 = vrot.slane %v6437_v63, %v11000_v13 }
0x3ce0   :  { %v6486_v25 = vsel %vm1089_vm3, %v6464_v55, %v6485_v58  ;;  %v6446_v14 = vpop.permute.xlu0 %6445 }
0x3ce1   :  { %v6443_v39 = vpop.permute.xlu1 %6442  ;;  %v6487_v22 = vsel %vm1091_vm4, %v6468_v35, %v6486_v25  ;;  %v6476_v4 = vrot.slane %v6446_v14, %v11000_v13 }
0x3ce2   :  { %v6472_v6 = vrot.slane %v6443_v39, %v11000_v13 }
0x3ce4   :  { %v6488_v56 = vsel %vm1093_vm5, %v6472_v6, %v6487_v22  ;;  %v6452_v47 = vpop.permute.xlu0 %6451 }
0x3ce5   :  { %v6449_v57 = vpop.permute.xlu1 %6448  ;;  %v6484_v53 = vrot.slane %v6452_v47, %v11000_v13  ;;  %v6489_v38 = vsel %vm1095_vm6, %v6476_v4, %v6488_v56 }
0x3ce6   :  { %v6480_v16 = vrot.slane %v6449_v57, %v11000_v13 }
0x3ce8   :  { %v6490_v7 = vsel %vm1097_vm7, %v6480_v16, %v6489_v38 }
0x3ce9   :  { %v6491_v33 = vsel %vm1099_vm8, %v6484_v53, %v6490_v7 }
0x3cea   :  { %v6493_v1 = vsel %vm1102_vm9, %v6491_v33, -inf }
0x3ceb   :  { %6494 = vmax.xlane.f32.xlu1 %v6493_v1 }
0x3d74   :  { %v6495_v45 = vpop.xlane.xlu1 %6494 }
0x3d75   :  { %v6500_v41 = vrot.slane %v6495_v45, %v8939_v36  ;;  %v6504_v28 = vrot.slane %v6495_v45, %v11001_v30  ;;  %v6508_v34 = vrot.slane %v6495_v45, %v11002_v3  ;;  %v6512_v46 = vrot.slane %v6495_v45, %v11003_v31 }
0x3d76   :  { %v6516_v24 = vrot.slane %v6495_v45, %v11004_v9  ;;  %v6520_v8 = vrot.slane %v6495_v45, %v11005_v43  ;;  %v6524_v18 = vrot.slane %v6495_v45, %v11006_v61 }
0x3d77   :  { %v6537_v20 = vsub.f32 %v6413_v29, %v6500_v41  ;;  %v6538_v60 = vsub.f32 %v6414_v52, %v6504_v28  ;;  %v6539_v19 = vsub.f32 %v6415_v11, %v6508_v34  ;;  %v6540_v48 = vsub.f32 %v6416_v54, %v6512_v46  ;;  %v11007_v11 = vld [vmem:[#allocation50_spill] sm:$0xff] }
0x3d78   :  { %v6541_v32 = vsub.f32 %v6417_v50, %v6516_v24  ;;  %v6542_v29 = vsub.f32 %v6418_v17, %v6520_v8  ;;  %v6528_v63 = vrot.slane %v6495_v45, %v11007_v11  ;;  %v6543_v55 = vsub.f32 %v6419_v12, %v6524_v18 }
0x3d79   :  { %v6545_v21 = vmul.f32 1.442695, %v6537_v20  ;;  %v6547_v15 = vmul.f32 1.442695, %v6538_v60  ;;  %v6549_v10 = vmul.f32 1.442695, %v6539_v19 }
0x3d7a   :  { %v6551_v42 = vmul.f32 1.442695, %v6540_v48  ;;  %v6553_v52 = vmul.f32 1.442695, %v6541_v32  ;;  %v6555_v54 = vmul.f32 1.442695, %v6542_v29  ;;  %v6544_v50 = vsub.f32 %v6420_v59, %v6528_v63 }
0x3d7b   :  { %8127 = vpow2.f32 %v6545_v21  ;;  %v6557_v25 = vmul.f32 1.442695, %v6543_v55 }
0x3d7c   :  { %8129 = vpow2.f32 %v6547_v15  ;;  %v6559_v17 = vmul.f32 1.442695, %v6544_v50 }
0x3d7d   :  { %8131 = vpow2.f32 %v6549_v10 }
0x3d7e   :  { %8133 = vpow2.f32 %v6551_v42 }
0x3d7f   :  { %8135 = vpow2.f32 %v6553_v52 }
0x3d80   :  { %8137 = vpow2.f32 %v6555_v54 }
0x3d81   :  { %8139 = vpow2.f32 %v6557_v25 }
0x3d82   :  { %8141 = vpow2.f32 %v6559_v17 }
0x3d88   :  { %v10650_v51 = vpop.eup %8127 }
0x3d89   :  { %6570 = vperm.xlu0 %7859, %v10650_v51   ;;  %v10654_v58 = vpop.eup %8129 }
0x3d8a   :  { %v10657_v14 = vpop.eup %8131 }
0x3d8b   :  { %v10660_v35 = vpop.eup %8133 }
0x3d8c   :  { %v10663_v12 = vpop.eup %8135 }
0x3d8d   :  { %6573 = vperm.xlu0 %7859, %v10654_v58   ;;  %v8138_v39 = vpop.eup %8137 }
0x3d8e   :  { %v10666_v59 = vpop.eup %8139 }
0x3d8f   :  { %v10669_v6 = vpop.eup %8141 }
0x3d91   :  { %6576 = vperm.xlu0 %7859, %v10657_v14  }
0x3d95   :  { %6579 = vperm.xlu0 %7859, %v10660_v35  }
0x3d99   :  { %6582 = vperm.xlu0 %7859, %v10663_v12  }
0x3d9d   :  { %6585 = vperm.xlu0 %7859, %v8138_v39  }
0x3da1   :  { %6588 = vperm.xlu0 %7859, %v10666_v59  }
0x3da5   :  { %6591 = vperm.xlu0 %7859, %v10669_v6  }
0x3e04   :  { %v6571_v22 = vpop.permute.xlu0 %6570 }
0x3e05   :  { %v6596_v7 = vrot.slane %v6571_v22, %v11000_v13 }
0x3e08   :  { %v6574_v56 = vpop.permute.xlu0 %6573 }
0x3e09   :  { %v6600_v53 = vrot.slane %v6574_v56, %v11000_v13 }
0x3e0b   :  { %v6625_v41 = vsel %vm1087_vm2, %v6600_v53, %v6596_v7 }
0x3e0c   :  { %v6577_v47 = vpop.permute.xlu0 %6576 }
0x3e0d   :  { %v6604_v38 = vrot.slane %v6577_v47, %v11000_v13 }
0x3e0f   :  { %v6626_v34 = vsel %vm1089_vm3, %v6604_v38, %v6625_v41 }
0x3e10   :  { %v6580_v4 = vpop.permute.xlu0 %6579 }
0x3e11   :  { %v6608_v33 = vrot.slane %v6580_v4, %v11000_v13 }
0x3e13   :  { %v6627_v60 = vsel %vm1091_vm4, %v6608_v33, %v6626_v34 }
0x3e14   :  { %v6583_v57 = vpop.permute.xlu0 %6582 }
0x3e15   :  { %v6612_v1 = vrot.slane %v6583_v57, %v11000_v13 }
0x3e17   :  { %v6628_v21 = vsel %vm1093_vm5, %v6612_v1, %v6627_v60 }
0x3e18   :  { %v6586_v16 = vpop.permute.xlu0 %6585 }
0x3e19   :  { %v6616_v28 = vrot.slane %v6586_v16, %v11000_v13 }
0x3e1b   :  { %v6629_v19 = vsel %vm1095_vm6, %v6616_v28, %v6628_v21 }
0x3e1c   :  { %v6589_v45 = vpop.permute.xlu0 %6588 }
0x3e1d   :  { %v6620_v20 = vrot.slane %v6589_v45, %v11000_v13 }
0x3e1f   :  { %v6630_v24 = vsel %vm1097_vm7, %v6620_v20, %v6629_v19 }
0x3e20   :  { %v6592_v46 = vpop.permute.xlu0 %6591 }
0x3e21   :  { %v6624_v15 = vrot.slane %v6592_v46, %v11000_v13 }
0x3e23   :  { %v6631_v48 = vsel %vm1099_vm8, %v6624_v15, %v6630_v24 }
0x3e24   :  { %v6633_v10 = vsel %vm1102_vm9, %v6631_v48, 0.0 }
0x3e25   :  { %6634 = vadd.xlane.f32.xlu0 %v6633_v10 }
0x3eae   :  { %v6635_v8 = vpop.xlane.xlu0 %6634 }
0x3eaf   :  { %v6640_v32 = vrot.slane %v6635_v8, %v8939_v36  ;;  %v6644_v42 = vrot.slane %v6635_v8, %v11001_v30  ;;  %v6660_v18 = vrot.slane %v6635_v8, %v11005_v43  ;;  %v6648_v29 = vrot.slane %v6635_v8, %v11002_v3 }
0x3eb0   :  { %v6652_v52 = vrot.slane %v6635_v8, %v11003_v31  ;;  %v6656_v63 = vrot.slane %v6635_v8, %v11004_v9  ;;  %v6664_v54 = vrot.slane %v6635_v8, %v11006_v61  ;;  %v6668_v43 = vrot.slane %v6635_v8, %v11007_v11 }
0x3eb1   :  { %8143 = vrcp.f32 %v6640_v32 }
0x3eb2   :  { %8145 = vrcp.f32 %v6644_v42 }
0x3eb3   :  { %8147 = vrcp.f32 %v6660_v18 }
0x3eb4   :  { %8149 = vrcp.f32 %v6648_v29 }
0x3eb5   :  { %8151 = vrcp.f32 %v6652_v52 }
0x3eb6   :  { %8153 = vrcp.f32 %v6656_v63 }
0x3eb7   :  { %8155 = vrcp.f32 %v6664_v54 }
0x3eb8   :  { %8157 = vrcp.f32 %v6668_v43 }
0x3ebe   :  { %v8144_v55 = vpop.eup %8143 }
0x3ebf   :  { %v6678_v36 = vmul.f32 %v8144_v55, %v10650_v51  ;;  %v8146_v30 = vpop.eup %8145 }
0x3ec0   :  { %v8148_v50 = vpop.eup %8147  ;;  %v6680_v3 = vmul.f32 %v8146_v30, %v10654_v58 }
0x3ec1   :  { %6695 = vperm.xlu1 %7860, %v6678_v36   ;;  %v8150_v25 = vpop.eup %8149  ;;  %v6688_v31 = vmul.f32 %v8148_v50, %v8138_v39 }
0x3ec2   :  { %v6682_v9 = vmul.f32 %v8150_v25, %v10657_v14  ;;  %v8152_v17 = vpop.eup %8151 }
0x3ec3   :  { %6720 = vperm.xlu0 %7859, %v6688_v31   ;;  %v6684_v61 = vmul.f32 %v8152_v17, %v10660_v35  ;;  %v8154_v51 = vpop.eup %8153 }
0x3ec4   :  { %v6686_v22 = vmul.f32 %v8154_v51, %v10663_v12  ;;  %v8156_v56 = vpop.eup %8155 }
0x3ec5   :  { %6700 = vperm.xlu1 %7860, %v6680_v3   ;;  %v6690_v11 = vmul.f32 %v8156_v56, %v10666_v59  ;;  %v8158_v58 = vpop.eup %8157 }
0x3ec6   :  { %v6692_v39 = vmul.f32 %v8158_v58, %v10669_v6 }
0x3ec9   :  { %6705 = vperm.xlu1 %7860, %v6682_v9  }
0x3ecd   :  { %6710 = vperm.xlu1 %7860, %v6684_v61  }
0x3ed1   :  { %6715 = vperm.xlu1 %7860, %v6686_v22  }
0x3ed5   :  { %6725 = vperm.xlu1 %7860, %v6690_v11  }
0x3ed9   :  { %6730 = vperm.xlu1 %7860, %v6692_v39  }
0x3edd   :  { %7008 = vrot.lane.b32.xlu1 %v10548_v23, %s8589_s12 }
0x3ee1   :  { %7013 = vrot.lane.b32.xlu1 %v10570_v5, %s8589_s12 }
0x3f3c   :  { %v6696_v14 = vpop.permute.xlu1 %6695 }
0x3f3d   :  { %v6733_v35 = vmul.f32 %v10437_v37, %v6696_v14  ;;  %v6964_v19 = vrot.slane %v6696_v14, %v11000_v13 }
0x3f3e   :  { %v6721_v4 = vpop.permute.xlu0 %6720 }
0x3f3f   :  { %v6741_v47 = vsel %vm271_vm1, %v6733_v35, 0.0  ;;  %v6738_v6 = vmul.f32 %v10988_v49, %v6721_v4  ;;  %v6984_v9 = vrot.slane %v6721_v4, %v11000_v13 }
0x3f40   :  { %v6701_v12 = vpop.permute.xlu1 %6700  ;;  %v6742_v59 = vrot.slane %v6741_v47, 4 }
0x3f41   :  { %v6734_v57 = vmul.f32 %v10443_v40, %v6701_v12  ;;  %v6776_v37 = vsel %vm271_vm1, %v6738_v6, 0.0  ;;  %v6968_v20 = vrot.slane %v6701_v12, %v11000_v13 }
0x3f42   :  { %v6743_v7 = vadd.f32 %v6742_v59, %v6741_v47  ;;  %v6777_v28 = vrot.slane %v6776_v37, 4 }
0x3f43   :  { %v6748_v16 = vsel %vm271_vm1, %v6734_v57, 0.0  ;;  %v6993_v42 = vsel %vm1087_vm2, %v6968_v20, %v6964_v19 }
0x3f44   :  { %v6749_v53 = vrot.slane %v6748_v16, 4  ;;  %v6706_v38 = vpop.permute.xlu1 %6705  ;;  %v6744_v34 = vrot.slane %v6743_v7, 2  ;;  %v6778_v8 = vadd.f32 %v6777_v28, %v6776_v37 }
0x3f45   :  { %v6735_v23 = vmul.f32 %v10987_v2, %v6706_v38  ;;  %v6972_v2 = vrot.slane %v6706_v38, %v11000_v13 }
0x3f46   :  { %v6750_v33 = vadd.f32 %v6749_v53, %v6748_v16  ;;  %v6745_v32 = vadd.f32 %v6744_v34, %v6743_v7  ;;  %v6779_v31 = vrot.slane %v6778_v8, 2 }
0x3f47   :  { %v6755_v5 = vsel %vm271_vm1, %v6735_v23, 0.0  ;;  %v6994_v52 = vsel %vm1089_vm3, %v6972_v2, %v6993_v42 }
0x3f48   :  { %v6756_v1 = vrot.slane %v6755_v5, 4  ;;  %v6711_v45 = vpop.permute.xlu1 %6710  ;;  %v6751_v60 = vrot.slane %v6750_v33, 2  ;;  %v6746_v61 = vrot.slane %v6745_v32, 1  ;;  %v6780_v4 = vadd.f32 %v6779_v31, %v6778_v8 }
0x3f49   :  { %v6736_v41 = vmul.f32 %v10465_v62, %v6711_v45  ;;  %v6976_v24 = vrot.slane %v6711_v45, %v11000_v13 }
0x3f4a   :  { %v6757_v40 = vadd.f32 %v6756_v1, %v6755_v5  ;;  %v6752_v29 = vadd.f32 %v6751_v60, %v6750_v33  ;;  %v6781_v45 = vrot.slane %v6780_v4, 1 }
0x3f4b   :  { %v6762_v49 = vsel %vm271_vm1, %v6736_v41, 0.0  ;;  %v6995_v30 = vsel %vm1091_vm4, %v6976_v24, %v6994_v52 }
0x3f4c   :  { %v6763_v21 = vrot.slane %v6762_v49, 4  ;;  %v6716_v46 = vpop.permute.xlu1 %6715  ;;  %v6758_v15 = vrot.slane %v6757_v40, 2  ;;  %v6753_v51 = vrot.slane %v6752_v29, 1 }
0x3f4d   :  { %v6737_v48 = vmul.f32 %v10989_v26, %v6716_v46  ;;  %v6980_v10 = vrot.slane %v6716_v46, %v11000_v13  ;;  %v6782_v46 = vadd.f32 %v6781_v45, %v6780_v4 }
0x3f4e   :  { %v6764_v62 = vadd.f32 %v6763_v21, %v6762_v49  ;;  %v6759_v36 = vadd.f32 %v6758_v15, %v6757_v40  ;;  %v6754_v6 = vadd.f32 %v6753_v51, %v6752_v29 }
0x3f4f   :  { %v6769_v18 = vsel %vm271_vm1, %v6737_v48, 0.0  ;;  %v6996_v3 = vsel %vm1093_vm5, %v6980_v10, %v6995_v30 }
0x3f50   :  { %v6765_v63 = vrot.slane %v6764_v62, 2  ;;  %v6770_v55 = vrot.slane %v6769_v18, 4  ;;  %v6726_v54 = vpop.permute.xlu1 %6725  ;;  %v6760_v58 = vrot.slane %v6759_v36, 1  ;;  %v6997_v14 = vsel %vm1095_vm6, %v6984_v9, %v6996_v3 }
0x3f51   :  { %v6739_v26 = vmul.f32 %v10991_v27, %v6726_v54  ;;  %v6988_v25 = vrot.slane %v6726_v54, %v11000_v13 }
0x3f52   :  { %v6766_v50 = vadd.f32 %v6765_v63, %v6764_v62  ;;  %v6771_v43 = vadd.f32 %v6770_v55, %v6769_v18 }
0x3f53   :  { %v6783_v17 = vsel %vm271_vm1, %v6739_v26, 0.0  ;;  %v6998_v57 = vsel %vm1097_vm7, %v6988_v25, %v6997_v14 }
0x3f54   :  { %v6772_v22 = vrot.slane %v6771_v43, 2  ;;  %v6784_v56 = vrot.slane %v6783_v17, 4  ;;  %v6731_v11 = vpop.permute.xlu1 %6730  ;;  %v6767_v35 = vrot.slane %v6766_v50, 1 }
0x3f55   :  { %v6740_v39 = vmul.f32 %v10990_v44, %v6731_v11  ;;  %v6992_v27 = vrot.slane %v6731_v11, %v11000_v13  ;;  %v6761_v44 = vadd.f32 %v6760_v58, %v6759_v36  ;;  %v6747_v13 = vadd.f32 %v6746_v61, %v6745_v32 }
0x3f56   :  { %v6773_v47 = vadd.f32 %v6772_v22, %v6771_v43  ;;  %v6785_v12 = vadd.f32 %v6784_v56, %v6783_v17  ;;  %v6768_v5 = vadd.f32 %v6767_v35, %v6766_v50 }
0x3f57   :  { %v6790_v59 = vsel %vm271_vm1, %v6740_v39, 0.0  ;;  %v6999_v16 = vsel %vm1099_vm8, %v6992_v27, %v6998_v57  ;;  %v6875_v41 = vsel %vm1087_vm2, %v6754_v6, %v6747_v13 }
0x3f58   :  { %v6774_v53 = vrot.slane %v6773_v47, 1  ;;  %v6786_v38 = vrot.slane %v6785_v12, 2  ;;  %v6791_v23 = vrot.slane %v6790_v59, 4  ;;  %v7009_v7 = vpop.permute.xlu1 %7008  ;;  %7001 = vst.msk [vmem:[#allocation22] sm:$0xff] %vm1102_vm9, %v6999_v16  ;;  %v6876_v20 = vsel %vm1089_vm3, %v6761_v44, %v6875_v41 }
0x3f59   :  { %7011 = vst.msk [vmem:[#allocation25] sm:$0xff] %vm271_vm1, %v7009_v7  ;;  %v6877_v49 = vsel %vm1091_vm4, %v6768_v5, %v6876_v20 }
0x3f5a   :  { %v6787_v37 = vadd.f32 %v6786_v38, %v6785_v12  ;;  %v6792_v33 = vadd.f32 %v6791_v23, %v6790_v59  ;;  %v6775_v1 = vadd.f32 %v6774_v53, %v6773_v47 }
0x3f5c   :  { %v6788_v40 = vrot.slane %v6787_v37, 1  ;;  %v6793_v28 = vrot.slane %v6792_v33, 2  ;;  %v7014_v34 = vpop.permute.xlu1 %7013  ;;  %v6878_v21 = vsel %vm1093_vm5, %v6775_v1, %v6877_v49 }
0x3f5d   :  { %7017 = vst.msk [vmem:[#allocation25 + $0x8] sm:$0xff] %vm271_vm1, %v7014_v34  ;;  %v6879_v24 = vsel %vm1095_vm6, %v6782_v46, %v6878_v21 }
0x3f5e   :  { %v6794_v60 = vadd.f32 %v6793_v28, %v6792_v33  ;;  %v6789_v2 = vadd.f32 %v6788_v40, %v6787_v37 }
0x3f60   :  { %v6795_v19 = vrot.slane %v6794_v60, 1  ;;  %v6880_v48 = vsel %vm1097_vm7, %v6789_v2, %v6879_v24 }
0x3f62   :  { %v6796_v15 = vadd.f32 %v6795_v19, %v6794_v60 }
0x3f64   :  { %v6881_v62 = vsel %vm1099_vm8, %v6796_v15, %v6880_v48 }
0x3f65   :  { %7833 = vmatmul.mubr.msk.f32.vlgmr.msra.gmra.mxu1 %vm271_vm1, %v6881_v62 }
0x3f66   :  { %8502 = shalt.err (!%p8499_p8)
}
0x3f67   :  { %7041 = dma.vmem_to_hbm [thread:$0]  %s7036_s0, 256, %s10785_s18, [#allocation24], %s8572_s26, %s8572_s26, %s8573_s27  }
0x3f68   :  { %s8511_s14 = scalar_lea.vmem %s7027_s3, 128  ;;  %p8516_p10 = scmp.lt.s32.totalorder %s7027_s3, %s7027_s3 }
0x3f69   :  { %p8512_p9 = scmp.ne.s32.totalorder %s7027_s3, %s8511_s14  ;;  %p8517_p11 = scmp.lt.s32.totalorder %s8511_s14, %s8511_s14 }
0x3f6b   :  { %p8518_p12 = por %p8517_p11, %p8516_p10 }
0x3f6d   :  { %p8519_p13 = pnand %p8518_p12, %p8512_p9 }
0x3f6f   :  { %8522 = shalt.err (!%p8519_p13)
}
0x3f70   :  { %7029 = dma.vmem_to_hbm [thread:$0]  %s7027_s3, 128, %s10784_s17, [#allocation4]  }
0x3f71   :  { %s8592_s25 = smov [#allocation25]  }
0x3f72   :  { %s7047_s30 = sshll.u32 %s8592_s25, 4  ;;  %s7048_s30 = int_to_ptr.vmem [resolvable:$true] %s7047_s30 }
0x3f73   :  { %s8531_s9 = scalar_lea.vmem %s7048_s30, 256  ;;  %p8536_p1 = scmp.lt.s32.totalorder %s7048_s30, %s7048_s30 }
0x3f74   :  { %p8532_p0 = scmp.ne.s32.totalorder %s7048_s30, %s8531_s9  ;;  %p8537_p2 = scmp.lt.s32.totalorder %s8531_s9, %s8531_s9 }
0x3f76   :  { %p8538_p3 = por %p8537_p2, %p8536_p1 }
0x3f78   :  { %p8539_p4 = pnand %p8538_p3, %p8532_p0 }
0x3f7a   :  { %8542 = shalt.err (!%p8539_p4)
}
0x3f7b   :  { %7053 = dma.vmem_to_hbm [thread:$0]  %s7048_s30, 256, %s10786_s19, [#allocation24], %s8572_s26, %s8572_s26, %s8573_s27  }
0x4025   :  { %v6950_v10 = vpop.f32.mrf.mxu1 }
0x4026   :  { %v6951_v8 = vadd.f32 %v6950_v10, %v10587_v0 }
0x4027   :  { %v7834_v32 = vpop.f32.mrf.mxu1 }
0x4028   :  { %8159 = vtanh.f32 %v6951_v8 }
0x4035   :  { %v8160_v42 = vpop.eup %8159 }
0x4036   :  { %6960 = vst.msk [vmem:[%s10783_s16 + $0x28] sm:$0xff] %vm271_vm1, %v8160_v42 }
0x4037   :  { %8565 = dma.done.wait [#allocation4], 128  }
0x4038   :  { %8566 = vsyncadd [#allocation4], 4294967168 }
0x4039   :  { %8567 = dma.done.wait [#allocation24], 512  }
0x403a   :  { %8568 = vsyncadd [#allocation24], 4294966784 }
0x403b   :  { %7065 = vsyncpa [#allocation3], 1 }
0x403c   :  { %7066 = vsyncpa [#allocation6], 1 }
0x403d   :  { %7067 = vsyncpa [#allocation9], 1 }
0x403e   :  { %7068 = vsyncpa [#allocation12], 1 }
0x403f   :  { %7069 = vsyncpa [#allocation15], 1 }
0x4040   :  { %7070 = vsyncpa [#allocation18], 1 }
0x4041   :  { %7071 = vsyncpa [#allocation21], 1 }
0x4042   :  { %7072 = vsyncpa [#allocation4], 1 }
0x4043   :  { %7073 = vsyncpa [#allocation24], 1 }

</bundles_post_ra>
